<compile_context>
chip_gen: v7x
topology: tpu7x:2x2x1
jax: 0.10.0
libtpu: 0.0.40
codegen_flags: <defaults>
</compile_context>

<pallas_src>
import functools

import jax
import jax.numpy as jnp
from jax.experimental import pallas as pl
from jax.experimental.pallas import tpu as pltpu

LN_EPS = 1e-5                 # torch nn.LayerNorm default
NEG_FILL = -100000000.0       # torch masked_fill_ value (applied BEFORE /sqrt(dk))
PARAM_DTYPE = jnp.bfloat16    # bf16 MXU path, f32 accumulate; jnp.float32 for
                              # bit-closer parity with the f32 torch reference.
APPROX_RECIP = True           # EUP reciprocal for softmax denom; False = exact.


def _row_tile(rows):
    for t in (1024, 512, 256, 128, 64, 32, 16, 8):
        if rows % t == 0:
            return t
    return rows


def _apply_act(y, act):
    if act == "leaky_relu":
        return jnp.where(y >= 0.0, y, 0.01 * y)          # torch LeakyReLU default
    if act == "gelu":
        return 0.5 * y * (1.0 + jax.lax.erf(y * (2.0 ** -0.5)))  # exact GELU
    if act == "sigmoid":
        return 1.0 / (1.0 + jnp.exp(-y))
    return y


def _layernorm_f32(x_f32, g_ref, b_ref):
    mu = jnp.mean(x_f32, axis=-1, keepdims=True)
    xc = x_f32 - mu
    var = jnp.mean(xc * xc, axis=-1, keepdims=True)
    n = xc * jax.lax.rsqrt(var + LN_EPS)
    return n * g_ref[...].astype(jnp.float32) + b_ref[...].astype(jnp.float32)


def _softmax_rows(s_f32):
    s = s_f32 - jnp.max(s_f32, axis=-1, keepdims=True)
    p = jnp.exp(s)
    denom = jnp.sum(p, axis=-1, keepdims=True)
    if APPROX_RECIP:
        return p * pl.reciprocal(denom, approx=True)
    return p / denom


def _mha_accumulate(resid_f32, q_src, kv_src, v_src, keep, fill,
                    wq, wk, wv, wo, n_heads, dh, cdt):
    """resid + MultiHead(Q=q_src, K=kv_src, V=v_src) @ Wo, all f32 accumulate.

    keep (S,1) holds {0, 1/sqrt(dh)}: the per-QUERY-row mask and the score
    scale folded together (row mask commutes through Q K^T, so one (S,H)
    multiply replaces n_heads (S,S) ones).  fill (S,1) holds
    {0, NEG_FILL/sqrt(dh)} and is added to score rows -- exactly
    (s*(1-m) + m*NEG_FILL)/sqrt(dh) as in the torch reference.
    """
    q = (jnp.dot(q_src, wq, preferred_element_type=jnp.float32) * keep).astype(cdt)
    k = jnp.dot(kv_src, wk, preferred_element_type=jnp.float32).astype(cdt)
    v = jnp.dot(v_src, wv, preferred_element_type=jnp.float32).astype(cdt)
    out = resid_f32
    for h in range(n_heads):                              # static unrolled heads
        lo = h * dh
        s = jax.lax.dot_general(q[:, lo:lo + dh], k[:, lo:lo + dh],
                                (((1,), (1,)), ((), ())),
                                preferred_element_type=jnp.float32)     # (S,S)
        p = _softmax_rows(s + fill)
        ctx = jnp.dot(p.astype(cdt), v[:, lo:lo + dh],
                      preferred_element_type=jnp.float32)               # (S,dh)
        # per-head partial output projection: no lane concat of sub-128 slabs
        out = out + jnp.dot(ctx.astype(cdt), wo[lo:lo + dh, :],
                            preferred_element_type=jnp.float32)
    return out


def _ffn_epilogue(z_f32, ln2g_ref, ln2b_ref, w1_ref, b1_ref, w2_ref, b2_ref,
                  act, cdt):
    n = _layernorm_f32(z_f32, ln2g_ref, ln2b_ref).astype(cdt)
    h = jnp.dot(n, w1_ref[...], preferred_element_type=jnp.float32)
    h = _apply_act(h + b1_ref[...].astype(jnp.float32), act).astype(cdt)
    y = jnp.dot(h, w2_ref[...], preferred_element_type=jnp.float32)
    return y + b2_ref[...].astype(jnp.float32) + z_f32


# ------------------ Fused EncoderBlock (LN+MHA+res+LN+FFN+res) ------------------
def _make_encoder_kernel(n_heads, dh, act):
    def kernel(x_ref, keep_ref, fill_ref, ln1g_ref, ln1b_ref,
               wq_ref, wk_ref, wv_ref, wo_ref,
               ln2g_ref, ln2b_ref, fc1w_ref, fc1b_ref, fc2w_ref, fc2b_ref,
               o_ref):
        x = x_ref[0]                                   # (S, H)
        cdt = x.dtype
        xf = x.astype(jnp.float32)
        keep = keep_ref[0]                             # (S, 1) f32
        fill = fill_ref[0]                             # (S, 1) f32
        zn = _layernorm_f32(xf, ln1g_ref, ln1b_ref).astype(cdt)
        z = _mha_accumulate(xf, zn, zn, zn, keep, fill,
                            wq_ref[...], wk_ref[...], wv_ref[...], wo_ref[...],
                            n_heads, dh, cdt)          # x + attn(...)   (f32)
        y = _ffn_epilogue(z, ln2g_ref, ln2b_ref, fc1w_ref, fc1b_ref,
                          fc2w_ref, fc2b_ref, act, cdt)
        o_ref[0] = y.astype(o_ref.dtype)
    return kernel


# ----------- Fused DualEncoderBlock (self-attn(y), cross-attn(x), FFN) -----------
def _make_dual_kernel(n_heads, dh, act):
    def kernel(x_ref, y_ref, keep_ref, fill_ref, ln1g_ref, ln1b_ref,
               wq_ref, wk_ref, wv_ref, wo_ref,
               ln2g_ref, ln2b_ref, fc1w_ref, fc1b_ref, fc2w_ref, fc2b_ref,
               o_ref):
        x = x_ref[0]
        ysrc = y_ref[0]
        cdt = x.dtype
        xf = x.astype(jnp.float32)
        yf = ysrc.astype(jnp.float32)
        keep = keep_ref[0]
        fill = fill_ref[0]
        wq = wq_ref[...]; wk = wk_ref[...]; wv = wv_ref[...]; wo = wo_ref[...]
        zy_n = _layernorm_f32(yf, ln1g_ref, ln1b_ref).astype(cdt)
        zx_n = _layernorm_f32(xf, ln1g_ref, ln1b_ref).astype(cdt)
        # z_y = y + selfattn(LN(y)); cross-attn uses V = z_y (NOT normalized)
        z_y = _mha_accumulate(yf, zy_n, zy_n, zy_n, keep, fill,
                              wq, wk, wv, wo, n_heads, dh, cdt)
        z = _mha_accumulate(xf, zx_n, zx_n, z_y.astype(cdt), keep, fill,
                            wq, wk, wv, wo, n_heads, dh, cdt)
        out = _ffn_epilogue(z, ln2g_ref, ln2b_ref, fc1w_ref, fc1b_ref,
                            fc2w_ref, fc2b_ref, act, cdt)
        o_ref[0] = out.astype(o_ref.dtype)
    return kernel


# ------------------------------- call wrappers -------------------------------
def _const_spec(shape):
    return pl.BlockSpec(shape, lambda b: (0,) * len(shape))


def _block_weight_specs(p, H):
    H4 = p["fc1_w"].shape[1]
    specs = [
        _const_spec((1, H)), _const_spec((1, H)),          # ln1 g, b
        _const_spec((H, H)), _const_spec((H, H)),          # wq, wk
        _const_spec((H, H)), _const_spec((H, H)),          # wv, wo
        _const_spec((1, H)), _const_spec((1, H)),          # ln2 g, b
        _const_spec((H, H4)), _const_spec((1, H4)),        # fc1 w, b
        _const_spec((H4, H)), _const_spec((1, H)),         # fc2 w, b
    ]
    args = [
        p["ln1_g"].reshape(1, H), p["ln1_b"].reshape(1, H),
        p["wq"], p["wk"], p["wv"], p["wo"],
        p["ln2_g"].reshape(1, H), p["ln2_b"].reshape(1, H),
        p["fc1_w"], p["fc1_b"].reshape(1, H4),
        p["fc2_w"], p["fc2_b"].reshape(1, H),
    ]
    return specs, args


def pallas_encoder_block(x, keep, fill, p, n_heads, act):
    B, S, H = x.shape
    dh = H // n_heads
    wspecs, wargs = _block_weight_specs(p, H)
    in_specs = [
        pl.BlockSpec((1, S, H), lambda b: (b, 0, 0)),
        pl.BlockSpec((1, S, 1), lambda b: (b, 0, 0)),
        pl.BlockSpec((1, S, 1), lambda b: (b, 0, 0)),
    ] + wspecs
    return pl.pallas_call(
        _make_encoder_kernel(n_heads, dh, act),
        out_shape=jax.ShapeDtypeStruct((B, S, H), x.dtype),
        grid=(B,),
        in_specs=in_specs,
        out_specs=pl.BlockSpec((1, S, H), lambda b: (b, 0, 0)),
        compiler_params=pltpu.CompilerParams(dimension_semantics=("parallel",)),
    )(x, keep, fill, *wargs)


def pallas_dual_block(x, y, keep, fill, p, n_heads, act):
    B, S, H = x.shape
    dh = H // n_heads
    wspecs, wargs = _block_weight_specs(p, H)
    in_specs = [
        pl.BlockSpec((1, S, H), lambda b: (b, 0, 0)),
        pl.BlockSpec((1, S, H), lambda b: (b, 0, 0)),
        pl.BlockSpec((1, S, 1), lambda b: (b, 0, 0)),
        pl.BlockSpec((1, S, 1), lambda b: (b, 0, 0)),
    ] + wspecs
    return pl.pallas_call(
        _make_dual_kernel(n_heads, dh, act),
        out_shape=jax.ShapeDtypeStruct((B, S, H), x.dtype),
        grid=(B,),
        in_specs=in_specs,
        out_specs=pl.BlockSpec((1, S, H), lambda b: (b, 0, 0)),
        compiler_params=pltpu.CompilerParams(dimension_semantics=("parallel",)),
    )(x, y, keep, fill, *wargs)


# ----------------- Fused generator (LN + Linear + Sigmoid) -----------------
def _gen_kernel(x_ref, g_ref, b_ref, w_ref, bias_ref, o_ref):
    x = x_ref[...]
    cdt = x.dtype
    xf = x.astype(jnp.float32)
    n = _layernorm_f32(xf, g_ref, b_ref).astype(cdt)
    y = jnp.dot(n, w_ref[...], preferred_element_type=jnp.float32)
    y = y + bias_ref[...].astype(jnp.float32)
    y = 1.0 / (1.0 + jnp.exp(-y))
    o_ref[...] = y.astype(o_ref.dtype)


def pallas_generator(x, ln_g, ln_b, w, b):
    B, S, H = x.shape
    O = w.shape[1]
    R = B * S
    TR = _row_tile(R)
    x2 = x.reshape(R, H)
    # TODO(synk): for production sizes pad O to a multiple of 128 (lane-dense
    # stores on v5e) and raise vmem_limit_bytes for larger row tiles.
    out = pl.pallas_call(
        _gen_kernel,
        out_shape=jax.ShapeDtypeStruct((R, O), jnp.float32),
        grid=(R // TR,),
        in_specs=[
            pl.BlockSpec((TR, H), lambda r: (r, 0)),
            pl.BlockSpec((1, H), lambda r: (0, 0)),
            pl.BlockSpec((1, H), lambda r: (0, 0)),
            pl.BlockSpec((H, O), lambda r: (0, 0)),
            pl.BlockSpec((1, O), lambda r: (0, 0)),
        ],
        out_specs=pl.BlockSpec((TR, O), lambda r: (r, 0)),
        compiler_params=pltpu.CompilerParams(dimension_semantics=("parallel",)),
    )(x2, ln_g.reshape(1, H), ln_b.reshape(1, H), w, b.reshape(1, O))
    return out.reshape(B, S, O)


# ------------------------------ Model forward --------------------------------
def model_forward(params, q, r, pid, maskf, *, n_heads, act):
    B, S = q.shape
    H = params["emb_q"].shape[1]
    dh = H // n_heads
    inv_sqrt_dk = 1.0 / float(dh) ** 0.5

    pos = jnp.arange(S, dtype=jnp.int32)
    # embedding gathers are glue (plain JAX)
    e_q = jnp.take(params["emb_q"], q, axis=0)
    e_r = jnp.take(params["emb_r"], r, axis=0)
    e_pid = jnp.take(params["emb_pid"], pid, axis=0)
    e_pos = jnp.take(params["emb_p"], pos, axis=0)[None, :, :]
    q_emb = e_q + e_pos + e_pid
    qa_emb = e_q + e_r + e_pos + e_pid

    # torch masks QUERY rows (mask.unsqueeze(-1).expand(B,S,S)).  Fold both the
    # row mask and the 1/sqrt(dk) scale into per-row factors:
    #   keep in {0, 1/sqrt(dk)} scales Q rows; fill in {0, NEG_FILL/sqrt(dk)}
    #   is added to score rows -- exactly (s*(1-m) + m*NEG_FILL)/sqrt(dk).
    keep = ((1.0 - maskf) * inv_sqrt_dk).astype(jnp.float32)        # (B,S,1)
    fill = (maskf * (NEG_FILL * inv_sqrt_dk)).astype(jnp.float32)   # (B,S,1)

    # The torch forward runs self.q_encoder on BOTH streams (self.qa_encoder is
    # created but never used) -> stack the streams on the batch axis and run
    # the shared-weight encoder stack once: half the launches, 2x grid steps.
    xy = jnp.concatenate([q_emb, qa_emb], axis=0)                   # (2B,S,H)
    keep2 = jnp.concatenate([keep, keep], axis=0)
    fill2 = jnp.concatenate([fill, fill], axis=0)
    for blk in params["q_encoder"]:
        xy = pallas_encoder_block(xy, keep2, fill2, blk, n_heads, act)
    x_t, y_t = xy[:B], xy[B:]

    # torch: `for block in kr_encoder: z, _ = block(x_t, y_t, mask)` -- z is
    # overwritten every iteration, so only the LAST block affects the output.
    z = pallas_dual_block(x_t, y_t, keep, fill, params["kr_encoder"][-1],
                          n_heads, act)

    return pallas_generator(z, params["gen_ln_g"], params["gen_ln_b"],
                            params["gen_w"], params["gen_b"])


# --------------------------- Parameter construction ---------------------------
def _nrm(key, shape, scale=0.02):
    return (scale * jax.random.normal(key, shape)).astype(PARAM_DTYPE)


def init_block_params(key, H):
    ks = jax.random.split(key, 8)
    ones = jnp.ones((H,), PARAM_DTYPE)
    zeros = jnp.zeros((H,), PARAM_DTYPE)
    return {
        "wq": _nrm(ks[0], (H, H)), "wk": _nrm(ks[1], (H, H)),
        "wv": _nrm(ks[2], (H, H)), "wo": _nrm(ks[3], (H, H)),
        "ln1_g": ones, "ln1_b": zeros,
        "fc1_w": _nrm(ks[4], (H, 4 * H)), "fc1_b": _nrm(ks[5], (4 * H,)),
        "fc2_w": _nrm(ks[6], (4 * H, H)), "fc2_b": _nrm(ks[7], (H,)),
        "ln2_g": ones, "ln2_b": zeros,
    }


def init_params(key, num_q, num_r, num_pid, H, output_size, num_encoder, max_seq_len):
    ks = jax.random.split(key, 6 + 2 * num_encoder)
    return {
        "emb_q": _nrm(ks[0], (num_q, H), 0.1),
        "emb_r": _nrm(ks[1], (num_r + 2, H), 0.1),
        "emb_pid": _nrm(ks[2], (num_pid, H), 0.1),
        "emb_p": _nrm(ks[3], (max_seq_len, H), 0.1),
        "q_encoder": [init_block_params(ks[6 + i], H) for i in range(num_encoder)],
        # qa_encoder params omitted: created in torch __init__ but unused in forward
        "kr_encoder": [init_block_params(ks[6 + num_encoder + i], H)
                       for i in range(num_encoder)],
        "gen_ln_g": jnp.ones((H,), PARAM_DTYPE),
        "gen_ln_b": jnp.zeros((H,), PARAM_DTYPE),
        "gen_w": _nrm(ks[4], (H, output_size)),
        "gen_b": _nrm(ks[5], (output_size,)),
    }


# ----------------------------------- Main -------------------------------------
if __name__ == "__main__":
    B, S, H = 2, 8, 32
    NUM_Q, NUM_R, NUM_PID = 20, 2, 10
    NUM_HEAD, NUM_ENCODER, MAX_SEQ_LEN, OUTPUT_SIZE = 4, 2, 16, 16
    USE_LEAKYRELU = True

    key = jax.random.PRNGKey(0)
    kp, kq, kr, kpid = jax.random.split(key, 4)

    params = init_params(kp, NUM_Q, NUM_R, NUM_PID, H, OUTPUT_SIZE,
                         NUM_ENCODER, MAX_SEQ_LEN)

    q = jax.random.randint(kq, (B, S), 0, NUM_Q, dtype=jnp.int32)
    r = jax.random.randint(kr, (B, S), 0, NUM_R + 2, dtype=jnp.int32)
    pid = jax.random.randint(kpid, (B, S), 0, NUM_PID, dtype=jnp.int32)
    # mask[b, i] == True -> whole attention row i masked (as in the torch expand)
    lengths = jnp.array([6, 5], dtype=jnp.int32)
    mask = jnp.arange(S, dtype=jnp.int32)[None, :] >= lengths[:, None]      # (B, S)
    maskf = mask.astype(jnp.float32)[:, :, None]                            # (B, S, 1)

    fwd = jax.jit(functools.partial(
        model_forward, n_heads=NUM_HEAD,
        act="leaky_relu" if USE_LEAKYRELU else "gelu"))

    y_hat = fwd(params, q, r, pid, maskf)
    y_hat = jax.block_until_ready(y_hat)
    assert y_hat.shape == (B, S, OUTPUT_SIZE)
    assert bool(jnp.all(jnp.isfinite(y_hat)))
    print("KERNEL_OK")
</pallas_src>

<mosaic_0001>
module attributes {stable_mosaic.version = 11 : i64} {
  func.func @_gen_kernel(%arg0: i32, %arg1: memref<16x32xbf16, #tpu.memory_space<vmem>>, %arg2: memref<1x32xbf16, #tpu.memory_space<vmem>>, %arg3: memref<1x32xbf16, #tpu.memory_space<vmem>>, %arg4: memref<32x16xbf16, #tpu.memory_space<vmem>>, %arg5: memref<1x16xbf16, #tpu.memory_space<vmem>>, %arg6: memref<16x16xf32, #tpu.memory_space<vmem>>) attributes {dimension_semantics = [#tpu.dimension_semantics<parallel>], iteration_bounds = array<i64: 1>, scalar_prefetch = 0 : i64, scratch_operands = 0 : i64, tpu.core_type = #tpu.core_type<tc>, window_params = [{transform_indices = @transform_0, window_bounds = array<i64: 16, 32>}, {pipeline_mode = #tpu.pipeline_mode<synchronous>, transform_indices = @transform_1, window_bounds = array<i64: 1, 32>}, {pipeline_mode = #tpu.pipeline_mode<synchronous>, transform_indices = @transform_2, window_bounds = array<i64: 1, 32>}, {pipeline_mode = #tpu.pipeline_mode<synchronous>, transform_indices = @transform_3, window_bounds = array<i64: 32, 16>}, {pipeline_mode = #tpu.pipeline_mode<synchronous>, transform_indices = @transform_4, window_bounds = array<i64: 1, 16>}, {transform_indices = @transform_5, window_bounds = array<i64: 16, 16>}]} {
    %c0 = arith.constant 0 : index
    %c0_0 = arith.constant 0 : index
    %0 = vector.load %arg1[%c0, %c0_0] : memref<16x32xbf16, #tpu.memory_space<vmem>>, vector<16x32xbf16>
    %1 = arith.extf %0 : vector<16x32xbf16> to vector<16x32xf32>
    %cst = arith.constant dense<0.000000e+00> : vector<16xf32>
    %2 = vector.multi_reduction <add>, %1, %cst [1] : vector<16x32xf32> to vector<16xf32>
    %3 = vector.shape_cast %2 : vector<16xf32> to vector<16x1xf32>
    %cst_1 = arith.constant 3.200000e+01 : f32
    %4 = vector.broadcast %cst_1 : f32 to vector<16x1xf32>
    %5 = arith.divf %3, %4 : vector<16x1xf32>
    %6 = vector.broadcast %5 : vector<16x1xf32> to vector<16x32xf32>
    %7 = arith.subf %1, %6 : vector<16x32xf32>
    %8 = arith.mulf %7, %7 : vector<16x32xf32>
    %cst_2 = arith.constant dense<0.000000e+00> : vector<16xf32>
    %9 = vector.multi_reduction <add>, %8, %cst_2 [1] : vector<16x32xf32> to vector<16xf32>
    %10 = vector.shape_cast %9 : vector<16xf32> to vector<16x1xf32>
    %cst_3 = arith.constant 3.200000e+01 : f32
    %11 = vector.broadcast %cst_3 : f32 to vector<16x1xf32>
    %12 = arith.divf %10, %11 : vector<16x1xf32>
    %cst_4 = arith.constant 9.99999974E-6 : f32
    %13 = vector.broadcast %cst_4 : f32 to vector<16x1xf32>
    %14 = arith.addf %12, %13 : vector<16x1xf32>
    %15 = math.rsqrt %14 : vector<16x1xf32>
    %16 = vector.broadcast %15 : vector<16x1xf32> to vector<16x32xf32>
    %17 = arith.mulf %7, %16 : vector<16x32xf32>
    %c0_5 = arith.constant 0 : index
    %c0_6 = arith.constant 0 : index
    %18 = vector.load %arg2[%c0_5, %c0_6] : memref<1x32xbf16, #tpu.memory_space<vmem>>, vector<1x32xbf16>
    %19 = arith.extf %18 : vector<1x32xbf16> to vector<1x32xf32>
    %20 = vector.broadcast %19 : vector<1x32xf32> to vector<16x32xf32>
    %21 = arith.mulf %17, %20 : vector<16x32xf32>
    %c0_7 = arith.constant 0 : index
    %c0_8 = arith.constant 0 : index
    %22 = vector.load %arg3[%c0_7, %c0_8] : memref<1x32xbf16, #tpu.memory_space<vmem>>, vector<1x32xbf16>
    %23 = arith.extf %22 : vector<1x32xbf16> to vector<1x32xf32>
    %24 = vector.broadcast %23 : vector<1x32xf32> to vector<16x32xf32>
    %25 = arith.addf %21, %24 : vector<16x32xf32>
    %26 = arith.truncf %25 : vector<16x32xf32> to vector<16x32xbf16>
    %c0_9 = arith.constant 0 : index
    %c0_10 = arith.constant 0 : index
    %27 = vector.load %arg4[%c0_9, %c0_10] : memref<32x16xbf16, #tpu.memory_space<vmem>>, vector<32x16xbf16>
    %cst_11 = arith.constant dense<0.000000e+00> : vector<16x16xf32>
    %28 = tpu.matmul %26, %27, %cst_11 {dimension_numbers = #tpu.dot_dimension_numbers<[1], [0], [0], [1], [0, 0, 1, 1], [], []>} : vector<16x32xbf16>, vector<32x16xbf16>, vector<16x16xf32> -> vector<16x16xf32>
    %c0_12 = arith.constant 0 : index
    %c0_13 = arith.constant 0 : index
    %29 = vector.load %arg5[%c0_12, %c0_13] : memref<1x16xbf16, #tpu.memory_space<vmem>>, vector<1x16xbf16>
    %30 = arith.extf %29 : vector<1x16xbf16> to vector<1x16xf32>
    %31 = vector.broadcast %30 : vector<1x16xf32> to vector<16x16xf32>
    %32 = arith.addf %28, %31 : vector<16x16xf32>
    %cst_14 = arith.constant 0.000000e+00 : f32
    %33 = vector.broadcast %cst_14 : f32 to vector<16x16xf32>
    %34 = arith.subf %33, %32 : vector<16x16xf32>
    %35 = math.exp %34 : vector<16x16xf32>
    %cst_15 = arith.constant 1.000000e+00 : f32
    %36 = vector.broadcast %cst_15 : f32 to vector<16x16xf32>
    %37 = arith.addf %36, %35 : vector<16x16xf32>
    %cst_16 = arith.constant 1.000000e+00 : f32
    %38 = vector.broadcast %cst_16 : f32 to vector<16x16xf32>
    %39 = arith.divf %38, %37 : vector<16x16xf32>
    %c0_17 = arith.constant 0 : index
    %c0_18 = arith.constant 0 : index
    %40 = vector.load %arg6[%c0_17, %c0_18] : memref<16x16xf32, #tpu.memory_space<vmem>>, vector<16x16xf32>
    tpu.vector_store %arg6[%c0_17, %c0_18], %39 {strides = array<i32>} : memref<16x16xf32, #tpu.memory_space<vmem>>, vector<16x16xf32>,
    return
  }
  func.func @transform_0(%arg0: i32) -> (i32, i32) {
    %c0_i32 = arith.constant 0 : i32
    %c0_i32_0 = arith.constant 0 : i32
    return %arg0, %c0_i32 : i32, i32
  }
  func.func @transform_1(%arg0: i32) -> (i32, i32) {
    %c0_i32 = arith.constant 0 : i32
    %c0_i32_0 = arith.constant 0 : i32
    %c0_i32_1 = arith.constant 0 : i32
    return %c0_i32, %c0_i32_0 : i32, i32
  }
  func.func @transform_2(%arg0: i32) -> (i32, i32) {
    %c0_i32 = arith.constant 0 : i32
    %c0_i32_0 = arith.constant 0 : i32
    %c0_i32_1 = arith.constant 0 : i32
    return %c0_i32, %c0_i32_0 : i32, i32
  }
  func.func @transform_3(%arg0: i32) -> (i32, i32) {
    %c0_i32 = arith.constant 0 : i32
    %c0_i32_0 = arith.constant 0 : i32
    %c0_i32_1 = arith.constant 0 : i32
    return %c0_i32, %c0_i32_0 : i32, i32
  }
  func.func @transform_4(%arg0: i32) -> (i32, i32) {
    %c0_i32 = arith.constant 0 : i32
    %c0_i32_0 = arith.constant 0 : i32
    %c0_i32_1 = arith.constant 0 : i32
    return %c0_i32, %c0_i32_0 : i32, i32
  }
  func.func @transform_5(%arg0: i32) -> (i32, i32) {
    %c0_i32 = arith.constant 0 : i32
    %c0_i32_0 = arith.constant 0 : i32
    return %arg0, %c0_i32 : i32, i32
  }
}

module attributes {stable_mosaic.version = 11 : i64} {
  func.func @kernel(%arg0: i32, %arg1: memref<1x8x32xbf16, #tpu.memory_space<vmem>>, %arg2: memref<1x8x1xf32, #tpu.memory_space<vmem>>, %arg3: memref<1x8x1xf32, #tpu.memory_space<vmem>>, %arg4: memref<1x32xbf16, #tpu.memory_space<vmem>>, %arg5: memref<1x32xbf16, #tpu.memory_space<vmem>>, %arg6: memref<32x32xbf16, #tpu.memory_space<vmem>>, %arg7: memref<32x32xbf16, #tpu.memory_space<vmem>>, %arg8: memref<32x32xbf16, #tpu.memory_space<vmem>>, %arg9: memref<32x32xbf16, #tpu.memory_space<vmem>>, %arg10: memref<1x32xbf16, #tpu.memory_space<vmem>>, %arg11: memref<1x32xbf16, #tpu.memory_space<vmem>>, %arg12: memref<32x128xbf16, #tpu.memory_space<vmem>>, %arg13: memref<1x128xbf16, #tpu.memory_space<vmem>>, %arg14: memref<128x32xbf16, #tpu.memory_space<vmem>>, %arg15: memref<1x32xbf16, #tpu.memory_space<vmem>>, %arg16: memref<1x8x32xbf16, #tpu.memory_space<vmem>>) attributes {dimension_semantics = [#tpu.dimension_semantics<parallel>], iteration_bounds = array<i64: 4>, scalar_prefetch = 0 : i64, scratch_operands = 0 : i64, tpu.core_type = #tpu.core_type<tc>, window_params = [{transform_indices = @transform_0, window_bounds = array<i64: 1, 8, 32>}, {transform_indices = @transform_1, window_bounds = array<i64: 1, 8, 1>}, {transform_indices = @transform_2, window_bounds = array<i64: 1, 8, 1>}, {pipeline_mode = #tpu.pipeline_mode<synchronous>, transform_indices = @transform_3, window_bounds = array<i64: 1, 32>}, {pipeline_mode = #tpu.pipeline_mode<synchronous>, transform_indices = @transform_4, window_bounds = array<i64: 1, 32>}, {pipeline_mode = #tpu.pipeline_mode<synchronous>, transform_indices = @transform_5, window_bounds = array<i64: 32, 32>}, {pipeline_mode = #tpu.pipeline_mode<synchronous>, transform_indices = @transform_6, window_bounds = array<i64: 32, 32>}, {pipeline_mode = #tpu.pipeline_mode<synchronous>, transform_indices = @transform_7, window_bounds = array<i64: 32, 32>}, {pipeline_mode = #tpu.pipeline_mode<synchronous>, transform_indices = @transform_8, window_bounds = array<i64: 32, 32>}, {pipeline_mode = #tpu.pipeline_mode<synchronous>, transform_indices = @transform_9, window_bounds = array<i64: 1, 32>}, {pipeline_mode = #tpu.pipeline_mode<synchronous>, transform_indices = @transform_10, window_bounds = array<i64: 1, 32>}, {pipeline_mode = #tpu.pipeline_mode<synchronous>, transform_indices = @transform_11, window_bounds = array<i64: 32, 128>}, {pipeline_mode = #tpu.pipeline_mode<synchronous>, transform_indices = @transform_12, window_bounds = array<i64: 1, 128>}, {pipeline_mode = #tpu.pipeline_mode<synchronous>, transform_indices = @transform_13, window_bounds = array<i64: 128, 32>}, {pipeline_mode = #tpu.pipeline_mode<synchronous>, transform_indices = @transform_14, window_bounds = array<i64: 1, 32>}, {transform_indices = @transform_15, window_bounds = array<i64: 1, 8, 32>}]} {
    %c0 = arith.constant 0 : index
    %c0_0 = arith.constant 0 : index
    %c0_1 = arith.constant 0 : index
    %0 = vector.load %arg1[%c0, %c0_0, %c0_1] : memref<1x8x32xbf16, #tpu.memory_space<vmem>>, vector<1x8x32xbf16>
    %1 = vector.shape_cast %0 : vector<1x8x32xbf16> to vector<8x32xbf16>
    %2 = arith.extf %1 : vector<8x32xbf16> to vector<8x32xf32>
    %c0_2 = arith.constant 0 : index
    %c0_3 = arith.constant 0 : index
    %c0_4 = arith.constant 0 : index
    %3 = vector.load %arg2[%c0_2, %c0_3, %c0_4] : memref<1x8x1xf32, #tpu.memory_space<vmem>>, vector<1x8x1xf32>
    %4 = vector.shape_cast %3 : vector<1x8x1xf32> to vector<8x1xf32>
    %c0_5 = arith.constant 0 : index
    %c0_6 = arith.constant 0 : index
    %c0_7 = arith.constant 0 : index
    %5 = vector.load %arg3[%c0_5, %c0_6, %c0_7] : memref<1x8x1xf32, #tpu.memory_space<vmem>>, vector<1x8x1xf32>
    %6 = vector.shape_cast %5 : vector<1x8x1xf32> to vector<8x1xf32>
    %cst = arith.constant dense<0.000000e+00> : vector<8xf32>
    %7 = vector.multi_reduction <add>, %2, %cst [1] : vector<8x32xf32> to vector<8xf32>
    %8 = vector.shape_cast %7 : vector<8xf32> to vector<8x1xf32>
    %cst_8 = arith.constant 3.200000e+01 : f32
    %9 = vector.broadcast %cst_8 : f32 to vector<8x1xf32>
    %10 = arith.divf %8, %9 : vector<8x1xf32>
    %11 = vector.broadcast %10 : vector<8x1xf32> to vector<8x32xf32>
    %12 = arith.subf %2, %11 : vector<8x32xf32>
    %13 = arith.mulf %12, %12 : vector<8x32xf32>
    %cst_9 = arith.constant dense<0.000000e+00> : vector<8xf32>
    %14 = vector.multi_reduction <add>, %13, %cst_9 [1] : vector<8x32xf32> to vector<8xf32>
    %15 = vector.shape_cast %14 : vector<8xf32> to vector<8x1xf32>
    %cst_10 = arith.constant 3.200000e+01 : f32
    %16 = vector.broadcast %cst_10 : f32 to vector<8x1xf32>
    %17 = arith.divf %15, %16 : vector<8x1xf32>
    %cst_11 = arith.constant 9.99999974E-6 : f32
    %18 = vector.broadcast %cst_11 : f32 to vector<8x1xf32>
    %19 = arith.addf %17, %18 : vector<8x1xf32>
    %20 = math.rsqrt %19 : vector<8x1xf32>
    %21 = vector.broadcast %20 : vector<8x1xf32> to vector<8x32xf32>
    %22 = arith.mulf %12, %21 : vector<8x32xf32>
    %c0_12 = arith.constant 0 : index
    %c0_13 = arith.constant 0 : index
    %23 = vector.load %arg4[%c0_12, %c0_13] : memref<1x32xbf16, #tpu.memory_space<vmem>>, vector<1x32xbf16>
    %24 = arith.extf %23 : vector<1x32xbf16> to vector<1x32xf32>
    %25 = vector.broadcast %24 : vector<1x32xf32> to vector<8x32xf32>
    %26 = arith.mulf %22, %25 : vector<8x32xf32>
    %c0_14 = arith.constant 0 : index
    %c0_15 = arith.constant 0 : index
    %27 = vector.load %arg5[%c0_14, %c0_15] : memref<1x32xbf16, #tpu.memory_space<vmem>>, vector<1x32xbf16>
    %28 = arith.extf %27 : vector<1x32xbf16> to vector<1x32xf32>
    %29 = vector.broadcast %28 : vector<1x32xf32> to vector<8x32xf32>
    %30 = arith.addf %26, %29 : vector<8x32xf32>
    %31 = arith.truncf %30 : vector<8x32xf32> to vector<8x32xbf16>
    %c0_16 = arith.constant 0 : index
    %c0_17 = arith.constant 0 : index
    %32 = vector.load %arg6[%c0_16, %c0_17] : memref<32x32xbf16, #tpu.memory_space<vmem>>, vector<32x32xbf16>
    %c0_18 = arith.constant 0 : index
    %c0_19 = arith.constant 0 : index
    %33 = vector.load %arg7[%c0_18, %c0_19] : memref<32x32xbf16, #tpu.memory_space<vmem>>, vector<32x32xbf16>
    %c0_20 = arith.constant 0 : index
    %c0_21 = arith.constant 0 : index
    %34 = vector.load %arg8[%c0_20, %c0_21] : memref<32x32xbf16, #tpu.memory_space<vmem>>, vector<32x32xbf16>
    %c0_22 = arith.constant 0 : index
    %c0_23 = arith.constant 0 : index
    %35 = vector.load %arg9[%c0_22, %c0_23] : memref<32x32xbf16, #tpu.memory_space<vmem>>, vector<32x32xbf16>
    %cst_24 = arith.constant dense<0.000000e+00> : vector<8x32xf32>
    %36 = tpu.matmul %31, %32, %cst_24 {dimension_numbers = #tpu.dot_dimension_numbers<[1], [0], [0], [1], [0, 0, 1, 1], [], []>} : vector<8x32xbf16>, vector<32x32xbf16>, vector<8x32xf32> -> vector<8x32xf32>
    %37 = vector.broadcast %4 : vector<8x1xf32> to vector<8x32xf32>
    %38 = arith.mulf %36, %37 : vector<8x32xf32>
    %39 = arith.truncf %38 : vector<8x32xf32> to vector<8x32xbf16>
    %cst_25 = arith.constant dense<0.000000e+00> : vector<8x32xf32>
    %40 = tpu.matmul %31, %33, %cst_25 {dimension_numbers = #tpu.dot_dimension_numbers<[1], [0], [0], [1], [0, 0, 1, 1], [], []>} : vector<8x32xbf16>, vector<32x32xbf16>, vector<8x32xf32> -> vector<8x32xf32>
    %41 = arith.truncf %40 : vector<8x32xf32> to vector<8x32xbf16>
    %cst_26 = arith.constant dense<0.000000e+00> : vector<8x32xf32>
    %42 = tpu.matmul %31, %34, %cst_26 {dimension_numbers = #tpu.dot_dimension_numbers<[1], [0], [0], [1], [0, 0, 1, 1], [], []>} : vector<8x32xbf16>, vector<32x32xbf16>, vector<8x32xf32> -> vector<8x32xf32>
    %43 = arith.truncf %42 : vector<8x32xf32> to vector<8x32xbf16>
    %44 = vector.extract_strided_slice %39 {offsets = [0, 0], sizes = [8, 8], strides = [1, 1]} : vector<8x32xbf16> to vector<8x8xbf16>
    %45 = vector.extract_strided_slice %41 {offsets = [0, 0], sizes = [8, 8], strides = [1, 1]} : vector<8x32xbf16> to vector<8x8xbf16>
    %cst_27 = arith.constant dense<0.000000e+00> : vector<8x8xf32>
    %46 = tpu.matmul %44, %45, %cst_27 {dimension_numbers = #tpu.dot_dimension_numbers<[1], [1], [0], [0], [0, 0, 1, 0], [], []>} : vector<8x8xbf16>, vector<8x8xbf16>, vector<8x8xf32> -> vector<8x8xf32>
    %47 = vector.broadcast %6 : vector<8x1xf32> to vector<8x8xf32>
    %48 = arith.addf %46, %47 : vector<8x8xf32>
    %cst_28 = arith.constant dense<0xFF800000> : vector<8xf32>
    %49 = vector.multi_reduction <maximumf>, %48, %cst_28 [1] : vector<8x8xf32> to vector<8xf32>
    %50 = vector.shape_cast %49 : vector<8xf32> to vector<8x1xf32>
    %51 = vector.broadcast %50 : vector<8x1xf32> to vector<8x8xf32>
    %52 = arith.subf %48, %51 : vector<8x8xf32>
    %53 = math.exp %52 : vector<8x8xf32>
    %cst_29 = arith.constant dense<0.000000e+00> : vector<8xf32>
    %54 = vector.multi_reduction <add>, %53, %cst_29 [1] : vector<8x8xf32> to vector<8xf32>
    %55 = vector.shape_cast %54 : vector<8xf32> to vector<8x1xf32>
    %56 = tpu.reciprocal %55 {approx = true} : vector<8x1xf32> -> vector<8x1xf32>
    %57 = vector.broadcast %56 : vector<8x1xf32> to vector<8x8xf32>
    %58 = arith.mulf %53, %57 : vector<8x8xf32>
    %59 = arith.truncf %58 : vector<8x8xf32> to vector<8x8xbf16>
    %60 = vector.extract_strided_slice %43 {offsets = [0, 0], sizes = [8, 8], strides = [1, 1]} : vector<8x32xbf16> to vector<8x8xbf16>
    %cst_30 = arith.constant dense<0.000000e+00> : vector<8x8xf32>
    %61 = tpu.matmul %59, %60, %cst_30 {dimension_numbers = #tpu.dot_dimension_numbers<[1], [0], [0], [1], [0, 0, 1, 1], [], []>} : vector<8x8xbf16>, vector<8x8xbf16>, vector<8x8xf32> -> vector<8x8xf32>
    %62 = arith.truncf %61 : vector<8x8xf32> to vector<8x8xbf16>
    %63 = vector.extract_strided_slice %35 {offsets = [0, 0], sizes = [8, 32], strides = [1, 1]} : vector<32x32xbf16> to vector<8x32xbf16>
    %cst_31 = arith.constant dense<0.000000e+00> : vector<8x32xf32>
    %64 = tpu.matmul %62, %63, %cst_31 {dimension_numbers = #tpu.dot_dimension_numbers<[1], [0], [0], [1], [0, 0, 1, 1], [], []>} : vector<8x8xbf16>, vector<8x32xbf16>, vector<8x32xf32> -> vector<8x32xf32>
    %65 = arith.addf %2, %64 : vector<8x32xf32>
    %66 = vector.extract_strided_slice %39 {offsets = [0, 8], sizes = [8, 8], strides = [1, 1]} : vector<8x32xbf16> to vector<8x8xbf16>
    %67 = vector.extract_strided_slice %41 {offsets = [0, 8], sizes = [8, 8], strides = [1, 1]} : vector<8x32xbf16> to vector<8x8xbf16>
    %cst_32 = arith.constant dense<0.000000e+00> : vector<8x8xf32>
    %68 = tpu.matmul %66, %67, %cst_32 {dimension_numbers = #tpu.dot_dimension_numbers<[1], [1], [0], [0], [0, 0, 1, 0], [], []>} : vector<8x8xbf16>, vector<8x8xbf16>, vector<8x8xf32> -> vector<8x8xf32>
    %69 = vector.broadcast %6 : vector<8x1xf32> to vector<8x8xf32>
    %70 = arith.addf %68, %69 : vector<8x8xf32>
    %cst_33 = arith.constant dense<0xFF800000> : vector<8xf32>
    %71 = vector.multi_reduction <maximumf>, %70, %cst_33 [1] : vector<8x8xf32> to vector<8xf32>
    %72 = vector.shape_cast %71 : vector<8xf32> to vector<8x1xf32>
    %73 = vector.broadcast %72 : vector<8x1xf32> to vector<8x8xf32>
    %74 = arith.subf %70, %73 : vector<8x8xf32>
    %75 = math.exp %74 : vector<8x8xf32>
    %cst_34 = arith.constant dense<0.000000e+00> : vector<8xf32>
    %76 = vector.multi_reduction <add>, %75, %cst_34 [1] : vector<8x8xf32> to vector<8xf32>
    %77 = vector.shape_cast %76 : vector<8xf32> to vector<8x1xf32>
    %78 = tpu.reciprocal %77 {approx = true} : vector<8x1xf32> -> vector<8x1xf32>
    %79 = vector.broadcast %78 : vector<8x1xf32> to vector<8x8xf32>
    %80 = arith.mulf %75, %79 : vector<8x8xf32>
    %81 = arith.truncf %80 : vector<8x8xf32> to vector<8x8xbf16>
    %82 = vector.extract_strided_slice %43 {offsets = [0, 8], sizes = [8, 8], strides = [1, 1]} : vector<8x32xbf16> to vector<8x8xbf16>
    %cst_35 = arith.constant dense<0.000000e+00> : vector<8x8xf32>
    %83 = tpu.matmul %81, %82, %cst_35 {dimension_numbers = #tpu.dot_dimension_numbers<[1], [0], [0], [1], [0, 0, 1, 1], [], []>} : vector<8x8xbf16>, vector<8x8xbf16>, vector<8x8xf32> -> vector<8x8xf32>
    %84 = arith.truncf %83 : vector<8x8xf32> to vector<8x8xbf16>
    %85 = vector.extract_strided_slice %35 {offsets = [8, 0], sizes = [8, 32], strides = [1, 1]} : vector<32x32xbf16> to vector<8x32xbf16>
    %cst_36 = arith.constant dense<0.000000e+00> : vector<8x32xf32>
    %86 = tpu.matmul %84, %85, %cst_36 {dimension_numbers = #tpu.dot_dimension_numbers<[1], [0], [0], [1], [0, 0, 1, 1], [], []>} : vector<8x8xbf16>, vector<8x32xbf16>, vector<8x32xf32> -> vector<8x32xf32>
    %87 = arith.addf %65, %86 : vector<8x32xf32>
    %88 = vector.extract_strided_slice %39 {offsets = [0, 16], sizes = [8, 8], strides = [1, 1]} : vector<8x32xbf16> to vector<8x8xbf16>
    %89 = vector.extract_strided_slice %41 {offsets = [0, 16], sizes = [8, 8], strides = [1, 1]} : vector<8x32xbf16> to vector<8x8xbf16>
    %cst_37 = arith.constant dense<0.000000e+00> : vector<8x8xf32>
    %90 = tpu.matmul %88, %89, %cst_37 {dimension_numbers = #tpu.dot_dimension_numbers<[1], [1], [0], [0], [0, 0, 1, 0], [], []>} : vector<8x8xbf16>, vector<8x8xbf16>, vector<8x8xf32> -> vector<8x8xf32>
    %91 = vector.broadcast %6 : vector<8x1xf32> to vector<8x8xf32>
    %92 = arith.addf %90, %91 : vector<8x8xf32>
    %cst_38 = arith.constant dense<0xFF800000> : vector<8xf32>
    %93 = vector.multi_reduction <maximumf>, %92, %cst_38 [1] : vector<8x8xf32> to vector<8xf32>
    %94 = vector.shape_cast %93 : vector<8xf32> to vector<8x1xf32>
    %95 = vector.broadcast %94 : vector<8x1xf32> to vector<8x8xf32>
    %96 = arith.subf %92, %95 : vector<8x8xf32>
    %97 = math.exp %96 : vector<8x8xf32>
    %cst_39 = arith.constant dense<0.000000e+00> : vector<8xf32>
    %98 = vector.multi_reduction <add>, %97, %cst_39 [1] : vector<8x8xf32> to vector<8xf32>
    %99 = vector.shape_cast %98 : vector<8xf32> to vector<8x1xf32>
    %100 = tpu.reciprocal %99 {approx = true} : vector<8x1xf32> -> vector<8x1xf32>
    %101 = vector.broadcast %100 : vector<8x1xf32> to vector<8x8xf32>
    %102 = arith.mulf %97, %101 : vector<8x8xf32>
    %103 = arith.truncf %102 : vector<8x8xf32> to vector<8x8xbf16>
    %104 = vector.extract_strided_slice %43 {offsets = [0, 16], sizes = [8, 8], strides = [1, 1]} : vector<8x32xbf16> to vector<8x8xbf16>
    %cst_40 = arith.constant dense<0.000000e+00> : vector<8x8xf32>
    %105 = tpu.matmul %103, %104, %cst_40 {dimension_numbers = #tpu.dot_dimension_numbers<[1], [0], [0], [1], [0, 0, 1, 1], [], []>} : vector<8x8xbf16>, vector<8x8xbf16>, vector<8x8xf32> -> vector<8x8xf32>
    %106 = arith.truncf %105 : vector<8x8xf32> to vector<8x8xbf16>
    %107 = vector.extract_strided_slice %35 {offsets = [16, 0], sizes = [8, 32], strides = [1, 1]} : vector<32x32xbf16> to vector<8x32xbf16>
    %cst_41 = arith.constant dense<0.000000e+00> : vector<8x32xf32>
    %108 = tpu.matmul %106, %107, %cst_41 {dimension_numbers = #tpu.dot_dimension_numbers<[1], [0], [0], [1], [0, 0, 1, 1], [], []>} : vector<8x8xbf16>, vector<8x32xbf16>, vector<8x32xf32> -> vector<8x32xf32>
    %109 = arith.addf %87, %108 : vector<8x32xf32>
    %110 = vector.extract_strided_slice %39 {offsets = [0, 24], sizes = [8, 8], strides = [1, 1]} : vector<8x32xbf16> to vector<8x8xbf16>
    %111 = vector.extract_strided_slice %41 {offsets = [0, 24], sizes = [8, 8], strides = [1, 1]} : vector<8x32xbf16> to vector<8x8xbf16>
    %cst_42 = arith.constant dense<0.000000e+00> : vector<8x8xf32>
    %112 = tpu.matmul %110, %111, %cst_42 {dimension_numbers = #tpu.dot_dimension_numbers<[1], [1], [0], [0], [0, 0, 1, 0], [], []>} : vector<8x8xbf16>, vector<8x8xbf16>, vector<8x8xf32> -> vector<8x8xf32>
    %113 = vector.broadcast %6 : vector<8x1xf32> to vector<8x8xf32>
    %114 = arith.addf %112, %113 : vector<8x8xf32>
    %cst_43 = arith.constant dense<0xFF800000> : vector<8xf32>
    %115 = vector.multi_reduction <maximumf>, %114, %cst_43 [1] : vector<8x8xf32> to vector<8xf32>
    %116 = vector.shape_cast %115 : vector<8xf32> to vector<8x1xf32>
    %117 = vector.broadcast %116 : vector<8x1xf32> to vector<8x8xf32>
    %118 = arith.subf %114, %117 : vector<8x8xf32>
    %119 = math.exp %118 : vector<8x8xf32>
    %cst_44 = arith.constant dense<0.000000e+00> : vector<8xf32>
    %120 = vector.multi_reduction <add>, %119, %cst_44 [1] : vector<8x8xf32> to vector<8xf32>
    %121 = vector.shape_cast %120 : vector<8xf32> to vector<8x1xf32>
    %122 = tpu.reciprocal %121 {approx = true} : vector<8x1xf32> -> vector<8x1xf32>
    %123 = vector.broadcast %122 : vector<8x1xf32> to vector<8x8xf32>
    %124 = arith.mulf %119, %123 : vector<8x8xf32>
    %125 = arith.truncf %124 : vector<8x8xf32> to vector<8x8xbf16>
    %126 = vector.extract_strided_slice %43 {offsets = [0, 24], sizes = [8, 8], strides = [1, 1]} : vector<8x32xbf16> to vector<8x8xbf16>
    %cst_45 = arith.constant dense<0.000000e+00> : vector<8x8xf32>
    %127 = tpu.matmul %125, %126, %cst_45 {dimension_numbers = #tpu.dot_dimension_numbers<[1], [0], [0], [1], [0, 0, 1, 1], [], []>} : vector<8x8xbf16>, vector<8x8xbf16>, vector<8x8xf32> -> vector<8x8xf32>
    %128 = arith.truncf %127 : vector<8x8xf32> to vector<8x8xbf16>
    %129 = vector.extract_strided_slice %35 {offsets = [24, 0], sizes = [8, 32], strides = [1, 1]} : vector<32x32xbf16> to vector<8x32xbf16>
    %cst_46 = arith.constant dense<0.000000e+00> : vector<8x32xf32>
    %130 = tpu.matmul %128, %129, %cst_46 {dimension_numbers = #tpu.dot_dimension_numbers<[1], [0], [0], [1], [0, 0, 1, 1], [], []>} : vector<8x8xbf16>, vector<8x32xbf16>, vector<8x32xf32> -> vector<8x32xf32>
    %131 = arith.addf %109, %130 : vector<8x32xf32>
    %cst_47 = arith.constant dense<0.000000e+00> : vector<8xf32>
    %132 = vector.multi_reduction <add>, %131, %cst_47 [1] : vector<8x32xf32> to vector<8xf32>
    %133 = vector.shape_cast %132 : vector<8xf32> to vector<8x1xf32>
    %cst_48 = arith.constant 3.200000e+01 : f32
    %134 = vector.broadcast %cst_48 : f32 to vector<8x1xf32>
    %135 = arith.divf %133, %134 : vector<8x1xf32>
    %136 = vector.broadcast %135 : vector<8x1xf32> to vector<8x32xf32>
    %137 = arith.subf %131, %136 : vector<8x32xf32>
    %138 = arith.mulf %137, %137 : vector<8x32xf32>
    %cst_49 = arith.constant dense<0.000000e+00> : vector<8xf32>
    %139 = vector.multi_reduction <add>, %138, %cst_49 [1] : vector<8x32xf32> to vector<8xf32>
    %140 = vector.shape_cast %139 : vector<8xf32> to vector<8x1xf32>
    %cst_50 = arith.constant 3.200000e+01 : f32
    %141 = vector.broadcast %cst_50 : f32 to vector<8x1xf32>
    %142 = arith.divf %140, %141 : vector<8x1xf32>
    %cst_51 = arith.constant 9.99999974E-6 : f32
    %143 = vector.broadcast %cst_51 : f32 to vector<8x1xf32>
    %144 = arith.addf %142, %143 : vector<8x1xf32>
    %145 = math.rsqrt %144 : vector<8x1xf32>
    %146 = vector.broadcast %145 : vector<8x1xf32> to vector<8x32xf32>
    %147 = arith.mulf %137, %146 : vector<8x32xf32>
    %c0_52 = arith.constant 0 : index
    %c0_53 = arith.constant 0 : index
    %148 = vector.load %arg10[%c0_52, %c0_53] : memref<1x32xbf16, #tpu.memory_space<vmem>>, vector<1x32xbf16>
    %149 = arith.extf %148 : vector<1x32xbf16> to vector<1x32xf32>
    %150 = vector.broadcast %149 : vector<1x32xf32> to vector<8x32xf32>
    %151 = arith.mulf %147, %150 : vector<8x32xf32>
    %c0_54 = arith.constant 0 : index
    %c0_55 = arith.constant 0 : index
    %152 = vector.load %arg11[%c0_54, %c0_55] : memref<1x32xbf16, #tpu.memory_space<vmem>>, vector<1x32xbf16>
    %153 = arith.extf %152 : vector<1x32xbf16> to vector<1x32xf32>
    %154 = vector.broadcast %153 : vector<1x32xf32> to vector<8x32xf32>
    %155 = arith.addf %151, %154 : vector<8x32xf32>
    %156 = arith.truncf %155 : vector<8x32xf32> to vector<8x32xbf16>
    %c0_56 = arith.constant 0 : index
    %c0_57 = arith.constant 0 : index
    %157 = vector.load %arg12[%c0_56, %c0_57] : memref<32x128xbf16, #tpu.memory_space<vmem>>, vector<32x128xbf16>
    %cst_58 = arith.constant dense<0.000000e+00> : vector<8x128xf32>
    %158 = tpu.matmul %156, %157, %cst_58 {dimension_numbers = #tpu.dot_dimension_numbers<[1], [0], [0], [1], [0, 0, 1, 1], [], []>} : vector<8x32xbf16>, vector<32x128xbf16>, vector<8x128xf32> -> vector<8x128xf32>
    %c0_59 = arith.constant 0 : index
    %c0_60 = arith.constant 0 : index
    %159 = vector.load %arg13[%c0_59, %c0_60] : memref<1x128xbf16, #tpu.memory_space<vmem>>, vector<1x128xbf16>
    %160 = arith.extf %159 : vector<1x128xbf16> to vector<1x128xf32>
    %161 = vector.broadcast %160 : vector<1x128xf32> to vector<8x128xf32>
    %162 = arith.addf %158, %161 : vector<8x128xf32>
    %cst_61 = arith.constant 0.000000e+00 : f32
    %163 = vector.broadcast %cst_61 : f32 to vector<8x128xf32>
    %164 = arith.cmpf oge, %162, %163 : vector<8x128xf32>
    %cst_62 = arith.constant 0.00999999977 : f32
    %165 = vector.broadcast %cst_62 : f32 to vector<8x128xf32>
    %166 = arith.mulf %165, %162 : vector<8x128xf32>
    %167 = arith.select %164, %162, %166 : vector<8x128xi1>, vector<8x128xf32>
    %168 = arith.truncf %167 : vector<8x128xf32> to vector<8x128xbf16>
    %c0_63 = arith.constant 0 : index
    %c0_64 = arith.constant 0 : index
    %169 = vector.load %arg14[%c0_63, %c0_64] : memref<128x32xbf16, #tpu.memory_space<vmem>>, vector<128x32xbf16>
    %cst_65 = arith.constant dense<0.000000e+00> : vector<8x32xf32>
    %170 = tpu.matmul %168, %169, %cst_65 {dimension_numbers = #tpu.dot_dimension_numbers<[1], [0], [0], [1], [0, 0, 1, 1], [], []>} : vector<8x128xbf16>, vector<128x32xbf16>, vector<8x32xf32> -> vector<8x32xf32>
    %c0_66 = arith.constant 0 : index
    %c0_67 = arith.constant 0 : index
    %171 = vector.load %arg15[%c0_66, %c0_67] : memref<1x32xbf16, #tpu.memory_space<vmem>>, vector<1x32xbf16>
    %172 = arith.extf %171 : vector<1x32xbf16> to vector<1x32xf32>
    %173 = vector.broadcast %172 : vector<1x32xf32> to vector<8x32xf32>
    %174 = arith.addf %170, %173 : vector<8x32xf32>
    %175 = arith.addf %174, %131 : vector<8x32xf32>
    %176 = arith.truncf %175 : vector<8x32xf32> to vector<8x32xbf16>
    %c0_68 = arith.constant 0 : index
    %c0_69 = arith.constant 0 : index
    %c0_70 = arith.constant 0 : index
    %177 = vector.load %arg16[%c0_68, %c0_69, %c0_70] : memref<1x8x32xbf16, #tpu.memory_space<vmem>>, vector<1x8x32xbf16>
    %178 = vector.shape_cast %177 : vector<1x8x32xbf16> to vector<8x32xbf16>
    %179 = vector.shape_cast %176 : vector<8x32xbf16> to vector<1x8x32xbf16>
    tpu.vector_store %arg16[%c0_68, %c0_69, %c0_70], %179 {strides = array<i32>} : memref<1x8x32xbf16, #tpu.memory_space<vmem>>, vector<1x8x32xbf16>,
    return
  }
  func.func @transform_0(%arg0: i32) -> (i32, i32, i32) {
    %c0_i32 = arith.constant 0 : i32
    %c0_i32_0 = arith.constant 0 : i32
    %c0_i32_1 = arith.constant 0 : i32
    return %arg0, %c0_i32, %c0_i32_0 : i32, i32, i32
  }
  func.func @transform_1(%arg0: i32) -> (i32, i32, i32) {
    %c0_i32 = arith.constant 0 : i32
    %c0_i32_0 = arith.constant 0 : i32
    %c0_i32_1 = arith.constant 0 : i32
    return %arg0, %c0_i32, %c0_i32_0 : i32, i32, i32
  }
  func.func @transform_2(%arg0: i32) -> (i32, i32, i32) {
    %c0_i32 = arith.constant 0 : i32
    %c0_i32_0 = arith.constant 0 : i32
    %c0_i32_1 = arith.constant 0 : i32
    return %arg0, %c0_i32, %c0_i32_0 : i32, i32, i32
  }
  func.func @transform_3(%arg0: i32) -> (i32, i32) {
    %c0_i32 = arith.constant 0 : i32
    %c0_i32_0 = arith.constant 0 : i32
    %c0_i32_1 = arith.constant 0 : i32
    return %c0_i32, %c0_i32_0 : i32, i32
  }
  func.func @transform_4(%arg0: i32) -> (i32, i32) {
    %c0_i32 = arith.constant 0 : i32
    %c0_i32_0 = arith.constant 0 : i32
    %c0_i32_1 = arith.constant 0 : i32
    return %c0_i32, %c0_i32_0 : i32, i32
  }
  func.func @transform_5(%arg0: i32) -> (i32, i32) {
    %c0_i32 = arith.constant 0 : i32
    %c0_i32_0 = arith.constant 0 : i32
    %c0_i32_1 = arith.constant 0 : i32
    return %c0_i32, %c0_i32_0 : i32, i32
  }
  func.func @transform_6(%arg0: i32) -> (i32, i32) {
    %c0_i32 = arith.constant 0 : i32
    %c0_i32_0 = arith.constant 0 : i32
    %c0_i32_1 = arith.constant 0 : i32
    return %c0_i32, %c0_i32_0 : i32, i32
  }
  func.func @transform_7(%arg0: i32) -> (i32, i32) {
    %c0_i32 = arith.constant 0 : i32
    %c0_i32_0 = arith.constant 0 : i32
    %c0_i32_1 = arith.constant 0 : i32
    return %c0_i32, %c0_i32_0 : i32, i32
  }
  func.func @transform_8(%arg0: i32) -> (i32, i32) {
    %c0_i32 = arith.constant 0 : i32
    %c0_i32_0 = arith.constant 0 : i32
    %c0_i32_1 = arith.constant 0 : i32
    return %c0_i32, %c0_i32_0 : i32, i32
  }
  func.func @transform_9(%arg0: i32) -> (i32, i32) {
    %c0_i32 = arith.constant 0 : i32
    %c0_i32_0 = arith.constant 0 : i32
    %c0_i32_1 = arith.constant 0 : i32
    return %c0_i32, %c0_i32_0 : i32, i32
  }
  func.func @transform_10(%arg0: i32) -> (i32, i32) {
    %c0_i32 = arith.constant 0 : i32
    %c0_i32_0 = arith.constant 0 : i32
    %c0_i32_1 = arith.constant 0 : i32
    return %c0_i32, %c0_i32_0 : i32, i32
  }
  func.func @transform_11(%arg0: i32) -> (i32, i32) {
    %c0_i32 = arith.constant 0 : i32
    %c0_i32_0 = arith.constant 0 : i32
    %c0_i32_1 = arith.constant 0 : i32
    return %c0_i32, %c0_i32_0 : i32, i32
  }
  func.func @transform_12(%arg0: i32) -> (i32, i32) {
    %c0_i32 = arith.constant 0 : i32
    %c0_i32_0 = arith.constant 0 : i32
    %c0_i32_1 = arith.constant 0 : i32
    return %c0_i32, %c0_i32_0 : i32, i32
  }
  func.func @transform_13(%arg0: i32) -> (i32, i32) {
    %c0_i32 = arith.constant 0 : i32
    %c0_i32_0 = arith.constant 0 : i32
    %c0_i32_1 = arith.constant 0 : i32
    return %c0_i32, %c0_i32_0 : i32, i32
  }
  func.func @transform_14(%arg0: i32) -> (i32, i32) {
    %c0_i32 = arith.constant 0 : i32
    %c0_i32_0 = arith.constant 0 : i32
    %c0_i32_1 = arith.constant 0 : i32
    return %c0_i32, %c0_i32_0 : i32, i32
  }
  func.func @transform_15(%arg0: i32) -> (i32, i32, i32) {
    %c0_i32 = arith.constant 0 : i32
    %c0_i32_0 = arith.constant 0 : i32
    %c0_i32_1 = arith.constant 0 : i32
    return %arg0, %c0_i32, %c0_i32_0 : i32, i32, i32
  }
}

module attributes {stable_mosaic.version = 11 : i64} {
  func.func @kernel(%arg0: i32, %arg1: memref<1x8x32xbf16, #tpu.memory_space<vmem>>, %arg2: memref<1x8x32xbf16, #tpu.memory_space<vmem>>, %arg3: memref<1x8x1xf32, #tpu.memory_space<vmem>>, %arg4: memref<1x8x1xf32, #tpu.memory_space<vmem>>, %arg5: memref<1x32xbf16, #tpu.memory_space<vmem>>, %arg6: memref<1x32xbf16, #tpu.memory_space<vmem>>, %arg7: memref<32x32xbf16, #tpu.memory_space<vmem>>, %arg8: memref<32x32xbf16, #tpu.memory_space<vmem>>, %arg9: memref<32x32xbf16, #tpu.memory_space<vmem>>, %arg10: memref<32x32xbf16, #tpu.memory_space<vmem>>, %arg11: memref<1x32xbf16, #tpu.memory_space<vmem>>, %arg12: memref<1x32xbf16, #tpu.memory_space<vmem>>, %arg13: memref<32x128xbf16, #tpu.memory_space<vmem>>, %arg14: memref<1x128xbf16, #tpu.memory_space<vmem>>, %arg15: memref<128x32xbf16, #tpu.memory_space<vmem>>, %arg16: memref<1x32xbf16, #tpu.memory_space<vmem>>, %arg17: memref<1x8x32xbf16, #tpu.memory_space<vmem>>) attributes {dimension_semantics = [#tpu.dimension_semantics<parallel>], iteration_bounds = array<i64: 2>, scalar_prefetch = 0 : i64, scratch_operands = 0 : i64, tpu.core_type = #tpu.core_type<tc>, window_params = [{transform_indices = @transform_0, window_bounds = array<i64: 1, 8, 32>}, {transform_indices = @transform_1, window_bounds = array<i64: 1, 8, 32>}, {transform_indices = @transform_2, window_bounds = array<i64: 1, 8, 1>}, {transform_indices = @transform_3, window_bounds = array<i64: 1, 8, 1>}, {pipeline_mode = #tpu.pipeline_mode<synchronous>, transform_indices = @transform_4, window_bounds = array<i64: 1, 32>}, {pipeline_mode = #tpu.pipeline_mode<synchronous>, transform_indices = @transform_5, window_bounds = array<i64: 1, 32>}, {pipeline_mode = #tpu.pipeline_mode<synchronous>, transform_indices = @transform_6, window_bounds = array<i64: 32, 32>}, {pipeline_mode = #tpu.pipeline_mode<synchronous>, transform_indices = @transform_7, window_bounds = array<i64: 32, 32>}, {pipeline_mode = #tpu.pipeline_mode<synchronous>, transform_indices = @transform_8, window_bounds = array<i64: 32, 32>}, {pipeline_mode = #tpu.pipeline_mode<synchronous>, transform_indices = @transform_9, window_bounds = array<i64: 32, 32>}, {pipeline_mode = #tpu.pipeline_mode<synchronous>, transform_indices = @transform_10, window_bounds = array<i64: 1, 32>}, {pipeline_mode = #tpu.pipeline_mode<synchronous>, transform_indices = @transform_11, window_bounds = array<i64: 1, 32>}, {pipeline_mode = #tpu.pipeline_mode<synchronous>, transform_indices = @transform_12, window_bounds = array<i64: 32, 128>}, {pipeline_mode = #tpu.pipeline_mode<synchronous>, transform_indices = @transform_13, window_bounds = array<i64: 1, 128>}, {pipeline_mode = #tpu.pipeline_mode<synchronous>, transform_indices = @transform_14, window_bounds = array<i64: 128, 32>}, {pipeline_mode = #tpu.pipeline_mode<synchronous>, transform_indices = @transform_15, window_bounds = array<i64: 1, 32>}, {transform_indices = @transform_16, window_bounds = array<i64: 1, 8, 32>}]} {
    %c0 = arith.constant 0 : index
    %c0_0 = arith.constant 0 : index
    %c0_1 = arith.constant 0 : index
    %0 = vector.load %arg1[%c0, %c0_0, %c0_1] : memref<1x8x32xbf16, #tpu.memory_space<vmem>>, vector<1x8x32xbf16>
    %1 = vector.shape_cast %0 : vector<1x8x32xbf16> to vector<8x32xbf16>
    %c0_2 = arith.constant 0 : index
    %c0_3 = arith.constant 0 : index
    %c0_4 = arith.constant 0 : index
    %2 = vector.load %arg2[%c0_2, %c0_3, %c0_4] : memref<1x8x32xbf16, #tpu.memory_space<vmem>>, vector<1x8x32xbf16>
    %3 = vector.shape_cast %2 : vector<1x8x32xbf16> to vector<8x32xbf16>
    %4 = arith.extf %1 : vector<8x32xbf16> to vector<8x32xf32>
    %5 = arith.extf %3 : vector<8x32xbf16> to vector<8x32xf32>
    %c0_5 = arith.constant 0 : index
    %c0_6 = arith.constant 0 : index
    %c0_7 = arith.constant 0 : index
    %6 = vector.load %arg3[%c0_5, %c0_6, %c0_7] : memref<1x8x1xf32, #tpu.memory_space<vmem>>, vector<1x8x1xf32>
    %7 = vector.shape_cast %6 : vector<1x8x1xf32> to vector<8x1xf32>
    %c0_8 = arith.constant 0 : index
    %c0_9 = arith.constant 0 : index
    %c0_10 = arith.constant 0 : index
    %8 = vector.load %arg4[%c0_8, %c0_9, %c0_10] : memref<1x8x1xf32, #tpu.memory_space<vmem>>, vector<1x8x1xf32>
    %9 = vector.shape_cast %8 : vector<1x8x1xf32> to vector<8x1xf32>
    %c0_11 = arith.constant 0 : index
    %c0_12 = arith.constant 0 : index
    %10 = vector.load %arg7[%c0_11, %c0_12] : memref<32x32xbf16, #tpu.memory_space<vmem>>, vector<32x32xbf16>
    %c0_13 = arith.constant 0 : index
    %c0_14 = arith.constant 0 : index
    %11 = vector.load %arg8[%c0_13, %c0_14] : memref<32x32xbf16, #tpu.memory_space<vmem>>, vector<32x32xbf16>
    %c0_15 = arith.constant 0 : index
    %c0_16 = arith.constant 0 : index
    %12 = vector.load %arg9[%c0_15, %c0_16] : memref<32x32xbf16, #tpu.memory_space<vmem>>, vector<32x32xbf16>
    %c0_17 = arith.constant 0 : index
    %c0_18 = arith.constant 0 : index
    %13 = vector.load %arg10[%c0_17, %c0_18] : memref<32x32xbf16, #tpu.memory_space<vmem>>, vector<32x32xbf16>
    %cst = arith.constant dense<0.000000e+00> : vector<8xf32>
    %14 = vector.multi_reduction <add>, %5, %cst [1] : vector<8x32xf32> to vector<8xf32>
    %15 = vector.shape_cast %14 : vector<8xf32> to vector<8x1xf32>
    %cst_19 = arith.constant 3.200000e+01 : f32
    %16 = vector.broadcast %cst_19 : f32 to vector<8x1xf32>
    %17 = arith.divf %15, %16 : vector<8x1xf32>
    %18 = vector.broadcast %17 : vector<8x1xf32> to vector<8x32xf32>
    %19 = arith.subf %5, %18 : vector<8x32xf32>
    %20 = arith.mulf %19, %19 : vector<8x32xf32>
    %cst_20 = arith.constant dense<0.000000e+00> : vector<8xf32>
    %21 = vector.multi_reduction <add>, %20, %cst_20 [1] : vector<8x32xf32> to vector<8xf32>
    %22 = vector.shape_cast %21 : vector<8xf32> to vector<8x1xf32>
    %cst_21 = arith.constant 3.200000e+01 : f32
    %23 = vector.broadcast %cst_21 : f32 to vector<8x1xf32>
    %24 = arith.divf %22, %23 : vector<8x1xf32>
    %cst_22 = arith.constant 9.99999974E-6 : f32
    %25 = vector.broadcast %cst_22 : f32 to vector<8x1xf32>
    %26 = arith.addf %24, %25 : vector<8x1xf32>
    %27 = math.rsqrt %26 : vector<8x1xf32>
    %28 = vector.broadcast %27 : vector<8x1xf32> to vector<8x32xf32>
    %29 = arith.mulf %19, %28 : vector<8x32xf32>
    %c0_23 = arith.constant 0 : index
    %c0_24 = arith.constant 0 : index
    %30 = vector.load %arg5[%c0_23, %c0_24] : memref<1x32xbf16, #tpu.memory_space<vmem>>, vector<1x32xbf16>
    %31 = arith.extf %30 : vector<1x32xbf16> to vector<1x32xf32>
    %32 = vector.broadcast %31 : vector<1x32xf32> to vector<8x32xf32>
    %33 = arith.mulf %29, %32 : vector<8x32xf32>
    %c0_25 = arith.constant 0 : index
    %c0_26 = arith.constant 0 : index
    %34 = vector.load %arg6[%c0_25, %c0_26] : memref<1x32xbf16, #tpu.memory_space<vmem>>, vector<1x32xbf16>
    %35 = arith.extf %34 : vector<1x32xbf16> to vector<1x32xf32>
    %36 = vector.broadcast %35 : vector<1x32xf32> to vector<8x32xf32>
    %37 = arith.addf %33, %36 : vector<8x32xf32>
    %38 = arith.truncf %37 : vector<8x32xf32> to vector<8x32xbf16>
    %cst_27 = arith.constant dense<0.000000e+00> : vector<8xf32>
    %39 = vector.multi_reduction <add>, %4, %cst_27 [1] : vector<8x32xf32> to vector<8xf32>
    %40 = vector.shape_cast %39 : vector<8xf32> to vector<8x1xf32>
    %cst_28 = arith.constant 3.200000e+01 : f32
    %41 = vector.broadcast %cst_28 : f32 to vector<8x1xf32>
    %42 = arith.divf %40, %41 : vector<8x1xf32>
    %43 = vector.broadcast %42 : vector<8x1xf32> to vector<8x32xf32>
    %44 = arith.subf %4, %43 : vector<8x32xf32>
    %45 = arith.mulf %44, %44 : vector<8x32xf32>
    %cst_29 = arith.constant dense<0.000000e+00> : vector<8xf32>
    %46 = vector.multi_reduction <add>, %45, %cst_29 [1] : vector<8x32xf32> to vector<8xf32>
    %47 = vector.shape_cast %46 : vector<8xf32> to vector<8x1xf32>
    %cst_30 = arith.constant 3.200000e+01 : f32
    %48 = vector.broadcast %cst_30 : f32 to vector<8x1xf32>
    %49 = arith.divf %47, %48 : vector<8x1xf32>
    %cst_31 = arith.constant 9.99999974E-6 : f32
    %50 = vector.broadcast %cst_31 : f32 to vector<8x1xf32>
    %51 = arith.addf %49, %50 : vector<8x1xf32>
    %52 = math.rsqrt %51 : vector<8x1xf32>
    %53 = vector.broadcast %52 : vector<8x1xf32> to vector<8x32xf32>
    %54 = arith.mulf %44, %53 : vector<8x32xf32>
    %c0_32 = arith.constant 0 : index
    %c0_33 = arith.constant 0 : index
    %55 = vector.load %arg5[%c0_32, %c0_33] : memref<1x32xbf16, #tpu.memory_space<vmem>>, vector<1x32xbf16>
    %56 = arith.extf %55 : vector<1x32xbf16> to vector<1x32xf32>
    %57 = vector.broadcast %56 : vector<1x32xf32> to vector<8x32xf32>
    %58 = arith.mulf %54, %57 : vector<8x32xf32>
    %c0_34 = arith.constant 0 : index
    %c0_35 = arith.constant 0 : index
    %59 = vector.load %arg6[%c0_34, %c0_35] : memref<1x32xbf16, #tpu.memory_space<vmem>>, vector<1x32xbf16>
    %60 = arith.extf %59 : vector<1x32xbf16> to vector<1x32xf32>
    %61 = vector.broadcast %60 : vector<1x32xf32> to vector<8x32xf32>
    %62 = arith.addf %58, %61 : vector<8x32xf32>
    %63 = arith.truncf %62 : vector<8x32xf32> to vector<8x32xbf16>
    %cst_36 = arith.constant dense<0.000000e+00> : vector<8x32xf32>
    %64 = tpu.matmul %38, %10, %cst_36 {dimension_numbers = #tpu.dot_dimension_numbers<[1], [0], [0], [1], [0, 0, 1, 1], [], []>} : vector<8x32xbf16>, vector<32x32xbf16>, vector<8x32xf32> -> vector<8x32xf32>
    %65 = vector.broadcast %7 : vector<8x1xf32> to vector<8x32xf32>
    %66 = arith.mulf %64, %65 : vector<8x32xf32>
    %67 = arith.truncf %66 : vector<8x32xf32> to vector<8x32xbf16>
    %cst_37 = arith.constant dense<0.000000e+00> : vector<8x32xf32>
    %68 = tpu.matmul %38, %11, %cst_37 {dimension_numbers = #tpu.dot_dimension_numbers<[1], [0], [0], [1], [0, 0, 1, 1], [], []>} : vector<8x32xbf16>, vector<32x32xbf16>, vector<8x32xf32> -> vector<8x32xf32>
    %69 = arith.truncf %68 : vector<8x32xf32> to vector<8x32xbf16>
    %cst_38 = arith.constant dense<0.000000e+00> : vector<8x32xf32>
    %70 = tpu.matmul %38, %12, %cst_38 {dimension_numbers = #tpu.dot_dimension_numbers<[1], [0], [0], [1], [0, 0, 1, 1], [], []>} : vector<8x32xbf16>, vector<32x32xbf16>, vector<8x32xf32> -> vector<8x32xf32>
    %71 = arith.truncf %70 : vector<8x32xf32> to vector<8x32xbf16>
    %72 = vector.extract_strided_slice %67 {offsets = [0, 0], sizes = [8, 8], strides = [1, 1]} : vector<8x32xbf16> to vector<8x8xbf16>
    %73 = vector.extract_strided_slice %69 {offsets = [0, 0], sizes = [8, 8], strides = [1, 1]} : vector<8x32xbf16> to vector<8x8xbf16>
    %cst_39 = arith.constant dense<0.000000e+00> : vector<8x8xf32>
    %74 = tpu.matmul %72, %73, %cst_39 {dimension_numbers = #tpu.dot_dimension_numbers<[1], [1], [0], [0], [0, 0, 1, 0], [], []>} : vector<8x8xbf16>, vector<8x8xbf16>, vector<8x8xf32> -> vector<8x8xf32>
    %75 = vector.broadcast %9 : vector<8x1xf32> to vector<8x8xf32>
    %76 = arith.addf %74, %75 : vector<8x8xf32>
    %cst_40 = arith.constant dense<0xFF800000> : vector<8xf32>
    %77 = vector.multi_reduction <maximumf>, %76, %cst_40 [1] : vector<8x8xf32> to vector<8xf32>
    %78 = vector.shape_cast %77 : vector<8xf32> to vector<8x1xf32>
    %79 = vector.broadcast %78 : vector<8x1xf32> to vector<8x8xf32>
    %80 = arith.subf %76, %79 : vector<8x8xf32>
    %81 = math.exp %80 : vector<8x8xf32>
    %cst_41 = arith.constant dense<0.000000e+00> : vector<8xf32>
    %82 = vector.multi_reduction <add>, %81, %cst_41 [1] : vector<8x8xf32> to vector<8xf32>
    %83 = vector.shape_cast %82 : vector<8xf32> to vector<8x1xf32>
    %84 = tpu.reciprocal %83 {approx = true} : vector<8x1xf32> -> vector<8x1xf32>
    %85 = vector.broadcast %84 : vector<8x1xf32> to vector<8x8xf32>
    %86 = arith.mulf %81, %85 : vector<8x8xf32>
    %87 = arith.truncf %86 : vector<8x8xf32> to vector<8x8xbf16>
    %88 = vector.extract_strided_slice %71 {offsets = [0, 0], sizes = [8, 8], strides = [1, 1]} : vector<8x32xbf16> to vector<8x8xbf16>
    %cst_42 = arith.constant dense<0.000000e+00> : vector<8x8xf32>
    %89 = tpu.matmul %87, %88, %cst_42 {dimension_numbers = #tpu.dot_dimension_numbers<[1], [0], [0], [1], [0, 0, 1, 1], [], []>} : vector<8x8xbf16>, vector<8x8xbf16>, vector<8x8xf32> -> vector<8x8xf32>
    %90 = arith.truncf %89 : vector<8x8xf32> to vector<8x8xbf16>
    %91 = vector.extract_strided_slice %13 {offsets = [0, 0], sizes = [8, 32], strides = [1, 1]} : vector<32x32xbf16> to vector<8x32xbf16>
    %cst_43 = arith.constant dense<0.000000e+00> : vector<8x32xf32>
    %92 = tpu.matmul %90, %91, %cst_43 {dimension_numbers = #tpu.dot_dimension_numbers<[1], [0], [0], [1], [0, 0, 1, 1], [], []>} : vector<8x8xbf16>, vector<8x32xbf16>, vector<8x32xf32> -> vector<8x32xf32>
    %93 = arith.addf %5, %92 : vector<8x32xf32>
    %94 = vector.extract_strided_slice %67 {offsets = [0, 8], sizes = [8, 8], strides = [1, 1]} : vector<8x32xbf16> to vector<8x8xbf16>
    %95 = vector.extract_strided_slice %69 {offsets = [0, 8], sizes = [8, 8], strides = [1, 1]} : vector<8x32xbf16> to vector<8x8xbf16>
    %cst_44 = arith.constant dense<0.000000e+00> : vector<8x8xf32>
    %96 = tpu.matmul %94, %95, %cst_44 {dimension_numbers = #tpu.dot_dimension_numbers<[1], [1], [0], [0], [0, 0, 1, 0], [], []>} : vector<8x8xbf16>, vector<8x8xbf16>, vector<8x8xf32> -> vector<8x8xf32>
    %97 = vector.broadcast %9 : vector<8x1xf32> to vector<8x8xf32>
    %98 = arith.addf %96, %97 : vector<8x8xf32>
    %cst_45 = arith.constant dense<0xFF800000> : vector<8xf32>
    %99 = vector.multi_reduction <maximumf>, %98, %cst_45 [1] : vector<8x8xf32> to vector<8xf32>
    %100 = vector.shape_cast %99 : vector<8xf32> to vector<8x1xf32>
    %101 = vector.broadcast %100 : vector<8x1xf32> to vector<8x8xf32>
    %102 = arith.subf %98, %101 : vector<8x8xf32>
    %103 = math.exp %102 : vector<8x8xf32>
    %cst_46 = arith.constant dense<0.000000e+00> : vector<8xf32>
    %104 = vector.multi_reduction <add>, %103, %cst_46 [1] : vector<8x8xf32> to vector<8xf32>
    %105 = vector.shape_cast %104 : vector<8xf32> to vector<8x1xf32>
    %106 = tpu.reciprocal %105 {approx = true} : vector<8x1xf32> -> vector<8x1xf32>
    %107 = vector.broadcast %106 : vector<8x1xf32> to vector<8x8xf32>
    %108 = arith.mulf %103, %107 : vector<8x8xf32>
    %109 = arith.truncf %108 : vector<8x8xf32> to vector<8x8xbf16>
    %110 = vector.extract_strided_slice %71 {offsets = [0, 8], sizes = [8, 8], strides = [1, 1]} : vector<8x32xbf16> to vector<8x8xbf16>
    %cst_47 = arith.constant dense<0.000000e+00> : vector<8x8xf32>
    %111 = tpu.matmul %109, %110, %cst_47 {dimension_numbers = #tpu.dot_dimension_numbers<[1], [0], [0], [1], [0, 0, 1, 1], [], []>} : vector<8x8xbf16>, vector<8x8xbf16>, vector<8x8xf32> -> vector<8x8xf32>
    %112 = arith.truncf %111 : vector<8x8xf32> to vector<8x8xbf16>
    %113 = vector.extract_strided_slice %13 {offsets = [8, 0], sizes = [8, 32], strides = [1, 1]} : vector<32x32xbf16> to vector<8x32xbf16>
    %cst_48 = arith.constant dense<0.000000e+00> : vector<8x32xf32>
    %114 = tpu.matmul %112, %113, %cst_48 {dimension_numbers = #tpu.dot_dimension_numbers<[1], [0], [0], [1], [0, 0, 1, 1], [], []>} : vector<8x8xbf16>, vector<8x32xbf16>, vector<8x32xf32> -> vector<8x32xf32>
    %115 = arith.addf %93, %114 : vector<8x32xf32>
    %116 = vector.extract_strided_slice %67 {offsets = [0, 16], sizes = [8, 8], strides = [1, 1]} : vector<8x32xbf16> to vector<8x8xbf16>
    %117 = vector.extract_strided_slice %69 {offsets = [0, 16], sizes = [8, 8], strides = [1, 1]} : vector<8x32xbf16> to vector<8x8xbf16>
    %cst_49 = arith.constant dense<0.000000e+00> : vector<8x8xf32>
    %118 = tpu.matmul %116, %117, %cst_49 {dimension_numbers = #tpu.dot_dimension_numbers<[1], [1], [0], [0], [0, 0, 1, 0], [], []>} : vector<8x8xbf16>, vector<8x8xbf16>, vector<8x8xf32> -> vector<8x8xf32>
    %119 = vector.broadcast %9 : vector<8x1xf32> to vector<8x8xf32>
    %120 = arith.addf %118, %119 : vector<8x8xf32>
    %cst_50 = arith.constant dense<0xFF800000> : vector<8xf32>
    %121 = vector.multi_reduction <maximumf>, %120, %cst_50 [1] : vector<8x8xf32> to vector<8xf32>
    %122 = vector.shape_cast %121 : vector<8xf32> to vector<8x1xf32>
    %123 = vector.broadcast %122 : vector<8x1xf32> to vector<8x8xf32>
    %124 = arith.subf %120, %123 : vector<8x8xf32>
    %125 = math.exp %124 : vector<8x8xf32>
    %cst_51 = arith.constant dense<0.000000e+00> : vector<8xf32>
    %126 = vector.multi_reduction <add>, %125, %cst_51 [1] : vector<8x8xf32> to vector<8xf32>
    %127 = vector.shape_cast %126 : vector<8xf32> to vector<8x1xf32>
    %128 = tpu.reciprocal %127 {approx = true} : vector<8x1xf32> -> vector<8x1xf32>
    %129 = vector.broadcast %128 : vector<8x1xf32> to vector<8x8xf32>
    %130 = arith.mulf %125, %129 : vector<8x8xf32>
    %131 = arith.truncf %130 : vector<8x8xf32> to vector<8x8xbf16>
    %132 = vector.extract_strided_slice %71 {offsets = [0, 16], sizes = [8, 8], strides = [1, 1]} : vector<8x32xbf16> to vector<8x8xbf16>
    %cst_52 = arith.constant dense<0.000000e+00> : vector<8x8xf32>
    %133 = tpu.matmul %131, %132, %cst_52 {dimension_numbers = #tpu.dot_dimension_numbers<[1], [0], [0], [1], [0, 0, 1, 1], [], []>} : vector<8x8xbf16>, vector<8x8xbf16>, vector<8x8xf32> -> vector<8x8xf32>
    %134 = arith.truncf %133 : vector<8x8xf32> to vector<8x8xbf16>
    %135 = vector.extract_strided_slice %13 {offsets = [16, 0], sizes = [8, 32], strides = [1, 1]} : vector<32x32xbf16> to vector<8x32xbf16>
    %cst_53 = arith.constant dense<0.000000e+00> : vector<8x32xf32>
    %136 = tpu.matmul %134, %135, %cst_53 {dimension_numbers = #tpu.dot_dimension_numbers<[1], [0], [0], [1], [0, 0, 1, 1], [], []>} : vector<8x8xbf16>, vector<8x32xbf16>, vector<8x32xf32> -> vector<8x32xf32>
    %137 = arith.addf %115, %136 : vector<8x32xf32>
    %138 = vector.extract_strided_slice %67 {offsets = [0, 24], sizes = [8, 8], strides = [1, 1]} : vector<8x32xbf16> to vector<8x8xbf16>
    %139 = vector.extract_strided_slice %69 {offsets = [0, 24], sizes = [8, 8], strides = [1, 1]} : vector<8x32xbf16> to vector<8x8xbf16>
    %cst_54 = arith.constant dense<0.000000e+00> : vector<8x8xf32>
    %140 = tpu.matmul %138, %139, %cst_54 {dimension_numbers = #tpu.dot_dimension_numbers<[1], [1], [0], [0], [0, 0, 1, 0], [], []>} : vector<8x8xbf16>, vector<8x8xbf16>, vector<8x8xf32> -> vector<8x8xf32>
    %141 = vector.broadcast %9 : vector<8x1xf32> to vector<8x8xf32>
    %142 = arith.addf %140, %141 : vector<8x8xf32>
    %cst_55 = arith.constant dense<0xFF800000> : vector<8xf32>
    %143 = vector.multi_reduction <maximumf>, %142, %cst_55 [1] : vector<8x8xf32> to vector<8xf32>
    %144 = vector.shape_cast %143 : vector<8xf32> to vector<8x1xf32>
    %145 = vector.broadcast %144 : vector<8x1xf32> to vector<8x8xf32>
    %146 = arith.subf %142, %145 : vector<8x8xf32>
    %147 = math.exp %146 : vector<8x8xf32>
    %cst_56 = arith.constant dense<0.000000e+00> : vector<8xf32>
    %148 = vector.multi_reduction <add>, %147, %cst_56 [1] : vector<8x8xf32> to vector<8xf32>
    %149 = vector.shape_cast %148 : vector<8xf32> to vector<8x1xf32>
    %150 = tpu.reciprocal %149 {approx = true} : vector<8x1xf32> -> vector<8x1xf32>
    %151 = vector.broadcast %150 : vector<8x1xf32> to vector<8x8xf32>
    %152 = arith.mulf %147, %151 : vector<8x8xf32>
    %153 = arith.truncf %152 : vector<8x8xf32> to vector<8x8xbf16>
    %154 = vector.extract_strided_slice %71 {offsets = [0, 24], sizes = [8, 8], strides = [1, 1]} : vector<8x32xbf16> to vector<8x8xbf16>
    %cst_57 = arith.constant dense<0.000000e+00> : vector<8x8xf32>
    %155 = tpu.matmul %153, %154, %cst_57 {dimension_numbers = #tpu.dot_dimension_numbers<[1], [0], [0], [1], [0, 0, 1, 1], [], []>} : vector<8x8xbf16>, vector<8x8xbf16>, vector<8x8xf32> -> vector<8x8xf32>
    %156 = arith.truncf %155 : vector<8x8xf32> to vector<8x8xbf16>
    %157 = vector.extract_strided_slice %13 {offsets = [24, 0], sizes = [8, 32], strides = [1, 1]} : vector<32x32xbf16> to vector<8x32xbf16>
    %cst_58 = arith.constant dense<0.000000e+00> : vector<8x32xf32>
    %158 = tpu.matmul %156, %157, %cst_58 {dimension_numbers = #tpu.dot_dimension_numbers<[1], [0], [0], [1], [0, 0, 1, 1], [], []>} : vector<8x8xbf16>, vector<8x32xbf16>, vector<8x32xf32> -> vector<8x32xf32>
    %159 = arith.addf %137, %158 : vector<8x32xf32>
    %160 = arith.truncf %159 : vector<8x32xf32> to vector<8x32xbf16>
    %cst_59 = arith.constant dense<0.000000e+00> : vector<8x32xf32>
    %161 = tpu.matmul %63, %10, %cst_59 {dimension_numbers = #tpu.dot_dimension_numbers<[1], [0], [0], [1], [0, 0, 1, 1], [], []>} : vector<8x32xbf16>, vector<32x32xbf16>, vector<8x32xf32> -> vector<8x32xf32>
    %162 = vector.broadcast %7 : vector<8x1xf32> to vector<8x32xf32>
    %163 = arith.mulf %161, %162 : vector<8x32xf32>
    %164 = arith.truncf %163 : vector<8x32xf32> to vector<8x32xbf16>
    %cst_60 = arith.constant dense<0.000000e+00> : vector<8x32xf32>
    %165 = tpu.matmul %63, %11, %cst_60 {dimension_numbers = #tpu.dot_dimension_numbers<[1], [0], [0], [1], [0, 0, 1, 1], [], []>} : vector<8x32xbf16>, vector<32x32xbf16>, vector<8x32xf32> -> vector<8x32xf32>
    %166 = arith.truncf %165 : vector<8x32xf32> to vector<8x32xbf16>
    %cst_61 = arith.constant dense<0.000000e+00> : vector<8x32xf32>
    %167 = tpu.matmul %160, %12, %cst_61 {dimension_numbers = #tpu.dot_dimension_numbers<[1], [0], [0], [1], [0, 0, 1, 1], [], []>} : vector<8x32xbf16>, vector<32x32xbf16>, vector<8x32xf32> -> vector<8x32xf32>
    %168 = arith.truncf %167 : vector<8x32xf32> to vector<8x32xbf16>
    %169 = vector.extract_strided_slice %164 {offsets = [0, 0], sizes = [8, 8], strides = [1, 1]} : vector<8x32xbf16> to vector<8x8xbf16>
    %170 = vector.extract_strided_slice %166 {offsets = [0, 0], sizes = [8, 8], strides = [1, 1]} : vector<8x32xbf16> to vector<8x8xbf16>
    %cst_62 = arith.constant dense<0.000000e+00> : vector<8x8xf32>
    %171 = tpu.matmul %169, %170, %cst_62 {dimension_numbers = #tpu.dot_dimension_numbers<[1], [1], [0], [0], [0, 0, 1, 0], [], []>} : vector<8x8xbf16>, vector<8x8xbf16>, vector<8x8xf32> -> vector<8x8xf32>
    %172 = vector.broadcast %9 : vector<8x1xf32> to vector<8x8xf32>
    %173 = arith.addf %171, %172 : vector<8x8xf32>
    %cst_63 = arith.constant dense<0xFF800000> : vector<8xf32>
    %174 = vector.multi_reduction <maximumf>, %173, %cst_63 [1] : vector<8x8xf32> to vector<8xf32>
    %175 = vector.shape_cast %174 : vector<8xf32> to vector<8x1xf32>
    %176 = vector.broadcast %175 : vector<8x1xf32> to vector<8x8xf32>
    %177 = arith.subf %173, %176 : vector<8x8xf32>
    %178 = math.exp %177 : vector<8x8xf32>
    %cst_64 = arith.constant dense<0.000000e+00> : vector<8xf32>
    %179 = vector.multi_reduction <add>, %178, %cst_64 [1] : vector<8x8xf32> to vector<8xf32>
    %180 = vector.shape_cast %179 : vector<8xf32> to vector<8x1xf32>
    %181 = tpu.reciprocal %180 {approx = true} : vector<8x1xf32> -> vector<8x1xf32>
    %182 = vector.broadcast %181 : vector<8x1xf32> to vector<8x8xf32>
    %183 = arith.mulf %178, %182 : vector<8x8xf32>
    %184 = arith.truncf %183 : vector<8x8xf32> to vector<8x8xbf16>
    %185 = vector.extract_strided_slice %168 {offsets = [0, 0], sizes = [8, 8], strides = [1, 1]} : vector<8x32xbf16> to vector<8x8xbf16>
    %cst_65 = arith.constant dense<0.000000e+00> : vector<8x8xf32>
    %186 = tpu.matmul %184, %185, %cst_65 {dimension_numbers = #tpu.dot_dimension_numbers<[1], [0], [0], [1], [0, 0, 1, 1], [], []>} : vector<8x8xbf16>, vector<8x8xbf16>, vector<8x8xf32> -> vector<8x8xf32>
    %187 = arith.truncf %186 : vector<8x8xf32> to vector<8x8xbf16>
    %188 = vector.extract_strided_slice %13 {offsets = [0, 0], sizes = [8, 32], strides = [1, 1]} : vector<32x32xbf16> to vector<8x32xbf16>
    %cst_66 = arith.constant dense<0.000000e+00> : vector<8x32xf32>
    %189 = tpu.matmul %187, %188, %cst_66 {dimension_numbers = #tpu.dot_dimension_numbers<[1], [0], [0], [1], [0, 0, 1, 1], [], []>} : vector<8x8xbf16>, vector<8x32xbf16>, vector<8x32xf32> -> vector<8x32xf32>
    %190 = arith.addf %4, %189 : vector<8x32xf32>
    %191 = vector.extract_strided_slice %164 {offsets = [0, 8], sizes = [8, 8], strides = [1, 1]} : vector<8x32xbf16> to vector<8x8xbf16>
    %192 = vector.extract_strided_slice %166 {offsets = [0, 8], sizes = [8, 8], strides = [1, 1]} : vector<8x32xbf16> to vector<8x8xbf16>
    %cst_67 = arith.constant dense<0.000000e+00> : vector<8x8xf32>
    %193 = tpu.matmul %191, %192, %cst_67 {dimension_numbers = #tpu.dot_dimension_numbers<[1], [1], [0], [0], [0, 0, 1, 0], [], []>} : vector<8x8xbf16>, vector<8x8xbf16>, vector<8x8xf32> -> vector<8x8xf32>
    %194 = vector.broadcast %9 : vector<8x1xf32> to vector<8x8xf32>
    %195 = arith.addf %193, %194 : vector<8x8xf32>
    %cst_68 = arith.constant dense<0xFF800000> : vector<8xf32>
    %196 = vector.multi_reduction <maximumf>, %195, %cst_68 [1] : vector<8x8xf32> to vector<8xf32>
    %197 = vector.shape_cast %196 : vector<8xf32> to vector<8x1xf32>
    %198 = vector.broadcast %197 : vector<8x1xf32> to vector<8x8xf32>
    %199 = arith.subf %195, %198 : vector<8x8xf32>
    %200 = math.exp %199 : vector<8x8xf32>
    %cst_69 = arith.constant dense<0.000000e+00> : vector<8xf32>
    %201 = vector.multi_reduction <add>, %200, %cst_69 [1] : vector<8x8xf32> to vector<8xf32>
    %202 = vector.shape_cast %201 : vector<8xf32> to vector<8x1xf32>
    %203 = tpu.reciprocal %202 {approx = true} : vector<8x1xf32> -> vector<8x1xf32>
    %204 = vector.broadcast %203 : vector<8x1xf32> to vector<8x8xf32>
    %205 = arith.mulf %200, %204 : vector<8x8xf32>
    %206 = arith.truncf %205 : vector<8x8xf32> to vector<8x8xbf16>
    %207 = vector.extract_strided_slice %168 {offsets = [0, 8], sizes = [8, 8], strides = [1, 1]} : vector<8x32xbf16> to vector<8x8xbf16>
    %cst_70 = arith.constant dense<0.000000e+00> : vector<8x8xf32>
    %208 = tpu.matmul %206, %207, %cst_70 {dimension_numbers = #tpu.dot_dimension_numbers<[1], [0], [0], [1], [0, 0, 1, 1], [], []>} : vector<8x8xbf16>, vector<8x8xbf16>, vector<8x8xf32> -> vector<8x8xf32>
    %209 = arith.truncf %208 : vector<8x8xf32> to vector<8x8xbf16>
    %210 = vector.extract_strided_slice %13 {offsets = [8, 0], sizes = [8, 32], strides = [1, 1]} : vector<32x32xbf16> to vector<8x32xbf16>
    %cst_71 = arith.constant dense<0.000000e+00> : vector<8x32xf32>
    %211 = tpu.matmul %209, %210, %cst_71 {dimension_numbers = #tpu.dot_dimension_numbers<[1], [0], [0], [1], [0, 0, 1, 1], [], []>} : vector<8x8xbf16>, vector<8x32xbf16>, vector<8x32xf32> -> vector<8x32xf32>
    %212 = arith.addf %190, %211 : vector<8x32xf32>
    %213 = vector.extract_strided_slice %164 {offsets = [0, 16], sizes = [8, 8], strides = [1, 1]} : vector<8x32xbf16> to vector<8x8xbf16>
    %214 = vector.extract_strided_slice %166 {offsets = [0, 16], sizes = [8, 8], strides = [1, 1]} : vector<8x32xbf16> to vector<8x8xbf16>
    %cst_72 = arith.constant dense<0.000000e+00> : vector<8x8xf32>
    %215 = tpu.matmul %213, %214, %cst_72 {dimension_numbers = #tpu.dot_dimension_numbers<[1], [1], [0], [0], [0, 0, 1, 0], [], []>} : vector<8x8xbf16>, vector<8x8xbf16>, vector<8x8xf32> -> vector<8x8xf32>
    %216 = vector.broadcast %9 : vector<8x1xf32> to vector<8x8xf32>
    %217 = arith.addf %215, %216 : vector<8x8xf32>
    %cst_73 = arith.constant dense<0xFF800000> : vector<8xf32>
    %218 = vector.multi_reduction <maximumf>, %217, %cst_73 [1] : vector<8x8xf32> to vector<8xf32>
    %219 = vector.shape_cast %218 : vector<8xf32> to vector<8x1xf32>
    %220 = vector.broadcast %219 : vector<8x1xf32> to vector<8x8xf32>
    %221 = arith.subf %217, %220 : vector<8x8xf32>
    %222 = math.exp %221 : vector<8x8xf32>
    %cst_74 = arith.constant dense<0.000000e+00> : vector<8xf32>
    %223 = vector.multi_reduction <add>, %222, %cst_74 [1] : vector<8x8xf32> to vector<8xf32>
    %224 = vector.shape_cast %223 : vector<8xf32> to vector<8x1xf32>
    %225 = tpu.reciprocal %224 {approx = true} : vector<8x1xf32> -> vector<8x1xf32>
    %226 = vector.broadcast %225 : vector<8x1xf32> to vector<8x8xf32>
    %227 = arith.mulf %222, %226 : vector<8x8xf32>
    %228 = arith.truncf %227 : vector<8x8xf32> to vector<8x8xbf16>
    %229 = vector.extract_strided_slice %168 {offsets = [0, 16], sizes = [8, 8], strides = [1, 1]} : vector<8x32xbf16> to vector<8x8xbf16>
    %cst_75 = arith.constant dense<0.000000e+00> : vector<8x8xf32>
    %230 = tpu.matmul %228, %229, %cst_75 {dimension_numbers = #tpu.dot_dimension_numbers<[1], [0], [0], [1], [0, 0, 1, 1], [], []>} : vector<8x8xbf16>, vector<8x8xbf16>, vector<8x8xf32> -> vector<8x8xf32>
    %231 = arith.truncf %230 : vector<8x8xf32> to vector<8x8xbf16>
    %232 = vector.extract_strided_slice %13 {offsets = [16, 0], sizes = [8, 32], strides = [1, 1]} : vector<32x32xbf16> to vector<8x32xbf16>
    %cst_76 = arith.constant dense<0.000000e+00> : vector<8x32xf32>
    %233 = tpu.matmul %231, %232, %cst_76 {dimension_numbers = #tpu.dot_dimension_numbers<[1], [0], [0], [1], [0, 0, 1, 1], [], []>} : vector<8x8xbf16>, vector<8x32xbf16>, vector<8x32xf32> -> vector<8x32xf32>
    %234 = arith.addf %212, %233 : vector<8x32xf32>
    %235 = vector.extract_strided_slice %164 {offsets = [0, 24], sizes = [8, 8], strides = [1, 1]} : vector<8x32xbf16> to vector<8x8xbf16>
    %236 = vector.extract_strided_slice %166 {offsets = [0, 24], sizes = [8, 8], strides = [1, 1]} : vector<8x32xbf16> to vector<8x8xbf16>
    %cst_77 = arith.constant dense<0.000000e+00> : vector<8x8xf32>
    %237 = tpu.matmul %235, %236, %cst_77 {dimension_numbers = #tpu.dot_dimension_numbers<[1], [1], [0], [0], [0, 0, 1, 0], [], []>} : vector<8x8xbf16>, vector<8x8xbf16>, vector<8x8xf32> -> vector<8x8xf32>
    %238 = vector.broadcast %9 : vector<8x1xf32> to vector<8x8xf32>
    %239 = arith.addf %237, %238 : vector<8x8xf32>
    %cst_78 = arith.constant dense<0xFF800000> : vector<8xf32>
    %240 = vector.multi_reduction <maximumf>, %239, %cst_78 [1] : vector<8x8xf32> to vector<8xf32>
    %241 = vector.shape_cast %240 : vector<8xf32> to vector<8x1xf32>
    %242 = vector.broadcast %241 : vector<8x1xf32> to vector<8x8xf32>
    %243 = arith.subf %239, %242 : vector<8x8xf32>
    %244 = math.exp %243 : vector<8x8xf32>
    %cst_79 = arith.constant dense<0.000000e+00> : vector<8xf32>
    %245 = vector.multi_reduction <add>, %244, %cst_79 [1] : vector<8x8xf32> to vector<8xf32>
    %246 = vector.shape_cast %245 : vector<8xf32> to vector<8x1xf32>
    %247 = tpu.reciprocal %246 {approx = true} : vector<8x1xf32> -> vector<8x1xf32>
    %248 = vector.broadcast %247 : vector<8x1xf32> to vector<8x8xf32>
    %249 = arith.mulf %244, %248 : vector<8x8xf32>
    %250 = arith.truncf %249 : vector<8x8xf32> to vector<8x8xbf16>
    %251 = vector.extract_strided_slice %168 {offsets = [0, 24], sizes = [8, 8], strides = [1, 1]} : vector<8x32xbf16> to vector<8x8xbf16>
    %cst_80 = arith.constant dense<0.000000e+00> : vector<8x8xf32>
    %252 = tpu.matmul %250, %251, %cst_80 {dimension_numbers = #tpu.dot_dimension_numbers<[1], [0], [0], [1], [0, 0, 1, 1], [], []>} : vector<8x8xbf16>, vector<8x8xbf16>, vector<8x8xf32> -> vector<8x8xf32>
    %253 = arith.truncf %252 : vector<8x8xf32> to vector<8x8xbf16>
    %254 = vector.extract_strided_slice %13 {offsets = [24, 0], sizes = [8, 32], strides = [1, 1]} : vector<32x32xbf16> to vector<8x32xbf16>
    %cst_81 = arith.constant dense<0.000000e+00> : vector<8x32xf32>
    %255 = tpu.matmul %253, %254, %cst_81 {dimension_numbers = #tpu.dot_dimension_numbers<[1], [0], [0], [1], [0, 0, 1, 1], [], []>} : vector<8x8xbf16>, vector<8x32xbf16>, vector<8x32xf32> -> vector<8x32xf32>
    %256 = arith.addf %234, %255 : vector<8x32xf32>
    %cst_82 = arith.constant dense<0.000000e+00> : vector<8xf32>
    %257 = vector.multi_reduction <add>, %256, %cst_82 [1] : vector<8x32xf32> to vector<8xf32>
    %258 = vector.shape_cast %257 : vector<8xf32> to vector<8x1xf32>
    %cst_83 = arith.constant 3.200000e+01 : f32
    %259 = vector.broadcast %cst_83 : f32 to vector<8x1xf32>
    %260 = arith.divf %258, %259 : vector<8x1xf32>
    %261 = vector.broadcast %260 : vector<8x1xf32> to vector<8x32xf32>
    %262 = arith.subf %256, %261 : vector<8x32xf32>
    %263 = arith.mulf %262, %262 : vector<8x32xf32>
    %cst_84 = arith.constant dense<0.000000e+00> : vector<8xf32>
    %264 = vector.multi_reduction <add>, %263, %cst_84 [1] : vector<8x32xf32> to vector<8xf32>
    %265 = vector.shape_cast %264 : vector<8xf32> to vector<8x1xf32>
    %cst_85 = arith.constant 3.200000e+01 : f32
    %266 = vector.broadcast %cst_85 : f32 to vector<8x1xf32>
    %267 = arith.divf %265, %266 : vector<8x1xf32>
    %cst_86 = arith.constant 9.99999974E-6 : f32
    %268 = vector.broadcast %cst_86 : f32 to vector<8x1xf32>
    %269 = arith.addf %267, %268 : vector<8x1xf32>
    %270 = math.rsqrt %269 : vector<8x1xf32>
    %271 = vector.broadcast %270 : vector<8x1xf32> to vector<8x32xf32>
    %272 = arith.mulf %262, %271 : vector<8x32xf32>
    %c0_87 = arith.constant 0 : index
    %c0_88 = arith.constant 0 : index
    %273 = vector.load %arg11[%c0_87, %c0_88] : memref<1x32xbf16, #tpu.memory_space<vmem>>, vector<1x32xbf16>
    %274 = arith.extf %273 : vector<1x32xbf16> to vector<1x32xf32>
    %275 = vector.broadcast %274 : vector<1x32xf32> to vector<8x32xf32>
    %276 = arith.mulf %272, %275 : vector<8x32xf32>
    %c0_89 = arith.constant 0 : index
    %c0_90 = arith.constant 0 : index
    %277 = vector.load %arg12[%c0_89, %c0_90] : memref<1x32xbf16, #tpu.memory_space<vmem>>, vector<1x32xbf16>
    %278 = arith.extf %277 : vector<1x32xbf16> to vector<1x32xf32>
    %279 = vector.broadcast %278 : vector<1x32xf32> to vector<8x32xf32>
    %280 = arith.addf %276, %279 : vector<8x32xf32>
    %281 = arith.truncf %280 : vector<8x32xf32> to vector<8x32xbf16>
    %c0_91 = arith.constant 0 : index
    %c0_92 = arith.constant 0 : index
    %282 = vector.load %arg13[%c0_91, %c0_92] : memref<32x128xbf16, #tpu.memory_space<vmem>>, vector<32x128xbf16>
    %cst_93 = arith.constant dense<0.000000e+00> : vector<8x128xf32>
    %283 = tpu.matmul %281, %282, %cst_93 {dimension_numbers = #tpu.dot_dimension_numbers<[1], [0], [0], [1], [0, 0, 1, 1], [], []>} : vector<8x32xbf16>, vector<32x128xbf16>, vector<8x128xf32> -> vector<8x128xf32>
    %c0_94 = arith.constant 0 : index
    %c0_95 = arith.constant 0 : index
    %284 = vector.load %arg14[%c0_94, %c0_95] : memref<1x128xbf16, #tpu.memory_space<vmem>>, vector<1x128xbf16>
    %285 = arith.extf %284 : vector<1x128xbf16> to vector<1x128xf32>
    %286 = vector.broadcast %285 : vector<1x128xf32> to vector<8x128xf32>
    %287 = arith.addf %283, %286 : vector<8x128xf32>
    %cst_96 = arith.constant 0.000000e+00 : f32
    %288 = vector.broadcast %cst_96 : f32 to vector<8x128xf32>
    %289 = arith.cmpf oge, %287, %288 : vector<8x128xf32>
    %cst_97 = arith.constant 0.00999999977 : f32
    %290 = vector.broadcast %cst_97 : f32 to vector<8x128xf32>
    %291 = arith.mulf %290, %287 : vector<8x128xf32>
    %292 = arith.select %289, %287, %291 : vector<8x128xi1>, vector<8x128xf32>
    %293 = arith.truncf %292 : vector<8x128xf32> to vector<8x128xbf16>
    %c0_98 = arith.constant 0 : index
    %c0_99 = arith.constant 0 : index
    %294 = vector.load %arg15[%c0_98, %c0_99] : memref<128x32xbf16, #tpu.memory_space<vmem>>, vector<128x32xbf16>
    %cst_100 = arith.constant dense<0.000000e+00> : vector<8x32xf32>
    %295 = tpu.matmul %293, %294, %cst_100 {dimension_numbers = #tpu.dot_dimension_numbers<[1], [0], [0], [1], [0, 0, 1, 1], [], []>} : vector<8x128xbf16>, vector<128x32xbf16>, vector<8x32xf32> -> vector<8x32xf32>
    %c0_101 = arith.constant 0 : index
    %c0_102 = arith.constant 0 : index
    %296 = vector.load %arg16[%c0_101, %c0_102] : memref<1x32xbf16, #tpu.memory_space<vmem>>, vector<1x32xbf16>
    %297 = arith.extf %296 : vector<1x32xbf16> to vector<1x32xf32>
    %298 = vector.broadcast %297 : vector<1x32xf32> to vector<8x32xf32>
    %299 = arith.addf %295, %298 : vector<8x32xf32>
    %300 = arith.addf %299, %256 : vector<8x32xf32>
    %301 = arith.truncf %300 : vector<8x32xf32> to vector<8x32xbf16>
    %c0_103 = arith.constant 0 : index
    %c0_104 = arith.constant 0 : index
    %c0_105 = arith.constant 0 : index
    %302 = vector.load %arg17[%c0_103, %c0_104, %c0_105] : memref<1x8x32xbf16, #tpu.memory_space<vmem>>, vector<1x8x32xbf16>
    %303 = vector.shape_cast %302 : vector<1x8x32xbf16> to vector<8x32xbf16>
    %304 = vector.shape_cast %301 : vector<8x32xbf16> to vector<1x8x32xbf16>
    tpu.vector_store %arg17[%c0_103, %c0_104, %c0_105], %304 {strides = array<i32>} : memref<1x8x32xbf16, #tpu.memory_space<vmem>>, vector<1x8x32xbf16>,
    return
  }
  func.func @transform_0(%arg0: i32) -> (i32, i32, i32) {
    %c0_i32 = arith.constant 0 : i32
    %c0_i32_0 = arith.constant 0 : i32
    %c0_i32_1 = arith.constant 0 : i32
    return %arg0, %c0_i32, %c0_i32_0 : i32, i32, i32
  }
  func.func @transform_1(%arg0: i32) -> (i32, i32, i32) {
    %c0_i32 = arith.constant 0 : i32
    %c0_i32_0 = arith.constant 0 : i32
    %c0_i32_1 = arith.constant 0 : i32
    return %arg0, %c0_i32, %c0_i32_0 : i32, i32, i32
  }
  func.func @transform_2(%arg0: i32) -> (i32, i32, i32) {
    %c0_i32 = arith.constant 0 : i32
    %c0_i32_0 = arith.constant 0 : i32
    %c0_i32_1 = arith.constant 0 : i32
    return %arg0, %c0_i32, %c0_i32_0 : i32, i32, i32
  }
  func.func @transform_3(%arg0: i32) -> (i32, i32, i32) {
    %c0_i32 = arith.constant 0 : i32
    %c0_i32_0 = arith.constant 0 : i32
    %c0_i32_1 = arith.constant 0 : i32
    return %arg0, %c0_i32, %c0_i32_0 : i32, i32, i32
  }
  func.func @transform_4(%arg0: i32) -> (i32, i32) {
    %c0_i32 = arith.constant 0 : i32
    %c0_i32_0 = arith.constant 0 : i32
    %c0_i32_1 = arith.constant 0 : i32
    return %c0_i32, %c0_i32_0 : i32, i32
  }
  func.func @transform_5(%arg0: i32) -> (i32, i32) {
    %c0_i32 = arith.constant 0 : i32
    %c0_i32_0 = arith.constant 0 : i32
    %c0_i32_1 = arith.constant 0 : i32
    return %c0_i32, %c0_i32_0 : i32, i32
  }
  func.func @transform_6(%arg0: i32) -> (i32, i32) {
    %c0_i32 = arith.constant 0 : i32
    %c0_i32_0 = arith.constant 0 : i32
    %c0_i32_1 = arith.constant 0 : i32
    return %c0_i32, %c0_i32_0 : i32, i32
  }
  func.func @transform_7(%arg0: i32) -> (i32, i32) {
    %c0_i32 = arith.constant 0 : i32
    %c0_i32_0 = arith.constant 0 : i32
    %c0_i32_1 = arith.constant 0 : i32
    return %c0_i32, %c0_i32_0 : i32, i32
  }
  func.func @transform_8(%arg0: i32) -> (i32, i32) {
    %c0_i32 = arith.constant 0 : i32
    %c0_i32_0 = arith.constant 0 : i32
    %c0_i32_1 = arith.constant 0 : i32
    return %c0_i32, %c0_i32_0 : i32, i32
  }
  func.func @transform_9(%arg0: i32) -> (i32, i32) {
    %c0_i32 = arith.constant 0 : i32
    %c0_i32_0 = arith.constant 0 : i32
    %c0_i32_1 = arith.constant 0 : i32
    return %c0_i32, %c0_i32_0 : i32, i32
  }
  func.func @transform_10(%arg0: i32) -> (i32, i32) {
    %c0_i32 = arith.constant 0 : i32
    %c0_i32_0 = arith.constant 0 : i32
    %c0_i32_1 = arith.constant 0 : i32
    return %c0_i32, %c0_i32_0 : i32, i32
  }
  func.func @transform_11(%arg0: i32) -> (i32, i32) {
    %c0_i32 = arith.constant 0 : i32
    %c0_i32_0 = arith.constant 0 : i32
    %c0_i32_1 = arith.constant 0 : i32
    return %c0_i32, %c0_i32_0 : i32, i32
  }
  func.func @transform_12(%arg0: i32) -> (i32, i32) {
    %c0_i32 = arith.constant 0 : i32
    %c0_i32_0 = arith.constant 0 : i32
    %c0_i32_1 = arith.constant 0 : i32
    return %c0_i32, %c0_i32_0 : i32, i32
  }
  func.func @transform_13(%arg0: i32) -> (i32, i32) {
    %c0_i32 = arith.constant 0 : i32
    %c0_i32_0 = arith.constant 0 : i32
    %c0_i32_1 = arith.constant 0 : i32
    return %c0_i32, %c0_i32_0 : i32, i32
  }
  func.func @transform_14(%arg0: i32) -> (i32, i32) {
    %c0_i32 = arith.constant 0 : i32
    %c0_i32_0 = arith.constant 0 : i32
    %c0_i32_1 = arith.constant 0 : i32
    return %c0_i32, %c0_i32_0 : i32, i32
  }
  func.func @transform_15(%arg0: i32) -> (i32, i32) {
    %c0_i32 = arith.constant 0 : i32
    %c0_i32_0 = arith.constant 0 : i32
    %c0_i32_1 = arith.constant 0 : i32
    return %c0_i32, %c0_i32_0 : i32, i32
  }
  func.func @transform_16(%arg0: i32) -> (i32, i32, i32) {
    %c0_i32 = arith.constant 0 : i32
    %c0_i32_0 = arith.constant 0 : i32
    %c0_i32_1 = arith.constant 0 : i32
    return %arg0, %c0_i32, %c0_i32_0 : i32, i32, i32
  }
}

</mosaic_0001>

<bundles_post_ra>
// kernel: sub.1
= control target key start
LH: loop header
LB: loop body
LE: loop exit
PB: predicated region body
PF: predicated region fallthrough
CT: control target
= control target key end

     0   :  { %s56_s0 = inlined_call_operand.vmem [shape: f32[2,8,1], index: 0, kind: input, shape index: {}]   ;;  %s57_s1 = inlined_call_operand.vmem [shape: f32[2,8,1], index: 1, kind: input, shape index: {}]   ;;  %s58_s2 = inlined_call_operand.vmem [shape: f32[2,8,1], index: 2, kind: output, shape index: {}]  }
   0x1   :  { %v3_v0 = vld [vmem:[%s56_s0] sm:$0x1]  ;;  %v20_v2 = vld [vmem:[%s56_s0 + $0x1] sm:$0x1] }
   0x2   :  { %v4_v1 = vld [vmem:[%s57_s1] sm:$0x1]  ;;  %v21_v4 = vld [vmem:[%s57_s1 + $0x1] sm:$0x1] }
   0x3   :  { %v7_v3 = vsub.f32 %v3_v0, %v4_v1  ;;  %v16_v5 = vsub.f32 %v20_v2, %v21_v4 }
   0x5   :  { %9 = vst [vmem:[%s58_s2] sm:$0x1] %v7_v3  ;;  %22 = vst [vmem:[%s58_s2 + $0x1] sm:$0x1] %v16_v5 }

// kernel: model_forward.7
= control target key start
LH: loop header
LB: loop body
LE: loop exit
PB: predicated region body
PF: predicated region fallthrough
CT: control target
= control target key end

     0   :  { %vm26_vm0 = vcmask 261120   ;;  %s299_s0 = inlined_call_operand.vmem [shape: bf16[16,32], index: 0, kind: input, shape index: {}]   ;;  %s300_s1 = inlined_call_operand.vmem [shape: bf16[1,32], index: 1, kind: input, shape index: {}]   ;;  %s301_s2 = inlined_call_operand.vmem [shape: bf16[1,32], index: 2, kind: input, shape index: {}]   ;;  %s302_s3 = inlined_call_operand.vmem [shape: bf16[32,16], index: 3, kind: input, shape index: {}]   ;;  %s303_s4 = inlined_call_operand.vmem [shape: bf16[1,16], index: 4, kind: input, shape index: {}]   ;;  %s304_s5 = inlined_call_operand.hbm [shape: f32[16,16], index: 5, kind: output, shape index: {}]  }
   0x1   :  { %v172_v0 = vld [vmem:[%s299_s0] sm:$0xff]  }
   0x2   :  { %v173_v1 = vunpack.c.l.bf16 %v172_v0  ;;  %v174_v2 = vunpack.c.h.bf16 %v172_v0 }
   0x3   :  { %10 = vsyncpa [#allocation3], 0  ;;  %v191_v15 = vld [vmem:[%s302_s3] sm:$0xff]   ;;  %v229_v16 = vmov 0.0   ;;  %v192_v17 = vld [vmem:[%s302_s3 + $0x8] sm:$0xff]   ;;  %vm230_vm1 = vmmov 0   ;;  %v56_v22 = vlaneseq }
   0x4   :  { %v27_v3 = vsel %vm26_vm0, %v173_v1, 0.0  ;;  %v30_v4 = vsel %vm26_vm0, %v174_v2, 0.0  ;;  %178 = vmatprep.subr.bf16.mxu0 %v229_v16  ;;  %182 = vmatprep.mubr.msk.bf16.mxu0 %vm230_vm1, %v229_v16  ;;  %v54_v26 = vld [vmem:[%s300_s1] sm:$0x1]  ;;  %vm149_vm2 = vcmask 130048  }
   0x5   :  { %28 = vadd.xlane.f32.xlu0 %v27_v3  ;;  %179 = vmatpush3.bf16.msra.mxu0 %v191_v15  ;;  %v57_v25 = vshrl.u32 %v56_v22, 7  ;;  %v55_v27 = vunpack.c.l.bf16 %v54_v26  ;;  %v62_v29 = vld [vmem:[%s301_s2] sm:$0x1]  ;;  %s231_s2 = smov [#allocation2]  }
   0x6   :  { %180 = vmatprep.subr.bf16.mxu0 %v229_v16  ;;  %v63_v33 = vunpack.c.l.bf16 %v62_v29  ;;  %v75_v42 = vld [vmem:[%s303_s4] sm:$0x1]  ;;  %s157_s4 = sshll.u32 %s231_s2, 4  ;;  %s158_s4 = int_to_ptr.vmem [resolvable:$true] %s157_s4 }
   0x7   :  { %v58_v28 = vsub.s32 0, %v57_v25  ;;  %v76_v43 = vunpack.c.l.bf16 %v75_v42  ;;  %s205_s27 = scalar_lea.vmem %s158_s4, 256  ;;  %p210_p1 = scmp.lt.s32.totalorder %s158_s4, %s158_s4 }
   0x8   :  { %p206_p0 = scmp.ne.s32.totalorder %s158_s4, %s205_s27  ;;  %p211_p2 = scmp.lt.s32.totalorder %s205_s27, %s205_s27 }
   0x9   :  { %31 = vadd.xlane.f32.xlu0 %v30_v4  ;;  %181 = vmatpush3.bf16.msra.mxu0 %v192_v17  ;;  %v59_v32 = vrot.slane %v55_v27, %v58_v28  ;;  %v67_v37 = vrot.slane %v63_v33, %v58_v28  ;;  %v80_v44 = vrot.slane %v76_v43, %v58_v28 }
   0xa   :  { %p212_p3 = por %p211_p2, %p210_p1 }
   0xc   :  { %p213_p4 = pnand %p212_p3, %p206_p0 }
  0x92   :  { %v29_v5 = vpop.xlane.xlu0 %28 }
  0x93   :  { %v34_v6 = vmul.f32 0.03125, %v29_v5 }
  0x95   :  { %v36_v7 = vsub.f32 %v173_v1, %v34_v6 }
  0x96   :  { %v32_v8 = vpop.xlane.xlu0 %31 }
  0x97   :  { %v35_v9 = vmul.f32 0.03125, %v32_v8  ;;  %v38_v10 = vmul.f32 %v36_v7, %v36_v7 }
  0x99   :  { %v37_v11 = vsub.f32 %v174_v2, %v35_v9  ;;  %v40_v12 = vsel %vm26_vm0, %v38_v10, 0.0 }
  0x9a   :  { %41 = vadd.xlane.f32.xlu1 %v40_v12 }
  0x9b   :  { %v39_v13 = vmul.f32 %v37_v11, %v37_v11 }
  0x9d   :  { %v43_v14 = vsel %vm26_vm0, %v39_v13, 0.0 }
  0x9e   :  { %44 = vadd.xlane.f32.xlu1 %v43_v14 }
 0x127   :  { %v42_v18 = vpop.xlane.xlu1 %41 }
 0x128   :  { %v46_v19 = vmul.f32 0.03125, %v42_v18 }
 0x12a   :  { %v48_v20 = vadd.f32 1e-05, %v46_v19 }
 0x12b   :  { %v45_v21 = vpop.xlane.xlu1 %44 }
 0x12c   :  { %193 = vrsqrt.f32 %v48_v20  ;;  %v47_v23 = vmul.f32 0.03125, %v45_v21 }
 0x12e   :  { %v49_v24 = vadd.f32 1e-05, %v47_v23 }
 0x130   :  { %195 = vrsqrt.f32 %v49_v24 }
 0x136   :  { %v194_v30 = vpop.eup %193 }
 0x137   :  { %v52_v31 = vmul.f32 %v194_v30, %v36_v7 }
 0x139   :  { %v60_v36 = vmul.f32 %v59_v32, %v52_v31 }
 0x13a   :  { %v196_v34 = vpop.eup %195 }
 0x13b   :  { %v53_v35 = vmul.f32 %v196_v34, %v37_v11  ;;  %v68_v39 = vadd.f32 %v67_v37, %v60_v36 }
 0x13d   :  { %v61_v38 = vmul.f32 %v59_v32, %v53_v35 }
 0x13f   :  { %v69_v40 = vadd.f32 %v67_v37, %v61_v38 }
 0x141   :  { %v70_v41 = vpack.c.bf16 %v69_v40, %v68_v39 }
 0x143   :  { %183 = vmatmul.mubr.msk.bf16.vlgmr.msra.gmra.mrb[0].mxu0 %vm26_vm0, %v70_v41 }
 0x216   :  { %v130_v45 = vpop.f32.mrb[0].mxu0 }
 0x217   :  { %v131_v46 = vadd.f32 %v130_v45, %v80_v44  ;;  %v184_v47 = vpop.f32.mrb[1].mxu0 }
 0x218   :  { %v133_v48 = vpop.f32.mrb[2].mxu0 }
 0x219   :  { %v137_v49 = vsub.f32 0.0, %v131_v46  ;;  %v134_v50 = vadd.f32 %v133_v48, %v80_v44  ;;  %v185_v51 = vpop.f32.mrb[3].mxu0 }
 0x21b   :  { %v139_v52 = vmul.f32 1.442695, %v137_v49  ;;  %v138_v53 = vsub.f32 0.0, %v134_v50 }
 0x21d   :  { %197 = vpow2.f32 %v139_v52  ;;  %v141_v54 = vmul.f32 1.442695, %v138_v53 }
 0x21f   :  { %199 = vpow2.f32 %v141_v54 }
 0x227   :  { %v198_v55 = vpop.eup %197 }
 0x228   :  { %v143_v56 = vadd.f32 1.0, %v198_v55 }
 0x229   :  { %v200_v57 = vpop.eup %199 }
 0x22a   :  { %201 = vrcp.f32 %v143_v56  ;;  %v144_v58 = vadd.f32 1.0, %v200_v57 }
 0x22c   :  { %203 = vrcp.f32 %v144_v58 }
 0x234   :  { %v202_v59 = vpop.eup %201 }
 0x235   :  { %150 = vst.msk [vmem:[#allocation2] sm:$0xff] %vm149_vm2, %v202_v59 }
 0x236   :  { %v204_v60 = vpop.eup %203 }
 0x237   :  { %151 = vst.msk [vmem:[#allocation2 + $0x8] sm:$0xff] %vm149_vm2, %v204_v60 }
 0x238   :  { %216 = shalt.err (!%p213_p4)
}
 0x239   :  { %s217_s30 = scalar_lea.hbm %s304_s5, 256 }
 0x23a   :  { %p218_p5 = scmp.ne.s32.totalorder %s304_s5, %s217_s30  ;;  %p221_p6 = scmp.lt.u32.totalorder %s217_s30, %s304_s5 }
 0x23c   :  { %p223_p7 = pnand %p221_p6, %p218_p5 }
 0x23e   :  { %226 = shalt.err (!%p223_p7)
}
 0x23f   :  { %s232_s10 = smov 128   ;;  %s233_s11 = smov 8  }
 0x240   :  { %163 = dma.vmem_to_hbm [thread:$0]  %s158_s4, 256, %s304_s5, [#allocation3], %s232_s10, %s232_s10, %s233_s11  }
 0x241   :  { %227 = dma.done.wait [#allocation3], 256  }
 0x242   :  { %228 = vsyncadd [#allocation3], 4294967040 }
 0x243   :  { %167 = vsyncpa [#allocation3], 1 }

// kernel: model_forward.4
= control target key start
LH: loop header
LB: loop body
LE: loop exit
PB: predicated region body
PF: predicated region fallthrough
CT: control target
= control target key end

     0   :  { %s2038_s18 = smov 0   ;;  %s2300_s0 = inlined_call_operand.vmem [shape: bf16[4,8,32], index: 0, kind: input, shape index: {}]   ;;  %s2301_s1 = inlined_call_operand.vmem [shape: f32[4,8,1], index: 1, kind: input, shape index: {}]   ;;  %s2302_s2 = inlined_call_operand.vmem [shape: f32[4,8,1], index: 2, kind: input, shape index: {}]   ;;  %s2303_s3 = inlined_call_operand.vmem [shape: bf16[1,32], index: 3, kind: input, shape index: {}]   ;;  %s2304_s4 = inlined_call_operand.vmem [shape: bf16[1,32], index: 4, kind: input, shape index: {}]   ;;  %s2305_s5 = inlined_call_operand.vmem [shape: bf16[32,32], index: 5, kind: input, shape index: {}]   ;;  %s2306_s6 = inlined_call_operand.vmem [shape: bf16[32,32], index: 6, kind: input, shape index: {}]   ;;  %s2307_s7 = inlined_call_operand.vmem [shape: bf16[32,32], index: 7, kind: input, shape index: {}]   ;;  %s2308_s8 = inlined_call_operand.vmem [shape: bf16[32,32], index: 8, kind: input, shape index: {}]   ;;  %s2309_s9 = inlined_call_operand.vmem [shape: bf16[1,32], index: 9, kind: input, shape index: {}]   ;;  %s2310_s10 = inlined_call_operand.vmem [shape: bf16[1,32], index: 10, kind: input, shape index: {}]   ;;  %s2311_s11 = inlined_call_operand.vmem [shape: bf16[32,128], index: 11, kind: input, shape index: {}]   ;;  %s2312_s12 = inlined_call_operand.vmem [shape: bf16[1,128], index: 12, kind: input, shape index: {}]   ;;  %s2313_s13 = inlined_call_operand.vmem [shape: bf16[128,32], index: 13, kind: input, shape index: {}]   ;;  %s2314_s14 = inlined_call_operand.vmem [shape: bf16[1,32], index: 14, kind: input, shape index: {}]   ;;  %s2315_s15 = inlined_call_operand.vmem [shape: bf16[4,8,32], index: 15, kind: output, shape index: {}]  }
   0x1 LB: > { %s1667_s19 = sadd.s32 4294967295, %s1950_s18   ;;  %p1671_p0 = scmp.ge.s32.totalorder %s1950_s18, 1  ;;  %s1950_s18 = sphi %s2038_s18, %s25_s18  }
   0x2   : > { %p454_p1 = scmp.lt.s32.totalorder %s1950_s18, 5 }
   0x4   : > { %p455_p2 = pnand %p1671_p0, %p454_p1 }
   0x5   : > { %p508_p3 = scmp.lt.s32.totalorder (!%p455_p2), %s1667_s19, 3  ;;  %vm529_vm0 = vcmask (!%p455_p2), 261120   ;;  %v1908_v8 = vld [vmem:[%s2305_s5] sm:$0xff] (!%p455_p2)   ;;  %v1952_v9 = vmov (!%p455_p2), 0.0   ;;  %vm1953_vm1 = vmmov (!%p455_p2), 0   ;;  %v1909_v10 = vld [vmem:[%s2305_s5 + $0x8] sm:$0xff] (!%p455_p2)   ;;  %v546_v16 = vlaneseq (!%p455_p2) }
   0x6   : > { %458 = sbr.rel (%p455_p2) target bundleno = 3359 (0xd1f), region = 80  ;;  %1755 = vmatprep.subr.bf16.mxu1 (!%p455_p2), %v1952_v9  ;;  %1759 = vmatprep.mubr.msk.bf16.mxu1 (!%p455_p2), %vm1953_vm1, %v1952_v9  ;;  %v1954_v11 = vmov (!%p455_p2), 0   ;;  %v544_v19 = vld [vmem:[%s2303_s3] sm:$0x1] (!%p455_p2)  ;;  %v1911_v32 = vld [vmem:[%s2306_s6 + $0x8] sm:$0xff] (!%p455_p2)   ;;  %vm748_vm2 = vcmask (!%p455_p2), 64512  }
   0x7   : > { %1756 = vmatpush3.bf16.msra.mxu1 (!%p455_p2), %v1908_v8  ;;  %1785 = vmatprep.subr.bf16.mxu0 (!%p455_p2), %v1952_v9  ;;  %v547_v18 = vshrl.u32 (!%p455_p2), %v546_v16, 7  ;;  %v551_v20 = vld [vmem:[%s2304_s4] sm:$0x1] (!%p455_p2)  ;;  %v545_v21 = vunpack.c.l.bf16 (!%p455_p2), %v544_v19  ;;  %v1913_v34 = vld [vmem:[%s2307_s7 + $0x8] sm:$0xff] (!%p455_p2)   ;;  %vm810_vm3 = vcmask (!%p455_p2), 1043456   ;;  %s1956_s24 = smov (!%p455_p2), 112  }
   0x8   : > { %1757 = vmatprep.subr.bf16.mxu1 (!%p455_p2), %v1952_v9  ;;  %1787 = vmatprep.mubr.msk.bf16.mxu0 (!%p455_p2), %vm1953_vm1, %v1952_v9  ;;  %v552_v23 = vunpack.c.l.bf16 (!%p455_p2), %v551_v20  ;;  %v1910_v30 = vld [vmem:[%s2306_s6] sm:$0xff] (!%p455_p2)   ;;  %s1957_s27 = smov (!%p455_p2), 104   ;;  %vm1588_vm5 = vcmask (!%p455_p2), 257024  }
   0x9   : > { %1906 = vset.pattern.permute.xlu1 (!%p455_p2), %v1954_v11  ;;  %1907 = vset.pattern.permute.xlu0 (!%p455_p2), %v1954_v11  ;;  %v2087_v22 = vsub.s32 (!%p455_p2), 0, %v547_v18  ;;  %v1912_v33 = vld [vmem:[%s2307_s7] sm:$0xff] (!%p455_p2)  }
   0xb   : > { %1758 = vmatpush3.bf16.msra.mxu1 (!%p455_p2), %v1909_v10  ;;  %v549_v24 = vrot.slane (!%p455_p2), %v545_v21, %v2087_v22  ;;  %v556_v27 = vrot.slane (!%p455_p2), %v552_v23, %v2087_v22 }
   0xc   : > { %1763 = vmatprep.subr.bf16.mxu1 (!%p455_p2), %v1952_v9 }
   0xd   : > { %s2317_s19 = smov (!%p508_p3, %s1667_s19), 3 }
   0xe   : > { %s1672_s20 = sshll.u32 %s2317_s19, 2  ;;  %s1673_s28 = sshll.u32 %s2317_s19, 3 }
   0xf   : > { %s511_s23 = scalar_lea.vmem %s2300_s0, %s1672_s20  ;;  %s515_s16 = scalar_lea.vmem %s2301_s1, %s1673_s28 }
  0x10   : > { %v525_v0 = vld [vmem:[%s511_s23] sm:$0xf]  ;;  %s519_s22 = scalar_lea.vmem %s2302_s2, %s1673_s28  ;;  %s1955_s23 = smov 120  }
  0x11   : > { %v2054_v1 = vunpack.c.l.bf16 %v525_v0  ;;  %v527_v12 = vld [vmem:[%s515_s16] sm:$0xff]  ;;  %s523_s28 = scalar_lea.vmem %s2315_s15, %s1672_s20 }
  0x12   : > { %632 = vperm.xlu1 %1906, %v527_v12   ;;  %v528_v13 = vld [vmem:[%s519_s22] sm:$0xff] }
  0x13   : > { %v530_v2 = vsel %vm529_vm0, %v2054_v1, 0.0 }
  0x14   : > { %531 = vadd.xlane.f32.xlu0 %v530_v2 }
  0x16   : > { %745 = vperm.xlu1 %1906, %v528_v13  }
  0x91   : > { %v633_v42 = vpop.permute.xlu1 %632 }
  0x95   : > { %v2132_v54 = vpop.permute.xlu1 %745 }
  0xa1   : > { %v532_v3 = vpop.xlane.xlu0 %531 }
  0xa2   : > { %v534_v4 = vmul.f32 0.03125, %v532_v3 }
  0xa4   : > { %v535_v5 = vsub.f32 %v2054_v1, %v534_v4 }
  0xa6   : > { %v536_v6 = vmul.f32 %v535_v5, %v535_v5 }
  0xa8   : > { %v537_v7 = vsel %vm529_vm0, %v536_v6, 0.0 }
  0xa9   : > { %538 = vadd.xlane.f32.xlu0 %v537_v7 }
 0x136   : > { %v539_v14 = vpop.xlane.xlu0 %538 }
 0x137   : > { %v540_v15 = vmul.f32 0.03125, %v539_v14  ;;  %v571_v14 = vld [vmem:[%s2308_s8] sm:$0xf] }
 0x139   : > { %v541_v17 = vadd.f32 1e-05, %v540_v15  ;;  %v859_v15 = vsel %vm810_vm3, %v571_v14, 0 }
 0x13b   : > { %1924 = vrsqrt.f32 %v541_v17 }
 0x145   : > { %v1925_v25 = vpop.eup %1924 }
 0x146   : > { %v543_v26 = vmul.f32 %v1925_v25, %v535_v5 }
 0x148   : > { %v550_v28 = vmul.f32 %v549_v24, %v543_v26 }
 0x14a   : > { %v557_v29 = vadd.f32 %v556_v27, %v550_v28 }
 0x14c   : > { %v558_v31 = vpack.c.bf16 %v557_v29, %v557_v29 }
 0x14e   : > { %1760 = vmatmul.mubr.msk.bf16.vlgmr.msra.gmra.mrb[0].mxu1 %vm529_vm0, %v558_v31 }
 0x14f   : > { %1764 = vmatpush3.bf16.msra.mxu1 %v1910_v30  ;;  %1767 = vmatprep.mubr.msk.bf16.mxu1 %vm1953_vm1, %v1952_v9 }
 0x150   : > { %1765 = vmatprep.subr.bf16.mxu1 %v1952_v9 }
 0x153   : > { %1766 = vmatpush3.bf16.msra.mxu1 %v1911_v32 }
 0x154   : > { %1771 = vmatprep.subr.bf16.mxu1 %v1952_v9 }
 0x156   : > { %1768 = vmatmul.mubr.msk.bf16.vlgmr.msra.gmra.mrb[4].mxu1 %vm529_vm0, %v558_v31 }
 0x157   : > { %1772 = vmatpush3.bf16.msra.mxu1 %v1912_v33  ;;  %1775 = vmatprep.mubr.msk.bf16.mxu1 %vm1953_vm1, %v1952_v9 }
 0x158   : > { %1773 = vmatprep.subr.bf16.mxu1 %v1952_v9 }
 0x15b   : > { %1774 = vmatpush3.bf16.msra.mxu1 %v1913_v34 }
 0x15c   : > { %1779 = vmatprep.subr.bf16.mxu1 %v1952_v9 }
 0x15e   : > { %1776 = vmatmul.mubr.msk.bf16.vlgmr.msra.gmra.mrb[8].mxu1 %vm529_vm0, %v558_v31 }
 0x15f   : > { %1781 = vmatprep.mubr.msk.bf16.mxu1 %vm1953_vm1, %v1952_v9 }
 0x221   : > { %v624_v35 = vpop.f32.mrb[0].mxu1 }
 0x222   : > { %v1761_v36 = vpop.f32.mrb[1].mxu1  ;;  %v635_v46 = vmul.f32 %v633_v42, %v624_v35 }
 0x223   : > { %v627_v37 = vpop.f32.mrb[2].mxu1 }
 0x224   : > { %v1762_v38 = vpop.f32.mrb[3].mxu1  ;;  %v2121_v48 = vpack.c.bf16 %v635_v46, %v635_v46 }
 0x229   : > { %v683_v39 = vpop.f32.mrb[4].mxu1 }
 0x22a   : > { %v2116_v40 = vpack.c.bf16 %v683_v39, %v683_v39  ;;  %v1769_v41 = vpop.f32.mrb[5].mxu1 }
 0x22b   : > { %v686_v43 = vpop.f32.mrb[6].mxu1 }
 0x22c   : > { %v1770_v44 = vpop.f32.mrb[7].mxu1  ;;  %v753_v45 = vsel %vm748_vm2, %v2116_v40, 0 }
 0x22d   : > { %1780 = vmatpush3.bf16.xpose.msra.mxu1 %v753_v45 }
 0x22e   : > { %1791 = vmatprep.subr.bf16.mxu1 %v1952_v9 }
 0x231   : > { %v736_v47 = vpop.f32.mrb[8].mxu1 }
 0x232   : > { %v2123_v49 = vpack.c.bf16 %v736_v47, %v736_v47  ;;  %v1777_v50 = vpop.f32.mrb[9].mxu1 }
 0x233   : > { %v739_v51 = vpop.f32.mrb[10].mxu1 }
 0x234   : > { %v1778_v52 = vpop.f32.mrb[11].mxu1  ;;  %1782 = vmatmul.mubr.msk.bf16.vlgmr.msra.gmra.mrb[12].mxu1 %vm748_vm2, %v2121_v48  ;;  %v812_v53 = vsel %vm810_vm3, %v2123_v49, 0 }
 0x235   : > { %1786 = vmatpush3.bf16.msra.mxu0 %v812_v53  ;;  %1793 = vmatprep.mubr.msk.bf16.mxu1 %vm1953_vm1, %v1952_v9 }
 0x236   : > { %1797 = vmatprep.subr.bf16.mxu0 %v1952_v9  ;;  %1792 = vmatpush3.bf16.msra.mxu1 %v859_v15 }
 0x237   : > { %1803 = vmatprep.subr.bf16.mxu1 %v1952_v9 }
 0x307   : > { %v789_v55 = vpop.f32.mrb[12].mxu1 }
 0x308   : > { %v790_v56 = vadd.f32 %v789_v55, %v2132_v54  ;;  %v1783_v57 = vpop.f32.mrb[13].mxu1 }
 0x309   : > { %v792_v58 = vpop.f32.mrb[14].mxu1 }
 0x30a   : > { %v1784_v59 = vpop.f32.mrb[15].mxu1  ;;  %v795_v60 = vsel %vm748_vm2, %v790_v56, -inf }
 0x30b   : > { %796 = vmax.xlane.f32.xlu0 %v795_v60 }
 0x321   : > { %906 = vrot.lane.b32.xlu0 %v2116_v40, %s1955_s23 }
 0x325   : > { %903 = vrot.lane.b32.xlu0 %v2121_v48, %s1955_s23 }
 0x329   : > { %1065 = vrot.lane.b32.xlu0 %v2116_v40, %s1956_s24 }
 0x32d   : > { %1063 = vrot.lane.b32.xlu0 %v2121_v48, %s1956_s24 }
 0x398   : > { %v797_v61 = vpop.xlane.xlu0 %796 }
 0x399   : > { %v798_v62 = vsub.f32 %v790_v56, %v797_v61  ;;  %v572_v61 = vld [vmem:[%s2308_s8 + $0x4] sm:$0xf] }
 0x39b   : > { %v799_v63 = vmul.f32 1.442695, %v798_v62  ;;  %v1020_v62 = vsel %vm810_vm3, %v572_v61, 0 }
 0x39c   : > { %v907_v4 = vpop.permute.xlu0 %906 }
 0x39d   : > { %1926 = vpow2.f32 %v799_v63  ;;  %v912_v10 = vsel %vm748_vm2, %v907_v4, 0 }
 0x3a0   : > { %v904_v8 = vpop.permute.xlu0 %903 }
 0x3a4   : > { %v1066_v11 = vpop.permute.xlu0 %1065 }
 0x3a5   : > { %v1071_v12 = vsel %vm748_vm2, %v1066_v11, 0  ;;  %v573_v11 = vld [vmem:[%s2308_s8 + $0x8] sm:$0xf] }
 0x3a6   : > { %v1178_v15 = vsel %vm810_vm3, %v573_v11, 0 }
 0x3a7   : > { %v1927_v0 = vpop.eup %1926 }
 0x3a8   : > { %v801_v2 = vsel %vm748_vm2, %v1927_v0, 0.0  ;;  %v1064_v13 = vpop.permute.xlu0 %1063 }
 0x3a9   : > { %802 = vadd.xlane.f32.xlu1 %v801_v2 }
 0x436   : > { %v803_v3 = vpop.xlane.xlu1 %802 }
 0x437   : > { %1928 = vrcp.f32 %v803_v3 }
 0x441   : > { %v1929_v5 = vpop.eup %1928 }
 0x442   : > { %v805_v6 = vmul.f32 %v1929_v5, %v1927_v0 }
 0x444   : > { %v806_v7 = vpack.c.bf16 %v805_v6, %v805_v6 }
 0x446   : > { %1788 = vmatmul.mubr.msk.bf16.vlgmr.msra.gmra.mrb[0].mxu0 %vm748_vm2, %v806_v7 }
 0x447   : > { %1798 = vmatpush3.bf16.xpose.msra.mxu0 %v912_v10  ;;  %1799 = vmatprep.mubr.msk.bf16.mxu0 %vm1953_vm1, %v1952_v9 }
 0x448   : > { %1815 = vmatprep.subr.bf16.mxu0 %v1952_v9 }
 0x44e   : > { %1800 = vmatmul.mubr.msk.bf16.vlgmr.msra.gmra.mrb[4].mxu0 %vm748_vm2, %v904_v8 }
 0x44f   : > { %1816 = vmatpush3.bf16.xpose.msra.mxu0 %v1071_v12  ;;  %1817 = vmatprep.mubr.msk.bf16.mxu0 %vm1953_vm1, %v1952_v9 }
 0x450   : > { %1821 = vmatprep.subr.bf16.mxu0 %v1952_v9 }
 0x456   : > { %1818 = vmatmul.mubr.msk.bf16.vlgmr.msra.gmra.mrb[8].mxu0 %vm748_vm2, %v1064_v13 }
 0x457   : > { %1823 = vmatprep.mubr.msk.bf16.mxu0 %vm1953_vm1, %v1952_v9 }
 0x519   : > { %v848_v16 = vpop.f32.mrb[0].mxu0 }
 0x51a   : > { %v854_v17 = vpack.c.bf16 %v848_v16, %v848_v16  ;;  %v1789_v18 = vpop.f32.mrb[1].mxu0 }
 0x51b   : > { %v851_v19 = vpop.f32.mrb[2].mxu0 }
 0x51c   : > { %v1790_v20 = vpop.f32.mrb[3].mxu0  ;;  %1794 = vmatmul.mubr.msk.bf16.vlgmr.msra.gmra.mrb[16].mxu1 %vm748_vm2, %v854_v17 }
 0x51d   : > { %1805 = vmatprep.mubr.msk.bf16.mxu1 %vm1953_vm1, %v1952_v9 }
 0x521   : > { %v948_v21 = vpop.f32.mrb[4].mxu0 }
 0x522   : > { %v1801_v23 = vpop.f32.mrb[5].mxu0  ;;  %v949_v32 = vadd.f32 %v948_v21, %v2132_v54 }
 0x523   : > { %v951_v24 = vpop.f32.mrb[6].mxu0 }
 0x524   : > { %v1802_v25 = vpop.f32.mrb[7].mxu0  ;;  %v954_v33 = vsel %vm748_vm2, %v949_v32, -inf }
 0x529   : > { %v1107_v26 = vpop.f32.mrb[8].mxu0 }
 0x52a   : > { %v1108_v27 = vadd.f32 %v1107_v26, %v2132_v54  ;;  %v1819_v28 = vpop.f32.mrb[9].mxu0 }
 0x52b   : > { %v1110_v29 = vpop.f32.mrb[10].mxu0  ;;  %v574_v28 = vld [vmem:[%s2308_s8 + $0xc] sm:$0xf] }
 0x52c   : > { %v1820_v30 = vpop.f32.mrb[11].mxu0  ;;  %v1113_v31 = vsel %vm748_vm2, %v1108_v27, -inf }
 0x52d   : > { %1114 = vmax.xlane.f32.xlu1 %v1113_v31  ;;  %v1336_v31 = vsel %vm810_vm3, %v574_v28, 0 }
 0x53e   : > { %1125 = vrot.lane.b32.xlu1 %v2123_v49, %s1956_s24 }
 0x542   : > { %1223 = vrot.lane.b32.xlu1 %v2116_v40, %s1957_s27 }
 0x546   : > { %1221 = vrot.lane.b32.xlu1 %v2121_v48, %s1957_s27 }
 0x56a   : > { %955 = vmax.xlane.f32.xlu1 %v954_v33 }
 0x5ba   : > { %v1115_v34 = vpop.xlane.xlu1 %1114 }
 0x5bb   : > { %v1116_v35 = vsub.f32 %v1108_v27, %v1115_v34 }
 0x5bd   : > { %v1117_v36 = vmul.f32 1.442695, %v1116_v35 }
 0x5be   : > { %v1126_v37 = vpop.permute.xlu1 %1125 }
 0x5bf   : > { %1930 = vpow2.f32 %v1117_v36  ;;  %v1131_v38 = vsel %vm810_vm3, %v1126_v37, 0 }
 0x5c0   : > { %1822 = vmatpush3.bf16.msra.mxu0 %v1131_v38 }
 0x5c1   : > { %1833 = vmatprep.subr.bf16.mxu0 %v1952_v9 }
 0x5c2   : > { %v1224_v41 = vpop.permute.xlu1 %1223 }
 0x5c3   : > { %v1229_v53 = vsel %vm748_vm2, %v1224_v41, 0 }
 0x5c6   : > { %v1222_v42 = vpop.permute.xlu1 %1221 }
 0x5c9   : > { %v1931_v39 = vpop.eup %1930 }
 0x5ca   : > { %v1119_v40 = vsel %vm748_vm2, %v1931_v39, 0.0 }
 0x5cb   : > { %1120 = vadd.xlane.f32.xlu0 %v1119_v40 }
 0x5f7   : > { %v956_v43 = vpop.xlane.xlu1 %955 }
 0x5f8   : > { %v957_v44 = vsub.f32 %v949_v32, %v956_v43 }
 0x5fa   : > { %v958_v45 = vmul.f32 1.442695, %v957_v44 }
 0x5fc   : > { %1932 = vpow2.f32 %v958_v45 }
 0x606   : > { %v1933_v46 = vpop.eup %1932 }
 0x607   : > { %v960_v47 = vsel %vm748_vm2, %v1933_v46, 0.0 }
 0x608   : > { %961 = vadd.xlane.f32.xlu0 %v960_v47  ;;  %v1915_v47 = vld [vmem:[%s2311_s11 + $0x8] sm:$0xff]  }
 0x61e   : > { %967 = vrot.lane.b32.xlu0 %v2123_v49, %s1955_s23 }
 0x658   : > { %v1121_v48 = vpop.xlane.xlu0 %1120 }
 0x659   : > { %1934 = vrcp.f32 %v1121_v48 }
 0x663   : > { %v1935_v50 = vpop.eup %1934 }
 0x664   : > { %v1123_v51 = vmul.f32 %v1935_v50, %v1931_v39 }
 0x666   : > { %v1124_v52 = vpack.c.bf16 %v1123_v51, %v1123_v51 }
 0x668   : > { %1824 = vmatmul.mubr.msk.bf16.vlgmr.msra.gmra.mrb[12].mxu0 %vm748_vm2, %v1124_v52  ;;  %v1392_v52 = vld [vmem:[%s2309_s9] sm:$0x1] }
 0x669   : > { %1834 = vmatpush3.bf16.xpose.msra.mxu0 %v1229_v53  ;;  %1835 = vmatprep.mubr.msk.bf16.mxu0 %vm1953_vm1, %v1952_v9  ;;  %v1399_v53 = vld [vmem:[%s2310_s10] sm:$0x1] }
 0x66a   : > { %1851 = vmatprep.subr.bf16.mxu0 %v1952_v9 }
 0x670   : > { %1836 = vmatmul.mubr.msk.bf16.vlgmr.msra.gmra.mrb[16].mxu0 %vm748_vm2, %v1222_v42 }
 0x671   : > { %1855 = vmatprep.mubr.msk.bf16.mxu0 %vm1953_vm1, %v1952_v9 }
 0x695   : > { %v962_v55 = vpop.xlane.xlu0 %961 }
 0x696   : > { %1936 = vrcp.f32 %v962_v55  ;;  %v1393_v55 = vunpack.c.l.bf16 %v1392_v52 }
 0x699   : > { %v968_v56 = vpop.permute.xlu0 %967 }
 0x69a   : > { %v973_v57 = vsel %vm810_vm3, %v968_v56, 0  ;;  %v1400_v56 = vunpack.c.l.bf16 %v1399_v53 }
 0x69b   : > { %1804 = vmatpush3.bf16.msra.mxu1 %v973_v57  ;;  %v1397_v57 = vrot.slane %v1393_v55, %v2087_v22 }
 0x69c   : > { %1809 = vmatprep.subr.bf16.mxu1 %v1952_v9 }
 0x6a0   : > { %v1937_v58 = vpop.eup %1936 }
 0x6a1   : > { %v964_v59 = vmul.f32 %v1937_v58, %v1933_v46 }
 0x6a3   : > { %v965_v60 = vpack.c.bf16 %v964_v59, %v964_v59 }
 0x6a5   : > { %1806 = vmatmul.mubr.msk.bf16.vlgmr.msra.gmra.mrb[20].mxu1 %vm748_vm2, %v965_v60  ;;  %v1404_v60 = vrot.slane %v1400_v56, %v2087_v22 }
 0x6a6   : > { %1811 = vmatprep.mubr.msk.bf16.mxu1 %vm1953_vm1, %v1952_v9  ;;  %1810 = vmatpush3.bf16.msra.mxu1 %v1020_v62 }
 0x6a7   : > { %1827 = vmatprep.subr.bf16.mxu1 %v1952_v9 }
 0x73b   : > { %v1167_v63 = vpop.f32.mrb[12].mxu0 }
 0x73c   : > { %v1825_v0 = vpop.f32.mrb[13].mxu0 }
 0x73d   : > { %v1170_v2 = vpop.f32.mrb[14].mxu0 }
 0x73e   : > { %v1826_v3 = vpop.f32.mrb[15].mxu0  ;;  %v1917_v2 = vld [vmem:[%s2313_s13 + $0x8] sm:$0xff]  }
 0x73f   : > { %v1918_v3 = vld [vmem:[%s2313_s13 + $0x10] sm:$0xff]  }
 0x743   : > { %v1265_v4 = vpop.f32.mrb[16].mxu0 }
 0x744   : > { %v1266_v5 = vadd.f32 %v1265_v4, %v2132_v54  ;;  %v1837_v6 = vpop.f32.mrb[17].mxu0  ;;  %v1173_v54 = vpack.c.bf16 %v1167_v63, %v1167_v63  ;;  %v1916_v63 = vld [vmem:[%s2313_s13] sm:$0xff]   ;;  %v1919_v4 = vld [vmem:[%s2313_s13 + $0x18] sm:$0xff]  }
 0x745   : > { %v1268_v7 = vpop.f32.mrb[18].mxu0  ;;  %v1921_v6 = vld [vmem:[%s2313_s13 + $0x28] sm:$0xff]  }
 0x746   : > { %v1838_v8 = vpop.f32.mrb[19].mxu0  ;;  %v1271_v10 = vsel %vm748_vm2, %v1266_v5, -inf  ;;  %v1922_v7 = vld [vmem:[%s2313_s13 + $0x30] sm:$0xff]  }
 0x747   : > { %1272 = vmax.xlane.f32.xlu0 %v1271_v10  ;;  %v1923_v8 = vld [vmem:[%s2313_s13 + $0x38] sm:$0xff]   ;;  %v1411_v10 = vld [vmem:[%s2312_s12] sm:$0x1] }
 0x748   : > { %v1412_v11 = vunpack.c.l.bf16 %v1411_v10 }
 0x778   : > { %v1009_v12 = vpop.f32.mrb[20].mxu1 }
 0x779   : > { %v1015_v13 = vpack.c.bf16 %v1009_v12, %v1009_v12  ;;  %v1807_v14 = vpop.f32.mrb[21].mxu1  ;;  %v1416_v12 = vrot.slane %v1412_v11, %v2087_v22 }
 0x77a   : > { %v1012_v16 = vpop.f32.mrb[22].mxu1 }
 0x77b   : > { %v1808_v17 = vpop.f32.mrb[23].mxu1  ;;  %1812 = vmatmul.mubr.msk.bf16.vlgmr.msra.gmra.mrb[16].mxu1 %vm748_vm2, %v1015_v13 }
 0x77c   : > { %1828 = vmatpush3.bf16.msra.mxu1 %v1178_v15  ;;  %1829 = vmatprep.mubr.msk.bf16.mxu1 %vm1953_vm1, %v1952_v9 }
 0x77d   : > { %1839 = vmatprep.subr.bf16.mxu1 %v1952_v9 }
 0x787   : > { %1830 = vmatmul.mubr.msk.bf16.vlgmr.msra.gmra.mrb[16].mxu1 %vm748_vm2, %v1173_v54 }
 0x788   : > { %1841 = vmatprep.mubr.msk.bf16.mxu1 %vm1953_vm1, %v1952_v9 }
 0x7d4   : > { %v1273_v18 = vpop.xlane.xlu0 %1272 }
 0x7d5   : > { %v1274_v19 = vsub.f32 %v1266_v5, %v1273_v18  ;;  %v1920_v5 = vld [vmem:[%s2313_s13 + $0x20] sm:$0xff]  }
 0x7d7   : > { %v1275_v20 = vmul.f32 1.442695, %v1274_v19  ;;  %v1492_v19 = vld [vmem:[%s2314_s14] sm:$0x1] }
 0x7d9   : > { %1938 = vpow2.f32 %v1275_v20  ;;  %v1493_v20 = vunpack.c.l.bf16 %v1492_v19 }
 0x7e3   : > { %v1939_v21 = vpop.eup %1938 }
 0x7e4   : > { %v1277_v23 = vsel %vm748_vm2, %v1939_v21, 0.0 }
 0x7e5   : > { %1278 = vadd.xlane.f32.xlu1 %v1277_v23 }
 0x7f6   : > { %1283 = vrot.lane.b32.xlu1 %v2123_v49, %s1957_s27 }
 0x872   : > { %v1279_v24 = vpop.xlane.xlu1 %1278 }
 0x873   : > { %1940 = vrcp.f32 %v1279_v24 }
 0x876   : > { %v1284_v25 = vpop.permute.xlu1 %1283 }
 0x877   : > { %v1289_v26 = vsel %vm810_vm3, %v1284_v25, 0 }
 0x878   : > { %1840 = vmatpush3.bf16.msra.mxu1 %v1289_v26 }
 0x879   : > { %1845 = vmatprep.subr.bf16.mxu1 %v1952_v9 }
 0x87d   : > { %v1941_v27 = vpop.eup %1940 }
 0x87e   : > { %v1281_v29 = vmul.f32 %v1941_v27, %v1939_v21  ;;  %v1497_v21 = vrot.slane %v1493_v20, %v2087_v22 }
 0x880   : > { %v1282_v30 = vpack.c.bf16 %v1281_v29, %v1281_v29 }
 0x882   : > { %1842 = vmatmul.mubr.msk.bf16.vlgmr.msra.gmra.mrb[24].mxu1 %vm748_vm2, %v1282_v30 }
 0x883   : > { %1846 = vmatpush3.bf16.msra.mxu1 %v1336_v31  ;;  %1847 = vmatprep.mubr.msk.bf16.mxu1 %vm1953_vm1, %v1952_v9 }
 0x955   : > { %v1325_v49 = vpop.f32.mrb[24].mxu1 }
 0x956   : > { %v1331_v32 = vpack.c.bf16 %v1325_v49, %v1325_v49  ;;  %v1843_v33 = vpop.f32.mrb[25].mxu1 }
 0x957   : > { %v1328_v34 = vpop.f32.mrb[26].mxu1 }
 0x958   : > { %v1844_v35 = vpop.f32.mrb[27].mxu1  ;;  %1848 = vmatmul.mubr.msk.bf16.vlgmr.msra.gmra.mrb[16].mxu1 %vm748_vm2, %v1331_v32 }
 0xa2b   : > { %v1372_v36 = vpop.f32.mrb[16].mxu1 }
 0xa2c   : > { %v2227_v37 = vadd.f32 %v1372_v36, %v2054_v1  ;;  %v1849_v38 = vpop.f32.mrb[17].mxu1  ;;  %v1914_v1 = vld [vmem:[%s2311_s11] sm:$0xff]  }
 0xa2d   : > { %v1375_v39 = vpop.f32.mrb[18].mxu1  ;;  %1852 = vmatpush3.bf16.msra.mxu0 %v1914_v1 }
 0xa2e   : > { %v1850_v40 = vpop.f32.mrb[19].mxu1  ;;  %v1379_v41 = vsel %vm529_vm0, %v2227_v37, 0.0  ;;  %1853 = vmatprep.subr.bf16.mxu0 %v1952_v9 }
 0xa2f   : > { %1380 = vadd.xlane.f32.xlu1 %v1379_v41 }
 0xa31   : > { %1854 = vmatpush3.bf16.msra.mxu0 %v1915_v47 }
 0xa32   : > { %1859 = vmatprep.subr.bf16.mxu0 %v1952_v9 }
 0xabc   : > { %v1381_v42 = vpop.xlane.xlu1 %1380 }
 0xabd   : > { %v1382_v43 = vmul.f32 0.03125, %v1381_v42 }
 0xabf   : > { %v1383_v44 = vsub.f32 %v2227_v37, %v1382_v43 }
 0xac1   : > { %v1384_v45 = vmul.f32 %v1383_v44, %v1383_v44 }
 0xac3   : > { %v1385_v46 = vsel %vm529_vm0, %v1384_v45, 0.0 }
 0xac4   : > { %1386 = vadd.xlane.f32.xlu0 %v1385_v46 }
 0xb51   : > { %v1387_v48 = vpop.xlane.xlu0 %1386 }
 0xb52   : > { %v1388_v50 = vmul.f32 0.03125, %v1387_v48 }
 0xb54   : > { %v1389_v51 = vadd.f32 1e-05, %v1388_v50 }
 0xb56   : > { %1942 = vrsqrt.f32 %v1389_v51 }
 0xb60   : > { %v1943_v58 = vpop.eup %1942 }
 0xb61   : > { %v1391_v59 = vmul.f32 %v1943_v58, %v1383_v44 }
 0xb63   : > { %v1398_v61 = vmul.f32 %v1397_v57, %v1391_v59 }
 0xb65   : > { %v1405_v62 = vadd.f32 %v1404_v60, %v1398_v61 }
 0xb67   : > { %v1406_v0 = vpack.c.bf16 %v1405_v62, %v1405_v62 }
 0xb69   : > { %1856 = vmatmul.mubr.msk.bf16.vlgmr.msra.gmra.mrb[20].mxu0 %vm529_vm0, %v1406_v0 }
 0xb6a   : > { %1860 = vmatpush3.bf16.msra.mxu0 %v1916_v63  ;;  %1875 = vmatprep.mubr.msk.bf16.mxu0 %vm1953_vm1, %v1952_v9 }
 0xb6b   : > { %1861 = vmatprep.subr.bf16.mxu0 %v1952_v9 }
 0xb6e   : > { %1862 = vmatpush3.bf16.msra.mxu0 %v1917_v2 }
 0xb6f   : > { %1863 = vmatprep.subr.bf16.mxu0 %v1952_v9 }
 0xb72   : > { %1864 = vmatpush3.bf16.msra.mxu0 %v1918_v3 }
 0xb73   : > { %1865 = vmatprep.subr.bf16.mxu0 %v1952_v9 }
 0xb76   : > { %1866 = vmatpush3.bf16.msra.mxu0 %v1919_v4 }
 0xb77   : > { %1867 = vmatprep.subr.bf16.mxu0 %v1952_v9 }
 0xb7a   : > { %1868 = vmatpush3.bf16.msra.mxu0 %v1920_v5 }
 0xb7b   : > { %1869 = vmatprep.subr.bf16.mxu0 %v1952_v9 }
 0xb7e   : > { %1870 = vmatpush3.bf16.msra.mxu0 %v1921_v6 }
 0xb7f   : > { %1871 = vmatprep.subr.bf16.mxu0 %v1952_v9 }
 0xb82   : > { %1872 = vmatpush3.bf16.msra.mxu0 %v1922_v7 }
 0xb83   : > { %1873 = vmatprep.subr.bf16.mxu0 %v1952_v9 }
 0xb86   : > { %1874 = vmatpush3.bf16.msra.mxu0 %v1923_v8 }
 0xc3c   : > { %v1466_v13 = vpop.f32.mrb[20].mxu0 }
 0xc3d   : > { %v1467_v14 = vadd.f32 %v1466_v13, %v1416_v12  ;;  %v1857_v15 = vpop.f32.mrb[21].mxu0 }
 0xc3e   : > { %v1469_v16 = vpop.f32.mrb[22].mxu0 }
 0xc3f   : > { %vm1472_vm4 = vcmp.ge.f32.partialorder %v1467_v14, 0.0  ;;  %v1473_v17 = vmul.f32 0.01, %v1467_v14  ;;  %v1858_v9 = vpop.f32.mrb[23].mxu0 }
 0xc41   : > { %v1474_v54 = vsel %vm1472_vm4, %v1467_v14, %v1473_v17 }
 0xc42   : > { %v1475_v18 = vpack.c.bf16 %v1474_v54, %v1474_v54 }
 0xc44   : > { %1876 = vmatmul.mubr.bf16.vlgmr.msra.gmra.mrb[24].mxu0 %v1475_v18 }
 0xd17   : > { %v1580_v23 = vpop.f32.mrb[24].mxu0 }
 0xd18   : > { %v1581_v24 = vadd.f32 %v1580_v23, %v1497_v21  ;;  %v1877_v25 = vpop.f32.mrb[25].mxu0 }
 0xd19   : > { %v1583_v26 = vpop.f32.mrb[26].mxu0 }
 0xd1a   : > { %v1586_v27 = vadd.f32 %v2227_v37, %v1581_v24  ;;  %v1878_v28 = vpop.f32.mrb[27].mxu0 }
 0xd1c   : > { %v1587_v29 = vpack.c.bf16 %v1586_v27, %v1586_v27 }
 0xd1e   : > { %1589 = vst.msk [vmem:[%s523_s28] sm:$0xf] %vm1588_vm5, %v1587_v29 }
 0xd1f PF: > { %s25_s18 = sadd.s32 1, %s1950_s18  }
 0xd20   : > { %p22_p4 = scmp.ge.s32.totalorder %s25_s18, 6  }
 0xd22   :  { %24 = sbr.rel (!%p22_p4) target bundleno = 1 (0x1), region = 116 }

// kernel: model_forward.6
= control target key start
LH: loop header
LB: loop body
LE: loop exit
PB: predicated region body
PF: predicated region fallthrough
CT: control target
= control target key end

     0   :  { %s3041_s21 = smov 0   ;;  %s3476_s0 = inlined_call_operand.vmem [shape: bf16[2,8,32], index: 0, kind: input, shape index: {}]   ;;  %s3477_s1 = inlined_call_operand.vmem [shape: bf16[2,8,32], index: 1, kind: input, shape index: {}]   ;;  %s3478_s2 = inlined_call_operand.vmem [shape: f32[2,8,1], index: 2, kind: input, shape index: {}]   ;;  %s3479_s3 = inlined_call_operand.vmem [shape: f32[2,8,1], index: 3, kind: input, shape index: {}]   ;;  %s3480_s4 = inlined_call_operand.vmem [shape: bf16[1,32], index: 4, kind: input, shape index: {}]   ;;  %s3481_s5 = inlined_call_operand.vmem [shape: bf16[1,32], index: 5, kind: input, shape index: {}]   ;;  %s3482_s6 = inlined_call_operand.vmem [shape: bf16[32,32], index: 6, kind: input, shape index: {}]   ;;  %s3483_s7 = inlined_call_operand.vmem [shape: bf16[32,32], index: 7, kind: input, shape index: {}]   ;;  %s3484_s8 = inlined_call_operand.vmem [shape: bf16[32,32], index: 8, kind: input, shape index: {}]   ;;  %s3485_s9 = inlined_call_operand.vmem [shape: bf16[32,32], index: 9, kind: input, shape index: {}]   ;;  %s3486_s10 = inlined_call_operand.vmem [shape: bf16[1,32], index: 10, kind: input, shape index: {}]   ;;  %s3487_s11 = inlined_call_operand.vmem [shape: bf16[1,32], index: 11, kind: input, shape index: {}]   ;;  %s3488_s12 = inlined_call_operand.vmem [shape: bf16[32,128], index: 12, kind: input, shape index: {}]   ;;  %s3489_s13 = inlined_call_operand.vmem [shape: bf16[1,128], index: 13, kind: input, shape index: {}]   ;;  %s3490_s14 = inlined_call_operand.vmem [shape: bf16[128,32], index: 14, kind: input, shape index: {}]   ;;  %s3491_s15 = inlined_call_operand.vmem [shape: bf16[1,32], index: 15, kind: input, shape index: {}]   ;;  %s3492_s16 = inlined_call_operand.vmem [shape: bf16[2,8,32], index: 16, kind: output, shape index: {}]  }
   0x1   :  { %3493 = sst [smem:[#allocation2_spill]] %s3476_s0 }
   0x2 LB: > { %s2489_s22 = sadd.s32 4294967295, %s2948_s21   ;;  %p2493_p0 = scmp.ge.s32.totalorder %s2948_s21, 1  ;;  %s2948_s21 = sphi %s3041_s21, %s26_s21  }
   0x3   : > { %p488_p1 = scmp.lt.s32.totalorder %s2948_s21, 3 }
   0x5   : > { %p489_p2 = pnand %p2493_p0, %p488_p1 }
   0x6   : > { %p548_p3 = scmp.lt.s32.totalorder (!%p489_p2), %s2489_s22, 1  ;;  %vm591_vm0 = vcmask (!%p489_p2), 261120   ;;  %v3067_v8 = vld [vmem:[%s3482_s6] sm:$0xff] (!%p489_p2)   ;;  %v2950_v9 = vmov (!%p489_p2), 0.0   ;;  %vm2951_vm1 = vmmov (!%p489_p2), 0   ;;  %v3076_v10 = vld [vmem:[%s3482_s6 + $0x8] sm:$0xff] (!%p489_p2)   ;;  %v608_v16 = vlaneseq (!%p489_p2) }
   0x7   : > { %492 = sbr.rel (%p489_p2) target bundleno = 5097 (0x13e9), region = 84  ;;  %2626 = vmatprep.subr.bf16.mxu0 (!%p489_p2), %v2950_v9  ;;  %2630 = vmatprep.mubr.msk.bf16.mxu0 (!%p489_p2), %vm2951_vm1, %v2950_v9  ;;  %v2952_v11 = vmov (!%p489_p2), 0   ;;  %v606_v19 = vld [vmem:[%s3480_s4] sm:$0x1] (!%p489_p2)  ;;  %v3117_v32 = vld [vmem:[%s3483_s7 + $0x8] sm:$0xff] (!%p489_p2)   ;;  %vm810_vm2 = vcmask (!%p489_p2), 64512  }
   0x8   : > { %2627 = vmatpush3.bf16.msra.mxu0 (!%p489_p2), %v3067_v8  ;;  %2650 = vmatprep.subr.bf16.mxu1 (!%p489_p2), %v2950_v9  ;;  %v609_v18 = vshrl.u32 (!%p489_p2), %v608_v16, 7  ;;  %v613_v20 = vld [vmem:[%s3481_s5] sm:$0x1] (!%p489_p2)  ;;  %v607_v21 = vunpack.c.l.bf16 (!%p489_p2), %v606_v19  ;;  %v3134_v34 = vld [vmem:[%s3484_s8 + $0x8] sm:$0xff] (!%p489_p2)   ;;  %vm872_vm3 = vcmask (!%p489_p2), 1043456   ;;  %s2955_s28 = smov (!%p489_p2), 104  }
   0x9   : > { %2628 = vmatprep.subr.bf16.mxu0 (!%p489_p2), %v2950_v9  ;;  %2652 = vmatprep.mubr.msk.bf16.mxu1 (!%p489_p2), %vm2951_vm1, %v2950_v9  ;;  %v614_v23 = vunpack.c.l.bf16 (!%p489_p2), %v613_v20  ;;  %v3110_v30 = vld [vmem:[%s3483_s7] sm:$0xff] (!%p489_p2)   ;;  %vm2398_vm5 = vcmask (!%p489_p2), 257024  }
   0xa   : > { %2886 = vset.pattern.permute.xlu1 (!%p489_p2), %v2952_v11  ;;  %2887 = vset.pattern.permute.xlu0 (!%p489_p2), %v2952_v11  ;;  %v3097_v22 = vsub.s32 (!%p489_p2), 0, %v609_v18  ;;  %v3126_v33 = vld [vmem:[%s3484_s8] sm:$0xff] (!%p489_p2)  }
   0xb   : > { %v587_v16 = vld [vmem:[%s3485_s9] sm:$0xf] (!%p489_p2) }
   0xc   : > { %2629 = vmatpush3.bf16.msra.mxu0 (!%p489_p2), %v3076_v10  ;;  %v3100_v24 = vrot.slane (!%p489_p2), %v607_v21, %v3097_v22  ;;  %v3103_v27 = vrot.slane (!%p489_p2), %v614_v23, %v3097_v22 }
   0xd   : > { %2634 = vmatprep.subr.bf16.mxu0 (!%p489_p2), %v2950_v9 }
   0xe   : > { %s3496_s22 = smov (!%p548_p3, %s2489_s22), 1 }
   0xf   : > { %s3052_s23 = sshll.u32 %s3496_s22, 2  ;;  %s2496_s0 = sshll.u32 %s3496_s22, 3 }
  0x10   : > { %s555_s26 = scalar_lea.vmem %s3477_s1, %s3052_s23  ;;  %s559_s19 = scalar_lea.vmem %s3478_s2, %s2496_s0 }
  0x11   : > { %v570_v0 = vld [vmem:[%s555_s26] sm:$0xf]  ;;  %s563_s25 = scalar_lea.vmem %s3479_s3, %s2496_s0  ;;  %s2954_s22 = smov 112  }
  0x12   : > { %v3058_v1 = vunpack.c.l.bf16 %v570_v0  ;;  %v573_v12 = vld [vmem:[%s559_s19] sm:$0xff]  ;;  %s3494_s0 = sld [smem:[#allocation2_spill]]  ;;  %s567_s30 = scalar_lea.vmem %s3492_s16, %s3052_s23 }
  0x13   : > { %694 = vperm.xlu1 %2886, %v573_v12   ;;  %v574_v13 = vld [vmem:[%s563_s25] sm:$0xff]  ;;  %s2953_s25 = smov 120  }
  0x14   : > { %v592_v2 = vsel %vm591_vm0, %v3058_v1, 0.0 }
  0x15   : > { %593 = vadd.xlane.f32.xlu0 %v592_v2 }
  0x17   : > { %807 = vperm.xlu1 %2886, %v574_v13  }
  0x18   : > { %s551_s17 = scalar_lea.vmem %s3494_s0, %s3052_s23 }
  0x92   : > { %v3146_v42 = vpop.permute.xlu1 %694 }
  0x96   : > { %v3163_v54 = vpop.permute.xlu1 %807 }
  0xa2   : > { %v594_v3 = vpop.xlane.xlu0 %593 }
  0xa3   : > { %v596_v4 = vmul.f32 0.03125, %v594_v3 }
  0xa5   : > { %v597_v5 = vsub.f32 %v3058_v1, %v596_v4 }
  0xa7   : > { %v598_v6 = vmul.f32 %v597_v5, %v597_v5 }
  0xa9   : > { %v599_v7 = vsel %vm591_vm0, %v598_v6, 0.0 }
  0xaa   : > { %600 = vadd.xlane.f32.xlu0 %v599_v7 }
 0x137   : > { %v601_v14 = vpop.xlane.xlu0 %600 }
 0x138   : > { %v602_v15 = vmul.f32 0.03125, %v601_v14 }
 0x13a   : > { %v603_v17 = vadd.f32 1e-05, %v602_v15 }
 0x13c   : > { %2904 = vrsqrt.f32 %v603_v17  ;;  %v3193_v17 = vsel %vm872_vm3, %v587_v16, 0 }
 0x146   : > { %v2905_v25 = vpop.eup %2904 }
 0x147   : > { %v605_v26 = vmul.f32 %v2905_v25, %v597_v5 }
 0x149   : > { %v612_v28 = vmul.f32 %v3100_v24, %v605_v26 }
 0x14b   : > { %v619_v29 = vadd.f32 %v3103_v27, %v612_v28 }
 0x14d   : > { %v620_v31 = vpack.c.bf16 %v619_v29, %v619_v29 }
 0x14f   : > { %2631 = vmatmul.mubr.msk.bf16.vlgmr.msra.gmra.mrb[0].mxu0 %vm591_vm0, %v620_v31 }
 0x150   : > { %2635 = vmatpush3.bf16.msra.mxu0 %v3110_v30  ;;  %2638 = vmatprep.mubr.msk.bf16.mxu0 %vm2951_vm1, %v2950_v9 }
 0x151   : > { %2636 = vmatprep.subr.bf16.mxu0 %v2950_v9 }
 0x154   : > { %2637 = vmatpush3.bf16.msra.mxu0 %v3117_v32 }
 0x155   : > { %2642 = vmatprep.subr.bf16.mxu0 %v2950_v9 }
 0x157   : > { %2639 = vmatmul.mubr.msk.bf16.vlgmr.msra.gmra.mrb[4].mxu0 %vm591_vm0, %v620_v31 }
 0x158   : > { %2643 = vmatpush3.bf16.msra.mxu0 %v3126_v33  ;;  %2646 = vmatprep.mubr.msk.bf16.mxu0 %vm2951_vm1, %v2950_v9 }
 0x159   : > { %2644 = vmatprep.subr.bf16.mxu0 %v2950_v9 }
 0x15c   : > { %2645 = vmatpush3.bf16.msra.mxu0 %v3134_v34 }
 0x15d   : > { %2656 = vmatprep.subr.bf16.mxu0 %v2950_v9 }
 0x15f   : > { %2647 = vmatmul.mubr.msk.bf16.vlgmr.msra.gmra.mrb[8].mxu0 %vm591_vm0, %v620_v31 }
 0x160   : > { %2658 = vmatprep.mubr.msk.bf16.mxu0 %vm2951_vm1, %v2950_v9 }
 0x222   : > { %v686_v35 = vpop.f32.mrb[0].mxu0 }
 0x223   : > { %v2632_v36 = vpop.f32.mrb[1].mxu0  ;;  %v697_v46 = vmul.f32 %v3146_v42, %v686_v35 }
 0x224   : > { %v689_v37 = vpop.f32.mrb[2].mxu0 }
 0x225   : > { %v2633_v38 = vpop.f32.mrb[3].mxu0  ;;  %v3152_v48 = vpack.c.bf16 %v697_v46, %v697_v46 }
 0x22a   : > { %v745_v39 = vpop.f32.mrb[4].mxu0 }
 0x22b   : > { %v3144_v40 = vpack.c.bf16 %v745_v39, %v745_v39  ;;  %v2640_v41 = vpop.f32.mrb[5].mxu0 }
 0x22c   : > { %v748_v43 = vpop.f32.mrb[6].mxu0  ;;  %v569_v41 = vld [vmem:[%s551_s17] sm:$0xf] }
 0x22d   : > { %v2641_v44 = vpop.f32.mrb[7].mxu0  ;;  %v815_v45 = vsel %vm810_vm2, %v3144_v40, 0 }
 0x22e   : > { %2651 = vmatpush3.bf16.xpose.msra.mxu1 %v815_v45  ;;  %v3213_v44 = vunpack.c.l.bf16 %v569_v41  ;;  %v589_v41 = vld [vmem:[%s3485_s9 + $0x8] sm:$0xf] }
 0x22f   : > { %2662 = vmatprep.subr.bf16.mxu1 %v2950_v9 }
 0x230   : > { %v621_v46 = vsel %vm591_vm0, %v3213_v44, 0.0 }
 0x232   : > { %v798_v47 = vpop.f32.mrb[8].mxu0 }
 0x233   : > { %v3154_v49 = vpack.c.bf16 %v798_v47, %v798_v47  ;;  %v2648_v50 = vpop.f32.mrb[9].mxu0 }
 0x234   : > { %v801_v51 = vpop.f32.mrb[10].mxu0 }
 0x235   : > { %v2649_v52 = vpop.f32.mrb[11].mxu0  ;;  %2653 = vmatmul.mubr.msk.bf16.vlgmr.msra.gmra.mrb[0].mxu1 %vm810_vm2, %v3152_v48  ;;  %v874_v53 = vsel %vm872_vm3, %v3154_v49, 0 }
 0x236   : > { %2657 = vmatpush3.bf16.msra.mxu0 %v874_v53  ;;  %2664 = vmatprep.mubr.msk.bf16.mxu1 %vm2951_vm1, %v2950_v9 }
 0x237   : > { %2668 = vmatprep.subr.bf16.mxu0 %v2950_v9  ;;  %2663 = vmatpush3.bf16.msra.mxu1 %v3193_v17 }
 0x238   : > { %2674 = vmatprep.subr.bf16.mxu1 %v2950_v9 }
 0x308   : > { %v851_v55 = vpop.f32.mrb[0].mxu1 }
 0x309   : > { %v852_v56 = vadd.f32 %v851_v55, %v3163_v54  ;;  %v2654_v57 = vpop.f32.mrb[1].mxu1 }
 0x30a   : > { %v854_v58 = vpop.f32.mrb[2].mxu1 }
 0x30b   : > { %v2655_v59 = vpop.f32.mrb[3].mxu1  ;;  %v857_v60 = vsel %vm810_vm2, %v852_v56, -inf }
 0x30c   : > { %858 = vmax.xlane.f32.xlu0 %v857_v60 }
 0x322   : > { %968 = vrot.lane.b32.xlu0 %v3144_v40, %s2953_s25 }
 0x326   : > { %965 = vrot.lane.b32.xlu0 %v3152_v48, %s2953_s25 }
 0x32a   : > { %1127 = vrot.lane.b32.xlu0 %v3144_v40, %s2954_s22 }
 0x32e   : > { %1125 = vrot.lane.b32.xlu0 %v3152_v48, %s2954_s22 }
 0x399   : > { %v859_v61 = vpop.xlane.xlu0 %858 }
 0x39a   : > { %v860_v62 = vsub.f32 %v852_v56, %v859_v61 }
 0x39c   : > { %v861_v63 = vmul.f32 1.442695, %v860_v62 }
 0x39d   : > { %v969_v4 = vpop.permute.xlu0 %968 }
 0x39e   : > { %2906 = vpow2.f32 %v861_v63  ;;  %v974_v12 = vsel %vm810_vm2, %v969_v4, 0 }
 0x3a1   : > { %v966_v11 = vpop.permute.xlu0 %965 }
 0x3a5   : > { %v1128_v13 = vpop.permute.xlu0 %1127 }
 0x3a6   : > { %v1133_v14 = vsel %vm810_vm2, %v1128_v13, 0 }
 0x3a8   : > { %v2907_v0 = vpop.eup %2906 }
 0x3a9   : > { %v863_v2 = vsel %vm810_vm2, %v2907_v0, 0.0  ;;  %v1126_v15 = vpop.permute.xlu0 %1125 }
 0x3aa   : > { %864 = vadd.xlane.f32.xlu1 %v863_v2 }
 0x437   : > { %v865_v3 = vpop.xlane.xlu1 %864 }
 0x438   : > { %2908 = vrcp.f32 %v865_v3 }
 0x442   : > { %v2909_v5 = vpop.eup %2908 }
 0x443   : > { %v867_v6 = vmul.f32 %v2909_v5, %v2907_v0 }
 0x445   : > { %v868_v7 = vpack.c.bf16 %v867_v6, %v867_v6 }
 0x447   : > { %2659 = vmatmul.mubr.msk.bf16.vlgmr.msra.gmra.mrb[12].mxu0 %vm810_vm2, %v868_v7 }
 0x448   : > { %2669 = vmatpush3.bf16.xpose.msra.mxu0 %v974_v12  ;;  %2670 = vmatprep.mubr.msk.bf16.mxu0 %vm2951_vm1, %v2950_v9 }
 0x449   : > { %2686 = vmatprep.subr.bf16.mxu0 %v2950_v9 }
 0x44f   : > { %2671 = vmatmul.mubr.msk.bf16.vlgmr.msra.gmra.mrb[16].mxu0 %vm810_vm2, %v966_v11 }
 0x450   : > { %2687 = vmatpush3.bf16.xpose.msra.mxu0 %v1133_v14  ;;  %2688 = vmatprep.mubr.msk.bf16.mxu0 %vm2951_vm1, %v2950_v9 }
 0x451   : > { %2692 = vmatprep.subr.bf16.mxu0 %v2950_v9 }
 0x457   : > { %2689 = vmatmul.mubr.msk.bf16.vlgmr.msra.gmra.mrb[20].mxu0 %vm810_vm2, %v1126_v15 }
 0x458   : > { %2694 = vmatprep.mubr.msk.bf16.mxu0 %vm2951_vm1, %v2950_v9 }
 0x51a   : > { %v910_v18 = vpop.f32.mrb[12].mxu0 }
 0x51b   : > { %v916_v19 = vpack.c.bf16 %v910_v18, %v910_v18  ;;  %v2660_v20 = vpop.f32.mrb[13].mxu0 }
 0x51c   : > { %v913_v21 = vpop.f32.mrb[14].mxu0 }
 0x51d   : > { %v2661_v23 = vpop.f32.mrb[15].mxu0  ;;  %2665 = vmatmul.mubr.msk.bf16.vlgmr.msra.gmra.mrb[4].mxu1 %vm810_vm2, %v916_v19 }
 0x51e   : > { %2676 = vmatprep.mubr.msk.bf16.mxu1 %vm2951_vm1, %v2950_v9 }
 0x522   : > { %v1010_v25 = vpop.f32.mrb[16].mxu0 }
 0x523   : > { %v2672_v26 = vpop.f32.mrb[17].mxu0  ;;  %v1011_v43 = vadd.f32 %v1010_v25, %v3163_v54 }
 0x524   : > { %v1013_v28 = vpop.f32.mrb[18].mxu0 }
 0x525   : > { %v2673_v29 = vpop.f32.mrb[19].mxu0  ;;  %v1016_v45 = vsel %vm810_vm2, %v1011_v43, -inf }
 0x52a   : > { %v1169_v31 = vpop.f32.mrb[20].mxu0 }
 0x52b   : > { %v1170_v35 = vadd.f32 %v1169_v31, %v3163_v54  ;;  %v2690_v36 = vpop.f32.mrb[21].mxu0 }
 0x52c   : > { %v1172_v37 = vpop.f32.mrb[22].mxu0 }
 0x52d   : > { %v2691_v38 = vpop.f32.mrb[23].mxu0  ;;  %v1175_v39 = vsel %vm810_vm2, %v1170_v35, -inf }
 0x52e   : > { %1176 = vmax.xlane.f32.xlu1 %v1175_v39 }
 0x53f   : > { %1187 = vrot.lane.b32.xlu1 %v3154_v49, %s2954_s22 }
 0x543   : > { %1285 = vrot.lane.b32.xlu1 %v3144_v40, %s2955_s28 }
 0x547   : > { %1283 = vrot.lane.b32.xlu1 %v3152_v48, %s2955_s28 }
 0x56b   : > { %1017 = vmax.xlane.f32.xlu1 %v1016_v45 }
 0x56f   : > { %622 = vadd.xlane.f32.xlu1 %v621_v46 }
 0x5bb   : > { %v1177_v40 = vpop.xlane.xlu1 %1176 }
 0x5bc   : > { %v1178_v47 = vsub.f32 %v1170_v35, %v1177_v40  ;;  %v3269_v40 = vsel %vm872_vm3, %v589_v41, 0 }
 0x5be   : > { %v1179_v50 = vmul.f32 1.442695, %v1178_v47 }
 0x5bf   : > { %v1188_v48 = vpop.permute.xlu1 %1187 }
 0x5c0   : > { %2910 = vpow2.f32 %v1179_v50  ;;  %v1193_v51 = vsel %vm872_vm3, %v1188_v48, 0 }
 0x5c1   : > { %2693 = vmatpush3.bf16.msra.mxu0 %v1193_v51 }
 0x5c2   : > { %2704 = vmatprep.subr.bf16.mxu0 %v2950_v9 }
 0x5c3   : > { %v1286_v55 = vpop.permute.xlu1 %1285 }
 0x5c4   : > { %v1291_v11 = vsel %vm810_vm2, %v1286_v55, 0 }
 0x5c7   : > { %v1284_v56 = vpop.permute.xlu1 %1283 }
 0x5ca   : > { %v2911_v52 = vpop.eup %2910 }
 0x5cb   : > { %v1181_v53 = vsel %vm810_vm2, %v2911_v52, 0.0 }
 0x5cc   : > { %1182 = vadd.xlane.f32.xlu0 %v1181_v53 }
 0x5f8   : > { %v1018_v57 = vpop.xlane.xlu1 %1017 }
 0x5f9   : > { %v1019_v58 = vsub.f32 %v1011_v43, %v1018_v57 }
 0x5fb   : > { %v1020_v59 = vmul.f32 1.442695, %v1019_v58 }
 0x5fc   : > { %v623_v60 = vpop.xlane.xlu1 %622 }
 0x5fd   : > { %2912 = vpow2.f32 %v1020_v59  ;;  %v624_v61 = vmul.f32 0.03125, %v623_v60 }
 0x5ff   : > { %v625_v62 = vsub.f32 %v3213_v44, %v624_v61 }
 0x601   : > { %v626_v63 = vmul.f32 %v625_v62, %v625_v62 }
 0x603   : > { %v627_v0 = vsel %vm591_vm0, %v626_v63, 0.0 }
 0x604   : > { %628 = vadd.xlane.f32.xlu1 %v627_v0 }
 0x607   : > { %v2913_v2 = vpop.eup %2912 }
 0x608   : > { %v1022_v3 = vsel %vm810_vm2, %v2913_v2, 0.0 }
 0x609   : > { %1023 = vadd.xlane.f32.xlu0 %v1022_v3 }
 0x61f   : > { %1029 = vrot.lane.b32.xlu0 %v3154_v49, %s2953_s25 }
 0x659   : > { %v1183_v4 = vpop.xlane.xlu0 %1182 }
 0x65a   : > { %2914 = vrcp.f32 %v1183_v4 }
 0x664   : > { %v2915_v5 = vpop.eup %2914 }
 0x665   : > { %v1185_v6 = vmul.f32 %v2915_v5, %v2911_v52 }
 0x667   : > { %v1186_v7 = vpack.c.bf16 %v1185_v6, %v1185_v6 }
 0x669   : > { %2695 = vmatmul.mubr.msk.bf16.vlgmr.msra.gmra.mrb[24].mxu0 %vm810_vm2, %v1186_v7 }
 0x66a   : > { %2705 = vmatpush3.bf16.xpose.msra.mxu0 %v1291_v11  ;;  %2706 = vmatprep.mubr.msk.bf16.mxu0 %vm2951_vm1, %v2950_v9 }
 0x66b   : > { %2722 = vmatprep.subr.bf16.mxu0 %v2950_v9 }
 0x671   : > { %2707 = vmatmul.mubr.msk.bf16.vlgmr.msra.gmra.mrb[28].mxu0 %vm810_vm2, %v1284_v56 }
 0x672   : > { %2723 = vmatpush3.bf16.msra.mxu0 %v3067_v8  ;;  %2726 = vmatprep.mubr.msk.bf16.mxu0 %vm2951_vm1, %v2950_v9 }
 0x673   : > { %2724 = vmatprep.subr.bf16.mxu0 %v2950_v9 }
 0x676   : > { %2725 = vmatpush3.bf16.msra.mxu0 %v3076_v10 }
 0x677   : > { %2730 = vmatprep.subr.bf16.mxu0 %v2950_v9 }
 0x691   : > { %v629_v12 = vpop.xlane.xlu1 %628 }
 0x692   : > { %v630_v13 = vmul.f32 0.03125, %v629_v12 }
 0x694   : > { %v631_v14 = vadd.f32 1e-05, %v630_v13 }
 0x696   : > { %2916 = vrsqrt.f32 %v631_v14  ;;  %v1024_v15 = vpop.xlane.xlu0 %1023 }
 0x697   : > { %2918 = vrcp.f32 %v1024_v15 }
 0x69a   : > { %v1030_v16 = vpop.permute.xlu0 %1029 }
 0x69b   : > { %v1035_v18 = vsel %vm872_vm3, %v1030_v16, 0 }
 0x69c   : > { %2675 = vmatpush3.bf16.msra.mxu1 %v1035_v18 }
 0x69d   : > { %2680 = vmatprep.subr.bf16.mxu1 %v2950_v9 }
 0x6a0   : > { %v2917_v8 = vpop.eup %2916 }
 0x6a1   : > { %v2919_v19 = vpop.eup %2918  ;;  %v633_v20 = vmul.f32 %v2917_v8, %v625_v62  ;;  %v590_v8 = vld [vmem:[%s3485_s9 + $0xc] sm:$0xf] }
 0x6a2   : > { %v1026_v21 = vmul.f32 %v2919_v19, %v2913_v2  ;;  %v3313_v19 = vsel %vm872_vm3, %v590_v8, 0 }
 0x6a3   : > { %v634_v10 = vmul.f32 %v633_v20, %v3100_v24  ;;  %v588_v24 = vld [vmem:[%s3485_s9 + $0x4] sm:$0xf] }
 0x6a4   : > { %v1027_v23 = vpack.c.bf16 %v1026_v21, %v1026_v21 }
 0x6a5   : > { %v635_v25 = vadd.f32 %v634_v10, %v3103_v27  ;;  %v3259_v27 = vsel %vm872_vm3, %v588_v24, 0 }
 0x6a6   : > { %2677 = vmatmul.mubr.msk.bf16.vlgmr.msra.gmra.mrb[8].mxu1 %vm810_vm2, %v1027_v23 }
 0x6a7   : > { %v636_v26 = vpack.c.bf16 %v635_v25, %v635_v25  ;;  %2682 = vmatprep.mubr.msk.bf16.mxu1 %vm2951_vm1, %v2950_v9  ;;  %2681 = vmatpush3.bf16.msra.mxu1 %v3259_v27 }
 0x6a8   : > { %2698 = vmatprep.subr.bf16.mxu1 %v2950_v9 }
 0x6a9   : > { %2727 = vmatmul.mubr.msk.bf16.vlgmr.msra.gmra.mrb[32].mxu0 %vm591_vm0, %v636_v26 }
 0x6aa   : > { %2731 = vmatpush3.bf16.msra.mxu0 %v3110_v30  ;;  %2734 = vmatprep.mubr.msk.bf16.mxu0 %vm2951_vm1, %v2950_v9 }
 0x6ab   : > { %2732 = vmatprep.subr.bf16.mxu0 %v2950_v9 }
 0x6ae   : > { %2733 = vmatpush3.bf16.msra.mxu0 %v3117_v32 }
 0x6af   : > { %2746 = vmatprep.subr.bf16.mxu0 %v2950_v9 }
 0x6b1   : > { %2735 = vmatmul.mubr.msk.bf16.vlgmr.msra.gmra.mrb[36].mxu0 %vm591_vm0, %v636_v26 }
 0x6b2   : > { %2748 = vmatprep.mubr.msk.bf16.mxu0 %vm2951_vm1, %v2950_v9 }
 0x73c   : > { %v1229_v30 = vpop.f32.mrb[24].mxu0 }
 0x73d   : > { %v2696_v32 = vpop.f32.mrb[25].mxu0  ;;  %v1235_v58 = vpack.c.bf16 %v1229_v30, %v1229_v30 }
 0x73e   : > { %v1232_v28 = vpop.f32.mrb[26].mxu0 }
 0x73f   : > { %v2697_v29 = vpop.f32.mrb[27].mxu0 }
 0x744   : > { %v1327_v31 = vpop.f32.mrb[28].mxu0 }
 0x745   : > { %v1328_v35 = vadd.f32 %v1327_v31, %v3163_v54  ;;  %v2708_v36 = vpop.f32.mrb[29].mxu0 }
 0x746   : > { %v1330_v37 = vpop.f32.mrb[30].mxu0 }
 0x747   : > { %v2709_v38 = vpop.f32.mrb[31].mxu0  ;;  %v1333_v39 = vsel %vm810_vm2, %v1328_v35, -inf }
 0x748   : > { %1334 = vmax.xlane.f32.xlu0 %v1333_v39 }
 0x779   : > { %v1071_v43 = vpop.f32.mrb[8].mxu1 }
 0x77a   : > { %v1077_v45 = vpack.c.bf16 %v1071_v43, %v1071_v43  ;;  %v2678_v46 = vpop.f32.mrb[9].mxu1 }
 0x77b   : > { %v1074_v47 = vpop.f32.mrb[10].mxu1 }
 0x77c   : > { %v2679_v50 = vpop.f32.mrb[11].mxu1  ;;  %2683 = vmatmul.mubr.msk.bf16.vlgmr.msra.gmra.mrb[4].mxu1 %vm810_vm2, %v1077_v45  ;;  %v1479_v48 = vpop.f32.mrb[32].mxu0 }
 0x77d   : > { %v2728_v51 = vpop.f32.mrb[33].mxu0  ;;  %2699 = vmatpush3.bf16.msra.mxu1 %v3269_v40  ;;  %2700 = vmatprep.mubr.msk.bf16.mxu1 %vm2951_vm1, %v2950_v9  ;;  %v1485_v62 = vmul.f32 %v1479_v48, %v3146_v42 }
 0x77e   : > { %v1482_v52 = vpop.f32.mrb[34].mxu0  ;;  %2710 = vmatprep.subr.bf16.mxu1 %v2950_v9 }
 0x77f   : > { %v2729_v53 = vpop.f32.mrb[35].mxu0  ;;  %v3285_v63 = vpack.c.bf16 %v1485_v62, %v1485_v62 }
 0x784   : > { %v1521_v55 = vpop.f32.mrb[36].mxu0 }
 0x785   : > { %v3276_v56 = vpack.c.bf16 %v1521_v55, %v1521_v55  ;;  %v2736_v57 = vpop.f32.mrb[37].mxu0 }
 0x786   : > { %v1524_v59 = vpop.f32.mrb[38].mxu0 }
 0x787   : > { %v1576_v60 = vsel %vm810_vm2, %v3276_v56, 0  ;;  %v2737_v61 = vpop.f32.mrb[39].mxu0 }
 0x788   : > { %2701 = vmatmul.mubr.msk.bf16.vlgmr.msra.gmra.mrb[4].mxu1 %vm810_vm2, %v1235_v58  ;;  %2747 = vmatpush3.bf16.xpose.msra.mxu0 %v1576_v60 }
 0x789   : > { %2712 = vmatprep.mubr.msk.bf16.mxu1 %vm2951_vm1, %v2950_v9  ;;  %2758 = vmatprep.subr.bf16.mxu0 %v2950_v9 }
 0x78f   : > { %2749 = vmatmul.mubr.msk.bf16.vlgmr.msra.gmra.mrb[40].mxu0 %vm810_vm2, %v3285_v63 }
 0x790   : > { %2759 = vmatpush3.bf16.msra.mxu0 %v3193_v17  ;;  %2760 = vmatprep.mubr.msk.bf16.mxu0 %vm2951_vm1, %v2950_v9 }
 0x791   : > { %2770 = vmatprep.subr.bf16.mxu0 %v2950_v9 }
 0x7d5   : > { %v1335_v0 = vpop.xlane.xlu0 %1334 }
 0x7d6   : > { %v1336_v2 = vsub.f32 %v1328_v35, %v1335_v0 }
 0x7d8   : > { %v1337_v42 = vmul.f32 1.442695, %v1336_v2 }
 0x7da   : > { %2920 = vpow2.f32 %v1337_v42 }
 0x7e4   : > { %v2921_v3 = vpop.eup %2920 }
 0x7e5   : > { %v1339_v4 = vsel %vm810_vm2, %v2921_v3, 0.0 }
 0x7e6   : > { %1340 = vadd.xlane.f32.xlu1 %v1339_v4 }
 0x7f7   : > { %1345 = vrot.lane.b32.xlu1 %v3154_v49, %s2955_s28 }
 0x7fb   : > { %1725 = vrot.lane.b32.xlu1 %v3276_v56, %s2953_s25 }
 0x7ff   : > { %1881 = vrot.lane.b32.xlu1 %v3276_v56, %s2954_s22 }
 0x803   : > { %1879 = vrot.lane.b32.xlu1 %v3285_v63, %s2954_s22 }
 0x862   : > { %v1612_v17 = vpop.f32.mrb[40].mxu0 }
 0x863   : > { %v1613_v5 = vadd.f32 %v1612_v17, %v3163_v54  ;;  %v2750_v6 = vpop.f32.mrb[41].mxu0 }
 0x864   : > { %v1615_v7 = vpop.f32.mrb[42].mxu0 }
 0x865   : > { %v2751_v11 = vpop.f32.mrb[43].mxu0  ;;  %v1618_v12 = vsel %vm810_vm2, %v1613_v5, -inf }
 0x866   : > { %1619 = vmax.xlane.f32.xlu0 %v1618_v12 }
 0x873   : > { %v1341_v13 = vpop.xlane.xlu1 %1340 }
 0x874   : > { %2922 = vrcp.f32 %v1341_v13 }
 0x877   : > { %v1346_v49 = vpop.permute.xlu1 %1345 }
 0x878   : > { %v1351_v14 = vsel %vm872_vm3, %v1346_v49, 0 }
 0x879   : > { %2711 = vmatpush3.bf16.msra.mxu1 %v1351_v14 }
 0x87a   : > { %2716 = vmatprep.subr.bf16.mxu1 %v2950_v9 }
 0x87b   : > { %v1726_v48 = vpop.permute.xlu1 %1725 }
 0x87c   : > { %v1731_v51 = vsel %vm810_vm2, %v1726_v48, 0 }
 0x87e   : > { %v2923_v15 = vpop.eup %2922 }
 0x87f   : > { %v1343_v16 = vmul.f32 %v2923_v15, %v2921_v3  ;;  %v1882_v52 = vpop.permute.xlu1 %1881 }
 0x880   : > { %v1887_v55 = vsel %vm810_vm2, %v1882_v52, 0 }
 0x881   : > { %v1344_v18 = vpack.c.bf16 %v1343_v16, %v1343_v16 }
 0x883   : > { %2713 = vmatmul.mubr.msk.bf16.vlgmr.msra.gmra.mrb[12].mxu1 %vm810_vm2, %v1344_v18  ;;  %v1880_v57 = vpop.permute.xlu1 %1879 }
 0x884   : > { %2718 = vmatprep.mubr.msk.bf16.mxu1 %vm2951_vm1, %v2950_v9  ;;  %2717 = vmatpush3.bf16.msra.mxu1 %v3313_v19 }
 0x885   : > { %2738 = vmatprep.subr.bf16.mxu1 %v2950_v9 }
 0x8f3   : > { %v1620_v20 = vpop.xlane.xlu0 %1619 }
 0x8f4   : > { %v1621_v21 = vsub.f32 %v1613_v5, %v1620_v20 }
 0x8f6   : > { %v1622_v10 = vmul.f32 1.442695, %v1621_v21 }
 0x8f8   : > { %2924 = vpow2.f32 %v1622_v10 }
 0x902   : > { %v2925_v23 = vpop.eup %2924 }
 0x903   : > { %v1624_v25 = vsel %vm810_vm2, %v2925_v23, 0.0 }
 0x904   : > { %1625 = vadd.xlane.f32.xlu0 %v1624_v25 }
 0x91a   : > { %1722 = vrot.lane.b32.xlu0 %v3285_v63, %s2953_s25 }
 0x956   : > { %v1387_v26 = vpop.f32.mrb[12].mxu1 }
 0x957   : > { %v1393_v24 = vpack.c.bf16 %v1387_v26, %v1387_v26  ;;  %v2714_v30 = vpop.f32.mrb[13].mxu1 }
 0x958   : > { %v1390_v32 = vpop.f32.mrb[14].mxu1 }
 0x959   : > { %v2715_v28 = vpop.f32.mrb[15].mxu1  ;;  %2719 = vmatmul.mubr.msk.bf16.vlgmr.msra.gmra.mrb[4].mxu1 %vm810_vm2, %v1393_v24 }
 0x95a   : > { %2739 = vmatpush3.bf16.msra.mxu1 %v3126_v33  ;;  %2742 = vmatprep.mubr.msk.bf16.mxu1 %vm2951_vm1, %v2950_v9 }
 0x95b   : > { %2740 = vmatprep.subr.bf16.mxu1 %v2950_v9 }
 0x95e   : > { %2741 = vmatpush3.bf16.msra.mxu1 %v3134_v34 }
 0x95f   : > { %2752 = vmatprep.subr.bf16.mxu1 %v2950_v9 }
 0x991   : > { %v1626_v33 = vpop.xlane.xlu0 %1625 }
 0x992   : > { %2926 = vrcp.f32 %v1626_v33 }
 0x995   : > { %v1723_v53 = vpop.permute.xlu0 %1722 }
 0x99c   : > { %v2927_v39 = vpop.eup %2926 }
 0x99d   : > { %v1628_v43 = vmul.f32 %v2927_v39, %v2925_v23 }
 0x99f   : > { %v1629_v50 = vpack.c.bf16 %v1628_v43, %v1628_v43 }
 0xa2c   : > { %v1434_v29 = vpop.f32.mrb[4].mxu1 }
 0xa2d   : > { %v2846_v31 = vadd.f32 %v1434_v29, %v3058_v1  ;;  %v2720_v35 = vpop.f32.mrb[5].mxu1 }
 0xa2e   : > { %v1437_v36 = vpop.f32.mrb[6].mxu1 }
 0xa2f   : > { %v1441_v37 = vpack.c.bf16 %v2846_v31, %v2846_v31  ;;  %v2721_v38 = vpop.f32.mrb[7].mxu1 }
 0xa31   : > { %2743 = vmatmul.mubr.msk.bf16.vlgmr.msra.gmra.mrb[16].mxu1 %vm591_vm0, %v1441_v37 }
 0xa32   : > { %2754 = vmatprep.mubr.msk.bf16.mxu1 %vm2951_vm1, %v2950_v9 }
 0xb04   : > { %v1565_v41 = vpop.f32.mrb[16].mxu1 }
 0xb05   : > { %v3331_v34 = vpack.c.bf16 %v1565_v41, %v1565_v41  ;;  %v2744_v45 = vpop.f32.mrb[17].mxu1 }
 0xb06   : > { %v1568_v46 = vpop.f32.mrb[18].mxu1 }
 0xb07   : > { %v2745_v47 = vpop.f32.mrb[19].mxu1  ;;  %v1634_v1 = vsel %vm872_vm3, %v3331_v34, 0 }
 0xb08   : > { %2753 = vmatpush3.bf16.msra.mxu1 %v1634_v1 }
 0xb09   : > { %2764 = vmatprep.subr.bf16.mxu1 %v2950_v9 }
 0xb0b   : > { %2755 = vmatmul.mubr.msk.bf16.vlgmr.msra.gmra.mrb[20].mxu1 %vm810_vm2, %v1629_v50 }
 0xb0c   : > { %2766 = vmatprep.mubr.msk.bf16.mxu1 %vm2951_vm1, %v2950_v9 }
 0xb11   : > { %2765 = vmatpush3.bf16.xpose.msra.mxu1 %v1731_v51 }
 0xb12   : > { %2782 = vmatprep.subr.bf16.mxu1 %v2950_v9 }
 0xb18   : > { %2767 = vmatmul.mubr.msk.bf16.vlgmr.msra.gmra.mrb[24].mxu1 %vm810_vm2, %v1723_v53 }
 0xb19   : > { %2783 = vmatpush3.bf16.xpose.msra.mxu1 %v1887_v55  ;;  %2784 = vmatprep.mubr.msk.bf16.mxu1 %vm2951_vm1, %v2950_v9 }
 0xb1a   : > { %2788 = vmatprep.subr.bf16.mxu1 %v2950_v9 }
 0xb20   : > { %2785 = vmatmul.mubr.msk.bf16.vlgmr.msra.gmra.mrb[28].mxu1 %vm810_vm2, %v1880_v57 }
 0xb21   : > { %2790 = vmatprep.mubr.msk.bf16.mxu1 %vm2951_vm1, %v2950_v9 }
 0xbde   : > { %v1670_v58 = vpop.f32.mrb[20].mxu1 }
 0xbdf   : > { %v1676_v59 = vpack.c.bf16 %v1670_v58, %v1670_v58  ;;  %v2756_v60 = vpop.f32.mrb[21].mxu1 }
 0xbe0   : > { %v1673_v61 = vpop.f32.mrb[22].mxu1 }
 0xbe1   : > { %v2757_v62 = vpop.f32.mrb[23].mxu1  ;;  %2761 = vmatmul.mubr.msk.bf16.vlgmr.msra.gmra.mrb[44].mxu0 %vm810_vm2, %v1676_v59 }
 0xbe2   : > { %2772 = vmatprep.mubr.msk.bf16.mxu0 %vm2951_vm1, %v2950_v9 }
 0xbeb   : > { %v1767_v0 = vpop.f32.mrb[24].mxu1 }
 0xbec   : > { %v2768_v2 = vpop.f32.mrb[25].mxu1  ;;  %v1768_v12 = vadd.f32 %v1767_v0, %v3163_v54 }
 0xbed   : > { %v1770_v42 = vpop.f32.mrb[26].mxu1 }
 0xbee   : > { %v2769_v3 = vpop.f32.mrb[27].mxu1  ;;  %v1773_v13 = vsel %vm810_vm2, %v1768_v12, -inf }
 0xbf3   : > { %v1923_v4 = vpop.f32.mrb[28].mxu1 }
 0xbf4   : > { %v1924_v17 = vadd.f32 %v1923_v4, %v3163_v54  ;;  %v2786_v5 = vpop.f32.mrb[29].mxu1 }
 0xbf5   : > { %v1926_v6 = vpop.f32.mrb[30].mxu1 }
 0xbf6   : > { %v2787_v7 = vpop.f32.mrb[31].mxu1  ;;  %v1929_v11 = vsel %vm810_vm2, %v1924_v17, -inf }
 0xbf7   : > { %1930 = vmax.xlane.f32.xlu1 %v1929_v11 }
 0xc08   : > { %1941 = vrot.lane.b32.xlu1 %v3331_v34, %s2954_s22 }
 0xc0c   : > { %2034 = vrot.lane.b32.xlu1 %v3285_v63, %s2955_s28 }
 0xc30   : > { %1774 = vmax.xlane.f32.xlu1 %v1773_v13 }
 0xc41   : > { %1786 = vrot.lane.b32.xlu1 %v3331_v34, %s2953_s25 }
 0xc84   : > { %v1931_v49 = vpop.xlane.xlu1 %1930 }
 0xc85   : > { %v1932_v14 = vsub.f32 %v1924_v17, %v1931_v49 }
 0xc87   : > { %v1933_v15 = vmul.f32 1.442695, %v1932_v14 }
 0xc88   : > { %v1942_v16 = vpop.permute.xlu1 %1941 }
 0xc89   : > { %2928 = vpow2.f32 %v1933_v15  ;;  %v1947_v18 = vsel %vm872_vm3, %v1942_v16, 0 }
 0xc8a   : > { %2789 = vmatpush3.bf16.msra.mxu1 %v1947_v18 }
 0xc8b   : > { %2800 = vmatprep.subr.bf16.mxu1 %v2950_v9 }
 0xc8c   : > { %v2035_v20 = vpop.permute.xlu1 %2034 }
 0xc93   : > { %v2929_v8 = vpop.eup %2928 }
 0xc94   : > { %v1935_v63 = vsel %vm810_vm2, %v2929_v8, 0.0 }
 0xc95   : > { %1936 = vadd.xlane.f32.xlu0 %v1935_v63 }
 0xcab   : > { %2036 = vrot.lane.b32.xlu0 %v3276_v56, %s2955_s28 }
 0xcbd   : > { %v1775_v21 = vpop.xlane.xlu1 %1774 }
 0xcbe   : > { %v1776_v10 = vsub.f32 %v1768_v12, %v1775_v21 }
 0xcc0   : > { %v1777_v23 = vmul.f32 1.442695, %v1776_v10 }
 0xcc1   : > { %v1787_v25 = vpop.permute.xlu1 %1786 }
 0xcc2   : > { %2930 = vpow2.f32 %v1777_v23  ;;  %v1792_v26 = vsel %vm872_vm3, %v1787_v25, 0  ;;  %v2202_v25 = vld [vmem:[%s3486_s10] sm:$0x1] }
 0xcc3   : > { %2771 = vmatpush3.bf16.msra.mxu0 %v1792_v26  ;;  %v2209_v26 = vld [vmem:[%s3487_s11] sm:$0x1] }
 0xcc4   : > { %2776 = vmatprep.subr.bf16.mxu0 %v2950_v9 }
 0xccc   : > { %v2931_v24 = vpop.eup %2930 }
 0xccd   : > { %v1779_v30 = vsel %vm810_vm2, %v2931_v24, 0.0 }
 0xcce   : > { %1780 = vadd.xlane.f32.xlu0 %v1779_v30  ;;  %v2210_v30 = vunpack.c.l.bf16 %v2209_v26 }
 0xd22   : > { %v1937_v32 = vpop.xlane.xlu0 %1936 }
 0xd23   : > { %2932 = vrcp.f32 %v1937_v32 }
 0xd26   : > { %v2037_v56 = vpop.permute.xlu0 %2036 }
 0xd27   : > { %v2042_v35 = vsel %vm810_vm2, %v2037_v56, 0  ;;  %v2214_v56 = vrot.slane %v2210_v30, %v3097_v22 }
 0xd2d   : > { %v2933_v28 = vpop.eup %2932 }
 0xd2e   : > { %v1939_v29 = vmul.f32 %v2933_v28, %v2929_v8 }
 0xd30   : > { %v1940_v31 = vpack.c.bf16 %v1939_v29, %v1939_v29 }
 0xd32   : > { %2791 = vmatmul.mubr.msk.bf16.vlgmr.msra.gmra.mrb[32].mxu1 %vm810_vm2, %v1940_v31 }
 0xd33   : > { %2801 = vmatpush3.bf16.xpose.msra.mxu1 %v2042_v35  ;;  %2802 = vmatprep.mubr.msk.bf16.mxu1 %vm2951_vm1, %v2950_v9 }
 0xd34   : > { %2818 = vmatprep.subr.bf16.mxu1 %v2950_v9 }
 0xd3a   : > { %2803 = vmatmul.mubr.msk.bf16.vlgmr.msra.gmra.mrb[36].mxu1 %vm810_vm2, %v2035_v20  ;;  %v2895_v20 = vld [vmem:[%s3488_s12 + $0x8] sm:$0xff]  }
 0xd3b   : > { %2822 = vmatprep.mubr.msk.bf16.mxu1 %vm2951_vm1, %v2950_v9 }
 0xd5b   : > { %v1781_v36 = vpop.xlane.xlu0 %1780 }
 0xd5c   : > { %2934 = vrcp.f32 %v1781_v36  ;;  %v2896_v36 = vld [vmem:[%s3490_s14] sm:$0xff]  }
 0xd66   : > { %v2935_v37 = vpop.eup %2934 }
 0xd67   : > { %v1783_v38 = vmul.f32 %v2935_v37, %v2931_v24  ;;  %v2203_v24 = vunpack.c.l.bf16 %v2202_v25 }
 0xd69   : > { %v1784_v33 = vpack.c.bf16 %v1783_v38, %v1783_v38  ;;  %v2207_v32 = vrot.slane %v2203_v24, %v3097_v22  ;;  %v2897_v38 = vld [vmem:[%s3490_s14 + $0x8] sm:$0xff]  }
 0xd6b   : > { %2773 = vmatmul.mubr.msk.bf16.vlgmr.msra.gmra.mrb[48].mxu0 %vm810_vm2, %v1784_v33  ;;  %v2898_v33 = vld [vmem:[%s3490_s14 + $0x10] sm:$0xff]  }
 0xd6c   : > { %2777 = vmatpush3.bf16.msra.mxu0 %v3259_v27  ;;  %2778 = vmatprep.mubr.msk.bf16.mxu0 %vm2951_vm1, %v2950_v9 }
 0xd6d   : > { %2794 = vmatprep.subr.bf16.mxu0 %v2950_v9 }
 0xe05   : > { %v1983_v39 = vpop.f32.mrb[32].mxu1 }
 0xe06   : > { %v2792_v41 = vpop.f32.mrb[33].mxu1 }
 0xe07   : > { %v1986_v43 = vpop.f32.mrb[34].mxu1  ;;  %v2900_v41 = vld [vmem:[%s3490_s14 + $0x20] sm:$0xff]  }
 0xe08   : > { %v2793_v45 = vpop.f32.mrb[35].mxu1  ;;  %v2901_v43 = vld [vmem:[%s3490_s14 + $0x28] sm:$0xff]  }
 0xe09   : > { %v2902_v45 = vld [vmem:[%s3490_s14 + $0x30] sm:$0xff]  }
 0xe0d   : > { %v2078_v46 = vpop.f32.mrb[36].mxu1 }
 0xe0e   : > { %v2079_v47 = vadd.f32 %v2078_v46, %v3163_v54  ;;  %v2804_v1 = vpop.f32.mrb[37].mxu1  ;;  %v1989_v54 = vpack.c.bf16 %v1983_v39, %v1983_v39  ;;  %v2899_v39 = vld [vmem:[%s3490_s14 + $0x18] sm:$0xff]  }
 0xe0f   : > { %v2081_v50 = vpop.f32.mrb[38].mxu1  ;;  %v2903_v46 = vld [vmem:[%s3490_s14 + $0x38] sm:$0xff]  }
 0xe10   : > { %v2805_v48 = vpop.f32.mrb[39].mxu1  ;;  %v2084_v51 = vsel %vm810_vm2, %v2079_v47, -inf }
 0xe11   : > { %2085 = vmax.xlane.f32.xlu0 %v2084_v51 }
 0xe3e   : > { %v1828_v52 = vpop.f32.mrb[48].mxu0 }
 0xe3f   : > { %v1834_v27 = vpack.c.bf16 %v1828_v52, %v1828_v52  ;;  %v2774_v53 = vpop.f32.mrb[49].mxu0 }
 0xe40   : > { %v1831_v55 = vpop.f32.mrb[50].mxu0 }
 0xe41   : > { %v2775_v57 = vpop.f32.mrb[51].mxu0  ;;  %2779 = vmatmul.mubr.msk.bf16.vlgmr.msra.gmra.mrb[44].mxu0 %vm810_vm2, %v1834_v27 }
 0xe42   : > { %2795 = vmatpush3.bf16.msra.mxu0 %v3269_v40  ;;  %2796 = vmatprep.mubr.msk.bf16.mxu0 %vm2951_vm1, %v2950_v9 }
 0xe43   : > { %2806 = vmatprep.subr.bf16.mxu0 %v2950_v9 }
 0xe4d   : > { %2797 = vmatmul.mubr.msk.bf16.vlgmr.msra.gmra.mrb[44].mxu0 %vm810_vm2, %v1989_v54  ;;  %v2302_v54 = vld [vmem:[%s3491_s15] sm:$0x1] }
 0xe4e   : > { %2808 = vmatprep.mubr.msk.bf16.mxu0 %vm2951_vm1, %v2950_v9 }
 0xe9e   : > { %v2086_v58 = vpop.xlane.xlu0 %2085 }
 0xe9f   : > { %v2087_v59 = vsub.f32 %v2079_v47, %v2086_v58  ;;  %v2221_v47 = vld [vmem:[%s3489_s13] sm:$0x1]  ;;  %v2303_v58 = vunpack.c.l.bf16 %v2302_v54 }
 0xea0   : > { %v2222_v1 = vunpack.c.l.bf16 %v2221_v47 }
 0xea1   : > { %v2088_v60 = vmul.f32 1.442695, %v2087_v59  ;;  %v2307_v59 = vrot.slane %v2303_v58, %v3097_v22 }
 0xea2   : > { %v2226_v50 = vrot.slane %v2222_v1, %v3097_v22 }
 0xea3   : > { %2936 = vpow2.f32 %v2088_v60 }
 0xead   : > { %v2937_v61 = vpop.eup %2936 }
 0xeae   : > { %v2090_v62 = vsel %vm810_vm2, %v2937_v61, 0.0 }
 0xeaf   : > { %2091 = vadd.xlane.f32.xlu0 %v2090_v62 }
 0xec5   : > { %2096 = vrot.lane.b32.xlu0 %v3331_v34, %s2955_s28 }
 0xf3c   : > { %v2092_v40 = vpop.xlane.xlu0 %2091 }
 0xf3d   : > { %2938 = vrcp.f32 %v2092_v40 }
 0xf40   : > { %v2097_v0 = vpop.permute.xlu0 %2096 }
 0xf41   : > { %v2102_v2 = vsel %vm872_vm3, %v2097_v0, 0 }
 0xf42   : > { %2807 = vmatpush3.bf16.msra.mxu0 %v2102_v2 }
 0xf43   : > { %2812 = vmatprep.subr.bf16.mxu0 %v2950_v9 }
 0xf47   : > { %v2939_v42 = vpop.eup %2938 }
 0xf48   : > { %v2094_v3 = vmul.f32 %v2939_v42, %v2937_v61 }
 0xf4a   : > { %v2095_v4 = vpack.c.bf16 %v2094_v3, %v2094_v3 }
 0xf4c   : > { %2809 = vmatmul.mubr.msk.bf16.vlgmr.msra.gmra.mrb[52].mxu0 %vm810_vm2, %v2095_v4 }
 0xf4d   : > { %2813 = vmatpush3.bf16.msra.mxu0 %v3313_v19  ;;  %2814 = vmatprep.mubr.msk.bf16.mxu0 %vm2951_vm1, %v2950_v9 }
0x101f   : > { %v2138_v17 = vpop.f32.mrb[52].mxu0 }
0x1020   : > { %v2144_v34 = vpack.c.bf16 %v2138_v17, %v2138_v17  ;;  %v2810_v5 = vpop.f32.mrb[53].mxu0 }
0x1021   : > { %v2141_v6 = vpop.f32.mrb[54].mxu0 }
0x1022   : > { %v2811_v7 = vpop.f32.mrb[55].mxu0  ;;  %2815 = vmatmul.mubr.msk.bf16.vlgmr.msra.gmra.mrb[44].mxu0 %vm810_vm2, %v2144_v34 }
0x10f5   : > { %v2182_v11 = vpop.f32.mrb[44].mxu0 }
0x10f6   : > { %v3404_v12 = vadd.f32 %v2182_v11, %v3213_v44  ;;  %v2816_v13 = vpop.f32.mrb[45].mxu0  ;;  %v2894_v44 = vld [vmem:[%s3488_s12] sm:$0xff]  }
0x10f7   : > { %v2185_v49 = vpop.f32.mrb[46].mxu0  ;;  %2819 = vmatpush3.bf16.msra.mxu1 %v2894_v44 }
0x10f8   : > { %v2817_v14 = vpop.f32.mrb[47].mxu0  ;;  %v2189_v19 = vsel %vm591_vm0, %v3404_v12, 0.0  ;;  %2820 = vmatprep.subr.bf16.mxu1 %v2950_v9 }
0x10f9   : > { %2190 = vadd.xlane.f32.xlu1 %v2189_v19 }
0x10fb   : > { %2821 = vmatpush3.bf16.msra.mxu1 %v2895_v20 }
0x10fc   : > { %2826 = vmatprep.subr.bf16.mxu1 %v2950_v9 }
0x1186   : > { %v2191_v15 = vpop.xlane.xlu1 %2190 }
0x1187   : > { %v2192_v16 = vmul.f32 0.03125, %v2191_v15 }
0x1189   : > { %v2193_v18 = vsub.f32 %v3404_v12, %v2192_v16 }
0x118b   : > { %v2194_v8 = vmul.f32 %v2193_v18, %v2193_v18 }
0x118d   : > { %v2195_v63 = vsel %vm591_vm0, %v2194_v8, 0.0 }
0x118e   : > { %2196 = vadd.xlane.f32.xlu0 %v2195_v63 }
0x121b   : > { %v2197_v21 = vpop.xlane.xlu0 %2196 }
0x121c   : > { %v2198_v10 = vmul.f32 0.03125, %v2197_v21 }
0x121e   : > { %v2199_v23 = vadd.f32 1e-05, %v2198_v10 }
0x1220   : > { %2940 = vrsqrt.f32 %v2199_v23 }
0x122a   : > { %v2941_v28 = vpop.eup %2940 }
0x122b   : > { %v2201_v29 = vmul.f32 %v2941_v28, %v2193_v18 }
0x122d   : > { %v2208_v31 = vmul.f32 %v2207_v32, %v2201_v29 }
0x122f   : > { %v2215_v35 = vadd.f32 %v2214_v56, %v2208_v31 }
0x1231   : > { %v2216_v37 = vpack.c.bf16 %v2215_v35, %v2215_v35 }
0x1233   : > { %2823 = vmatmul.mubr.msk.bf16.vlgmr.msra.gmra.mrb[40].mxu1 %vm591_vm0, %v2216_v37 }
0x1234   : > { %2827 = vmatpush3.bf16.msra.mxu1 %v2896_v36  ;;  %2842 = vmatprep.mubr.msk.bf16.mxu1 %vm2951_vm1, %v2950_v9 }
0x1235   : > { %2828 = vmatprep.subr.bf16.mxu1 %v2950_v9 }
0x1238   : > { %2829 = vmatpush3.bf16.msra.mxu1 %v2897_v38 }
0x1239   : > { %2830 = vmatprep.subr.bf16.mxu1 %v2950_v9 }
0x123c   : > { %2831 = vmatpush3.bf16.msra.mxu1 %v2898_v33 }
0x123d   : > { %2832 = vmatprep.subr.bf16.mxu1 %v2950_v9 }
0x1240   : > { %2833 = vmatpush3.bf16.msra.mxu1 %v2899_v39 }
0x1241   : > { %2834 = vmatprep.subr.bf16.mxu1 %v2950_v9 }
0x1244   : > { %2835 = vmatpush3.bf16.msra.mxu1 %v2900_v41 }
0x1245   : > { %2836 = vmatprep.subr.bf16.mxu1 %v2950_v9 }
0x1248   : > { %2837 = vmatpush3.bf16.msra.mxu1 %v2901_v43 }
0x1249   : > { %2838 = vmatprep.subr.bf16.mxu1 %v2950_v9 }
0x124c   : > { %2839 = vmatpush3.bf16.msra.mxu1 %v2902_v45 }
0x124d   : > { %2840 = vmatprep.subr.bf16.mxu1 %v2950_v9 }
0x1250   : > { %2841 = vmatpush3.bf16.msra.mxu1 %v2903_v46 }
0x1306   : > { %v2276_v48 = vpop.f32.mrb[40].mxu1 }
0x1307   : > { %v2277_v51 = vadd.f32 %v2276_v48, %v2226_v50  ;;  %v2824_v52 = vpop.f32.mrb[41].mxu1 }
0x1308   : > { %v2279_v27 = vpop.f32.mrb[42].mxu1 }
0x1309   : > { %vm2282_vm4 = vcmp.ge.f32.partialorder %v2277_v51, 0.0  ;;  %v2283_v53 = vmul.f32 0.01, %v2277_v51  ;;  %v2825_v9 = vpop.f32.mrb[43].mxu1 }
0x130b   : > { %v2284_v55 = vsel %vm2282_vm4, %v2277_v51, %v2283_v53 }
0x130c   : > { %v2285_v57 = vpack.c.bf16 %v2284_v55, %v2284_v55 }
0x130e   : > { %2843 = vmatmul.mubr.bf16.vlgmr.msra.gmra.mrb[44].mxu1 %v2285_v57 }
0x13e1   : > { %v2390_v60 = vpop.f32.mrb[44].mxu1 }
0x13e2   : > { %v2391_v61 = vadd.f32 %v2390_v60, %v2307_v59  ;;  %v2844_v62 = vpop.f32.mrb[45].mxu1 }
0x13e3   : > { %v2393_v40 = vpop.f32.mrb[46].mxu1 }
0x13e4   : > { %v2396_v0 = vadd.f32 %v3404_v12, %v2391_v61  ;;  %v2845_v2 = vpop.f32.mrb[47].mxu1 }
0x13e6   : > { %v2397_v42 = vpack.c.bf16 %v2396_v0, %v2396_v0 }
0x13e8   : > { %2399 = vst.msk [vmem:[%s567_s30] sm:$0xf] %vm2398_vm5, %v2397_v42 }
0x13e9 PF: > { %s26_s21 = sadd.s32 1, %s2948_s21  }
0x13ea   : > { %p23_p4 = scmp.ge.s32.totalorder %s26_s21, 4  }
0x13ec   :  { %25 = sbr.rel (!%p23_p4) target bundleno = 2 (0x2), region = 123 }

</bundles_post_ra>
